<compile_context>
chip_gen: v6e
topology: v6e:2x2x1
jax: 0.10.0
libtpu: 0.0.40
codegen_flags: <defaults>
</compile_context>

<pallas_src>
import functools
import math

import numpy as np
import jax
import jax.numpy as jnp
from jax.experimental import pallas as pl
from jax.experimental.pallas import tpu as pltpu

LANE = 128


def _round_up(v, m):
    return ((v + m - 1) // m) * m


def _block_diag_mask(n_seq, sp, s):
    """(R,R) additive f32 mask: 0 where key is in the same sequence and is a
    real (non-padded) token, -1e30 otherwise."""
    r = np.arange(n_seq * sp)
    same_seq = (r[:, None] // sp) == (r[None, :] // sp)
    valid_key = (r[None, :] % sp) < s
    return jnp.asarray(np.where(same_seq & valid_key, 0.0, -1e30), dtype=jnp.float32)


# ----------------------------------------------------------------------------
# The single fused Pallas kernel (one grid program per batch element)
# ----------------------------------------------------------------------------

def _ht_kernel(
    patches_ref,       # (1, F*NP, patch_dim) f32  -- this batch element
    smask_ref,          # (R_s, R_s) f32  block-diagonal attention mask (space)
    tmask_ref,           # (R_t, R_t) f32  block-diagonal attention mask (time)
    patch_w_ref,        # (patch_dim, dim) bf16
    patch_b_ref,        # (1, dim) f32
    # --- space group --------------------------------------------------------
    s_pos_ref,          # (NP, dim) f32 : positional embedding for patch tokens
    s_aggpos_ref,       # (1, dim)  f32 : agg token + its positional embedding
    s_wqkv_ref,         # (L, dim, heads*3*128) bf16  head-major, 128-lane padded
    s_bqkv_ref,         # (L, 1, heads*3*128)   f32
    s_wo_ref,           # (L, heads, 128, dim)  bf16  per-head rows, zero padded
    s_bo_ref,           # (L, 1, dim) f32
    s_wm1_ref, s_bm1_ref,   # (L, dim, mlp) bf16 / (L, 1, mlp) f32
    s_wm2_ref, s_bm2_ref,   # (L, mlp, dim) bf16 / (L, 1, dim) f32
    # --- time group ---------------------------------------------------------
    t_pos_ref, t_aggpos_ref,
    t_wqkv_ref, t_bqkv_ref, t_wo_ref, t_bo_ref,
    t_wm1_ref, t_bm1_ref, t_wm2_ref, t_bm2_ref,
    head_w_ref,         # (dim, num_classes) f32
    head_b_ref,         # (1, num_classes)   f32
    out_ref,            # (1, 8, 128) f32 lane-dense output block
    xbuf,               # VMEM scratch (max_rows, dim) f32 : resident activations
    *, F, NP, dim, heads, head_dim, num_classes,
):
    SP_s = _round_up(NP + 1, 8)       # padded per-sequence length (space)
    SP_t = _round_up(F + 1, 8)        # padded per-sequence length (time)
    R_s = F * SP_s                    # total space rows for this batch element
    R_t = SP_t                        # total time rows (one sequence)
    scale = 1.0 / math.sqrt(head_dim)

    def mm(a, w):
        # MXU matmul with f32 accumulation; activations cast to weight dtype.
        return jax.lax.dot_general(
            a.astype(w.dtype), w, (((1,), (0,)), ((), ())),
            preferred_element_type=jnp.float32)

    def layernorm(x):
        # affine (gamma/beta) already folded into the following linear.
        mu = jnp.mean(x, axis=-1, keepdims=True)
        xc = x - mu
        var = jnp.mean(xc * xc, axis=-1, keepdims=True)
        return xc * jax.lax.rsqrt(var + 1e-5)

    def gelu(y):  # tanh-approx GELU (EUP), f32
        c = math.sqrt(2.0 / math.pi)
        return 0.5 * y * (1.0 + jnp.tanh(c * (y + 0.044715 * y * y * y)))

    def run_group(R, mask, wqkv_ref, bqkv_ref, wo_ref, bo_ref,
                  wm1_ref, bm1_ref, wm2_ref, bm2_ref):
        """Pre-LN transformer over xbuf[0:R, :].  All sequences of the group
        are processed together; `mask` is block-diagonal and also masks padded
        key columns.  Padded rows become non-zero across layers but are never
        read as agg tokens and never attended to."""
        L = wqkv_ref.shape[0]
        for l in range(L):
            # ---- attention sub-block: one batched block-diagonal attention --
            x = xbuf[pl.ds(0, R), :]                             # (R, dim) f32
            qkv = (mm(layernorm(x), wqkv_ref[l]) + bqkv_ref[l]
                   ).astype(jnp.bfloat16)                        # single bf16 cast
            acc = jnp.zeros((R, dim), jnp.float32)
            for hh in range(heads):
                b0 = hh * 3 * LANE                               # lane-aligned slices
                q = qkv[:, b0:b0 + LANE]
                k = qkv[:, b0 + LANE:b0 + 2 * LANE]
                v = qkv[:, b0 + 2 * LANE:b0 + 3 * LANE]
                s = jax.lax.dot_general(q, k, (((1,), (1,)), ((), ())),
                                        preferred_element_type=jnp.float32)
                s = s * scale + mask                             # f32 masking
                s = s - jnp.max(s, axis=-1, keepdims=True)
                p = jnp.exp(s)
                p = p * pl.reciprocal(jnp.sum(p, axis=-1, keepdims=True),
                                      approx=True)
                pv = jax.lax.dot_general(p.astype(jnp.bfloat16), v,
                                         (((1,), (0,)), ((), ())),
                                         preferred_element_type=jnp.float32)
                # per-head output-projection accumulation (no lane concat)
                acc = acc + jax.lax.dot_general(
                    pv.astype(jnp.bfloat16), wo_ref[l, hh],
                    (((1,), (0,)), ((), ())),
                    preferred_element_type=jnp.float32)
            xbuf[pl.ds(0, R), :] = x + acc + bo_ref[l]           # one aligned store
            # ---- MLP sub-block (pre-LN), fused residual ---------------------
            x2 = xbuf[pl.ds(0, R), :]
            h2 = gelu(mm(layernorm(x2), wm1_ref[l]) + bm1_ref[l])
            xbuf[pl.ds(0, R), :] = x2 + mm(h2, wm2_ref[l]) + bm2_ref[l]

    # --- patch embedding (all frames / patches of this batch element) -------
    tok = mm(patches_ref[0], patch_w_ref[...]) + patch_b_ref[...]   # (F*NP, dim)

    # --- space sequences: [patch tokens + pos | agg token | zero pad] -------
    s_pos = s_pos_ref[...]
    s_agg = s_aggpos_ref[...]
    seqs = []
    for fi in range(F):
        parts = [tok[fi * NP:(fi + 1) * NP, :] + s_pos, s_agg]
        if SP_s > NP + 1:
            parts.append(jnp.zeros((SP_s - NP - 1, dim), jnp.float32))
        seqs.append(jnp.concatenate(parts, axis=0))
    xbuf[pl.ds(0, R_s), :] = jnp.concatenate(seqs, axis=0)          # one chunked store

    run_group(R_s, smask_ref[...],
              s_wqkv_ref, s_bqkv_ref, s_wo_ref, s_bo_ref,
              s_wm1_ref, s_bm1_ref, s_wm2_ref, s_bm2_ref)

    # --- gather per-frame space agg tokens -> one time sequence -------------
    frames = jnp.concatenate(
        [xbuf[pl.ds(fi * SP_s + NP, 1), :] for fi in range(F)], axis=0)   # (F, dim)
    parts = [frames + t_pos_ref[...], t_aggpos_ref[...]]
    if SP_t > F + 1:
        parts.append(jnp.zeros((SP_t - F - 1, dim), jnp.float32))
    xbuf[pl.ds(0, R_t), :] = jnp.concatenate(parts, axis=0)

    run_group(R_t, tmask_ref[...],
              t_wqkv_ref, t_bqkv_ref, t_wo_ref, t_bo_ref,
              t_wm1_ref, t_bm1_ref, t_wm2_ref, t_bm2_ref)

    # --- classification head + log_softmax, lane-dense (8,128) output -------
    cls = xbuf[pl.ds(F, 1), :]                                       # time agg token
    logits = mm(cls, head_w_ref[...]) + head_b_ref[...]              # (1, C)
    z = logits - jnp.max(logits, axis=-1, keepdims=True)
    logp = z - jnp.log(jnp.sum(jnp.exp(z), axis=-1, keepdims=True))
    row = jnp.concatenate(
        [logp, jnp.zeros((1, LANE - num_classes), jnp.float32)], axis=1)
    out_ref[0] = jnp.concatenate([row, jnp.zeros((7, LANE), jnp.float32)], axis=0)


# ----------------------------------------------------------------------------
# Wrapper: patch rearrange (pure layout, done once in XLA) + the fused kernel
# ----------------------------------------------------------------------------

def hierarchical_transformer_forward(x, packed, cfg):
    b, f, H, W, c = x.shape
    p = cfg["patch_size"]
    dim = cfg["dim"]
    nc = cfg["num_classes"]
    nh, nw = H // p, W // p
    NP = nh * nw
    patch_dim = p * p * c

    # x.permute(0,4,1,2,3) + Rearrange('b c f (h p1) (w p2) -> b f (h w) (p1 p2 c)')
    x_ncfhw = jnp.transpose(x, (0, 4, 1, 2, 3))
    xr = x_ncfhw.reshape(b, c, f, nh, p, nw, p)
    xr = jnp.transpose(xr, (0, 2, 3, 5, 4, 6, 1))       # b f h w p1 p2 c
    patches = xr.reshape(b, f * NP, patch_dim)

    SP_s = _round_up(NP + 1, 8)
    SP_t = _round_up(f + 1, 8)
    R_s = f * SP_s
    R_t = SP_t
    max_rows = max(R_s, R_t)

    smask = _block_diag_mask(f, SP_s, NP + 1)            # (R_s, R_s)
    tmask = _block_diag_mask(1, SP_t, f + 1)             # (R_t, R_t)

    args = (patches, smask, tmask,
            packed["patch_w"], packed["patch_b"],
            *packed["space"], *packed["time"],
            packed["head_w"], packed["head_b"])

    in_specs = [pl.BlockSpec((1, f * NP, patch_dim), lambda i: (i, 0, 0))]
    in_specs += [pl.BlockSpec(a.shape, lambda i, n=a.ndim: (0,) * n)
                 for a in args[1:]]

    kernel = functools.partial(
        _ht_kernel, F=f, NP=NP, dim=dim,
        heads=cfg["heads"], head_dim=cfg["head_dim"], num_classes=nc)

    # Advisory cost hint: the call is latency-bound, help XLA schedule around it.
    cost = pl.CostEstimate(flops=int(4e7), transcendentals=int(1e5),
                           bytes_accessed=int(5e5))

    out = pl.pallas_call(
        kernel,
        out_shape=jax.ShapeDtypeStruct((b, 8, LANE), jnp.float32),
        grid=(b,),
        in_specs=in_specs,
        out_specs=pl.BlockSpec((1, 8, LANE), lambda i: (i, 0, 0)),
        scratch_shapes=[pltpu.VMEM((max_rows, dim), jnp.float32)],
        compiler_params=pltpu.CompilerParams(
            dimension_semantics=("parallel",),          # 2 TCs on v7x, no-op elsewhere
            vmem_limit_bytes=32 * 1024 * 1024),
        cost_estimate=cost,
    )(*args)
    return out[:, 0, :nc]                                # slice lane-dense block


# ----------------------------------------------------------------------------
# Deterministic parameter init + packing (LN folding, head-major 128-lane
# padded q/k/v layout, per-layer stacking, bf16 MXU weights)
# ----------------------------------------------------------------------------

def _init_linear(key, din, dout, scale=0.02):
    w = scale * jax.random.normal(key, (din, dout), jnp.float32)
    b = jnp.zeros((dout,), jnp.float32)
    return w, b


def _init_block(key, dim, heads, head_dim, mlp_dim):
    inner = heads * head_dim
    ks = jax.random.split(key, 4)
    w_qkv, b_qkv = _init_linear(ks[0], dim, 3 * inner)
    w_o, b_o = _init_linear(ks[1], inner, dim)
    w_m1, b_m1 = _init_linear(ks[2], dim, mlp_dim)
    w_m2, b_m2 = _init_linear(ks[3], mlp_dim, dim)
    return dict(
        ln1_g=jnp.ones((dim,), jnp.float32), ln1_b=jnp.zeros((dim,), jnp.float32),
        ln2_g=jnp.ones((dim,), jnp.float32), ln2_b=jnp.zeros((dim,), jnp.float32),
        w_qkv=w_qkv, b_qkv=b_qkv, w_o=w_o, b_o=b_o,
        w_mlp1=w_m1, b_mlp1=b_m1, w_mlp2=w_m2, b_mlp2=b_m2)


def _init_group(key, seq_len, dim, layers, heads, head_dim, mlp_dim):
    ks = jax.random.split(key, layers + 2)
    return dict(
        agg_tok=0.02 * jax.random.normal(ks[0], (1, dim), jnp.float32),
        pos_emb=0.02 * jax.random.normal(ks[1], (seq_len + 1, dim), jnp.float32),
        blocks=[_init_block(ks[2 + l], dim, heads, head_dim, mlp_dim)
                for l in range(layers)])


def init_params(key, cfg):
    ks = jax.random.split(key, 4)
    patch_dim = cfg["channels"] * cfg["patch_size"] ** 2
    n_patches = (cfg["image_size"] // cfg["patch_size"]) ** 2
    patch_w, patch_b = _init_linear(ks[0], patch_dim, cfg["dim"])
    head_w, head_b = _init_linear(ks[1], cfg["dim"], cfg["num_classes"])
    return dict(
        patch_w=patch_w, patch_b=patch_b,
        space=_init_group(ks[2], n_patches, cfg["dim"], cfg["layers"],
                          cfg["heads"], cfg["head_dim"], cfg["mlp_dim"]),
        time=_init_group(ks[3], cfg["frames"], cfg["dim"], cfg["layers"],
                         cfg["heads"], cfg["head_dim"], cfg["mlp_dim"]),
        head_w=head_w, head_b=head_b)


def _pack_group(gp, heads, head_dim):
    """Fold LayerNorm affine params into the following linear, repack q/k/v
    head-major with each head's q/k/v block zero-padded to 128 lanes, pad the
    per-head output-projection rows to 128, stack per-layer weights along a
    leading 'layer' axis, and cast MXU operands to bf16."""
    dim = gp["blocks"][0]["w_qkv"].shape[0]
    inner = heads * head_dim

    def fold_qkv(blk):
        w = blk["ln1_g"][:, None] * blk["w_qkv"]                   # (dim, 3*inner)
        bias = blk["ln1_b"] @ blk["w_qkv"] + blk["b_qkv"]          # (3*inner,)
        wp = jnp.zeros((dim, heads * 3 * LANE), jnp.float32)
        bp = jnp.zeros((heads * 3 * LANE,), jnp.float32)
        for hh in range(heads):
            for j in range(3):                                     # q, k, v
                src = j * inner + hh * head_dim
                dst = hh * 3 * LANE + j * LANE
                wp = wp.at[:, dst:dst + head_dim].set(w[:, src:src + head_dim])
                bp = bp.at[dst:dst + head_dim].set(bias[src:src + head_dim])
        return wp, bp

    def pack_wo(blk):
        wo = jnp.zeros((heads, LANE, dim), jnp.float32)
        for hh in range(heads):
            wo = wo.at[hh, :head_dim, :].set(
                blk["w_o"][hh * head_dim:(hh + 1) * head_dim, :])
        return wo

    folded = [fold_qkv(b) for b in gp["blocks"]]
    wqkv = jnp.stack([f[0] for f in folded]).astype(jnp.bfloat16)
    bqkv = jnp.stack([f[1][None, :] for f in folded])
    wo = jnp.stack([pack_wo(b) for b in gp["blocks"]]).astype(jnp.bfloat16)
    bo = jnp.stack([b["b_o"][None, :] for b in gp["blocks"]])
    wm1 = jnp.stack([b["ln2_g"][:, None] * b["w_mlp1"]
                     for b in gp["blocks"]]).astype(jnp.bfloat16)
    bm1 = jnp.stack([(b["ln2_b"] @ b["w_mlp1"] + b["b_mlp1"])[None, :]
                     for b in gp["blocks"]])
    wm2 = jnp.stack([b["w_mlp2"] for b in gp["blocks"]]).astype(jnp.bfloat16)
    bm2 = jnp.stack([b["b_mlp2"][None, :] for b in gp["blocks"]])

    pos = gp["pos_emb"]                         # (S+1, dim)
    aggpos = gp["agg_tok"] + pos[0:1, :]        # agg token + its positional emb
    pos_tok = pos[1:, :]                        # positional emb for real tokens
    return (pos_tok, aggpos, wqkv, bqkv, wo, bo, wm1, bm1, wm2, bm2)


def pack_params(params, cfg):
    return dict(
        patch_w=params["patch_w"].astype(jnp.bfloat16),
        patch_b=params["patch_b"][None, :],
        space=_pack_group(params["space"], cfg["heads"], cfg["head_dim"]),
        time=_pack_group(params["time"], cfg["heads"], cfg["head_dim"]),
        head_w=params["head_w"],
        head_b=params["head_b"][None, :])


# ----------------------------------------------------------------------------

if __name__ == "__main__":
    cfg = dict(
        patch_size=4, image_size=16, channels=3, frames=2,
        dim=32, heads=2, head_dim=16, mlp_dim=64, layers=2,
        num_classes=10,
    )
    key_params, key_data = jax.random.split(jax.random.PRNGKey(0))
    params = init_params(key_params, cfg)
    packed = pack_params(params, cfg)

    # input video: (B, F, H, W, C) channel-last, as consumed by forward()
    x = jax.random.normal(
        key_data,
        (2, cfg["frames"], cfg["image_size"], cfg["image_size"], cfg["channels"]),
        jnp.float32)

    fwd = jax.jit(lambda xx, pp: hierarchical_transformer_forward(xx, pp, cfg))
    out = jax.block_until_ready(fwd(x, packed))

    assert out.shape == (2, cfg["num_classes"]), out.shape
    # log_softmax rows must sum (in prob space) to ~1
    row_sums = jnp.sum(jnp.exp(out), axis=-1)
    assert bool(jnp.all(jnp.abs(row_sums - 1.0) < 1e-3)), row_sums
    assert bool(jnp.all(jnp.isfinite(out)))

    print("KERNEL_OK")
</pallas_src>

<mosaic_0001>
module attributes {stable_mosaic.version = 11 : i64} {
  func.func @_ht_kernel(%arg0: i32, %arg1: memref<1x32x48xf32, #tpu.memory_space<vmem>>, %arg2: memref<48x48xf32, #tpu.memory_space<vmem>>, %arg3: memref<8x8xf32, #tpu.memory_space<vmem>>, %arg4: memref<48x32xbf16, #tpu.memory_space<vmem>>, %arg5: memref<1x32xf32, #tpu.memory_space<vmem>>, %arg6: memref<16x32xf32, #tpu.memory_space<vmem>>, %arg7: memref<1x32xf32, #tpu.memory_space<vmem>>, %arg8: memref<2x32x768xbf16, #tpu.memory_space<vmem>>, %arg9: memref<2x1x768xf32, #tpu.memory_space<vmem>>, %arg10: memref<2x2x128x32xbf16, #tpu.memory_space<vmem>>, %arg11: memref<2x1x32xf32, #tpu.memory_space<vmem>>, %arg12: memref<2x32x64xbf16, #tpu.memory_space<vmem>>, %arg13: memref<2x1x64xf32, #tpu.memory_space<vmem>>, %arg14: memref<2x64x32xbf16, #tpu.memory_space<vmem>>, %arg15: memref<2x1x32xf32, #tpu.memory_space<vmem>>, %arg16: memref<2x32xf32, #tpu.memory_space<vmem>>, %arg17: memref<1x32xf32, #tpu.memory_space<vmem>>, %arg18: memref<2x32x768xbf16, #tpu.memory_space<vmem>>, %arg19: memref<2x1x768xf32, #tpu.memory_space<vmem>>, %arg20: memref<2x2x128x32xbf16, #tpu.memory_space<vmem>>, %arg21: memref<2x1x32xf32, #tpu.memory_space<vmem>>, %arg22: memref<2x32x64xbf16, #tpu.memory_space<vmem>>, %arg23: memref<2x1x64xf32, #tpu.memory_space<vmem>>, %arg24: memref<2x64x32xbf16, #tpu.memory_space<vmem>>, %arg25: memref<2x1x32xf32, #tpu.memory_space<vmem>>, %arg26: memref<32x10xf32, #tpu.memory_space<vmem>>, %arg27: memref<1x10xf32, #tpu.memory_space<vmem>>, %arg28: memref<1x8x128xf32, #tpu.memory_space<vmem>>, %arg29: memref<48x32xf32, #tpu.memory_space<vmem>>) attributes {dimension_semantics = [#tpu.dimension_semantics<parallel>], iteration_bounds = array<i64: 2>, scalar_prefetch = 0 : i64, scratch_operands = 1 : i64, tpu.core_type = #tpu.core_type<tc>, window_params = [{transform_indices = @transform_0, window_bounds = array<i64: 1, 32, 48>}, {pipeline_mode = #tpu.pipeline_mode<synchronous>, transform_indices = @transform_1, window_bounds = array<i64: 48, 48>}, {pipeline_mode = #tpu.pipeline_mode<synchronous>, transform_indices = @transform_2, window_bounds = array<i64: 8, 8>}, {pipeline_mode = #tpu.pipeline_mode<synchronous>, transform_indices = @transform_3, window_bounds = array<i64: 48, 32>}, {pipeline_mode = #tpu.pipeline_mode<synchronous>, transform_indices = @transform_4, window_bounds = array<i64: 1, 32>}, {pipeline_mode = #tpu.pipeline_mode<synchronous>, transform_indices = @transform_5, window_bounds = array<i64: 16, 32>}, {pipeline_mode = #tpu.pipeline_mode<synchronous>, transform_indices = @transform_6, window_bounds = array<i64: 1, 32>}, {pipeline_mode = #tpu.pipeline_mode<synchronous>, transform_indices = @transform_7, window_bounds = array<i64: 2, 32, 768>}, {pipeline_mode = #tpu.pipeline_mode<synchronous>, transform_indices = @transform_8, window_bounds = array<i64: 2, 1, 768>}, {pipeline_mode = #tpu.pipeline_mode<synchronous>, transform_indices = @transform_9, window_bounds = array<i64: 2, 2, 128, 32>}, {pipeline_mode = #tpu.pipeline_mode<synchronous>, transform_indices = @transform_10, window_bounds = array<i64: 2, 1, 32>}, {pipeline_mode = #tpu.pipeline_mode<synchronous>, transform_indices = @transform_11, window_bounds = array<i64: 2, 32, 64>}, {pipeline_mode = #tpu.pipeline_mode<synchronous>, transform_indices = @transform_12, window_bounds = array<i64: 2, 1, 64>}, {pipeline_mode = #tpu.pipeline_mode<synchronous>, transform_indices = @transform_13, window_bounds = array<i64: 2, 64, 32>}, {pipeline_mode = #tpu.pipeline_mode<synchronous>, transform_indices = @transform_14, window_bounds = array<i64: 2, 1, 32>}, {pipeline_mode = #tpu.pipeline_mode<synchronous>, transform_indices = @transform_15, window_bounds = array<i64: 2, 32>}, {pipeline_mode = #tpu.pipeline_mode<synchronous>, transform_indices = @transform_16, window_bounds = array<i64: 1, 32>}, {pipeline_mode = #tpu.pipeline_mode<synchronous>, transform_indices = @transform_17, window_bounds = array<i64: 2, 32, 768>}, {pipeline_mode = #tpu.pipeline_mode<synchronous>, transform_indices = @transform_18, window_bounds = array<i64: 2, 1, 768>}, {pipeline_mode = #tpu.pipeline_mode<synchronous>, transform_indices = @transform_19, window_bounds = array<i64: 2, 2, 128, 32>}, {pipeline_mode = #tpu.pipeline_mode<synchronous>, transform_indices = @transform_20, window_bounds = array<i64: 2, 1, 32>}, {pipeline_mode = #tpu.pipeline_mode<synchronous>, transform_indices = @transform_21, window_bounds = array<i64: 2, 32, 64>}, {pipeline_mode = #tpu.pipeline_mode<synchronous>, transform_indices = @transform_22, window_bounds = array<i64: 2, 1, 64>}, {pipeline_mode = #tpu.pipeline_mode<synchronous>, transform_indices = @transform_23, window_bounds = array<i64: 2, 64, 32>}, {pipeline_mode = #tpu.pipeline_mode<synchronous>, transform_indices = @transform_24, window_bounds = array<i64: 2, 1, 32>}, {pipeline_mode = #tpu.pipeline_mode<synchronous>, transform_indices = @transform_25, window_bounds = array<i64: 32, 10>}, {pipeline_mode = #tpu.pipeline_mode<synchronous>, transform_indices = @transform_26, window_bounds = array<i64: 1, 10>}, {transform_indices = @transform_27, window_bounds = array<i64: 1, 8, 128>}]} {
    %c0 = arith.constant 0 : index
    %c0_0 = arith.constant 0 : index
    %c0_1 = arith.constant 0 : index
    %0 = vector.load %arg1[%c0, %c0_0, %c0_1] : memref<1x32x48xf32, #tpu.memory_space<vmem>>, vector<1x32x48xf32>
    %1 = vector.shape_cast %0 : vector<1x32x48xf32> to vector<32x48xf32>
    %c0_2 = arith.constant 0 : index
    %c0_3 = arith.constant 0 : index
    %2 = vector.load %arg4[%c0_2, %c0_3] : memref<48x32xbf16, #tpu.memory_space<vmem>>, vector<48x32xbf16>
    %3 = arith.truncf %1 : vector<32x48xf32> to vector<32x48xbf16>
    %cst = arith.constant dense<0.000000e+00> : vector<32x32xf32>
    %4 = tpu.matmul %3, %2, %cst {dimension_numbers = #tpu.dot_dimension_numbers<[1], [0], [0], [1], [0, 0, 1, 1], [], []>} : vector<32x48xbf16>, vector<48x32xbf16>, vector<32x32xf32> -> vector<32x32xf32>
    %c0_4 = arith.constant 0 : index
    %c0_5 = arith.constant 0 : index
    %5 = vector.load %arg5[%c0_4, %c0_5] : memref<1x32xf32, #tpu.memory_space<vmem>>, vector<1x32xf32>
    %6 = vector.broadcast %5 : vector<1x32xf32> to vector<32x32xf32>
    %7 = arith.addf %4, %6 : vector<32x32xf32>
    %c0_6 = arith.constant 0 : index
    %c0_7 = arith.constant 0 : index
    %8 = vector.load %arg6[%c0_6, %c0_7] : memref<16x32xf32, #tpu.memory_space<vmem>>, vector<16x32xf32>
    %c0_8 = arith.constant 0 : index
    %c0_9 = arith.constant 0 : index
    %9 = vector.load %arg7[%c0_8, %c0_9] : memref<1x32xf32, #tpu.memory_space<vmem>>, vector<1x32xf32>
    %10 = vector.extract_strided_slice %7 {offsets = [0, 0], sizes = [16, 32], strides = [1, 1]} : vector<32x32xf32> to vector<16x32xf32>
    %11 = arith.addf %10, %8 : vector<16x32xf32>
    %cst_10 = arith.constant 0.000000e+00 : f32
    %12 = vector.broadcast %cst_10 : f32 to vector<7x32xf32>
    %13 = tpu.concatenate %11, %9, %12 in 0 : vector<16x32xf32>, vector<1x32xf32>, vector<7x32xf32> -> vector<24x32xf32>
    %14 = vector.extract_strided_slice %7 {offsets = [16, 0], sizes = [16, 32], strides = [1, 1]} : vector<32x32xf32> to vector<16x32xf32>
    %15 = arith.addf %14, %8 : vector<16x32xf32>
    %cst_11 = arith.constant 0.000000e+00 : f32
    %16 = vector.broadcast %cst_11 : f32 to vector<7x32xf32>
    %17 = tpu.concatenate %15, %9, %16 in 0 : vector<16x32xf32>, vector<1x32xf32>, vector<7x32xf32> -> vector<24x32xf32>
    %18 = tpu.concatenate %13, %17 in 0 : vector<24x32xf32>, vector<24x32xf32> -> vector<48x32xf32>
    %c0_12 = arith.constant 0 : index
    %c0_13 = arith.constant 0 : index
    %19 = vector.load %arg29[%c0_12, %c0_13] : memref<48x32xf32, #tpu.memory_space<vmem>>, vector<48x32xf32>
    tpu.vector_store %arg29[%c0_12, %c0_13], %18 {strides = array<i32>} : memref<48x32xf32, #tpu.memory_space<vmem>>, vector<48x32xf32>,
    %c0_14 = arith.constant 0 : index
    %c0_15 = arith.constant 0 : index
    %20 = vector.load %arg2[%c0_14, %c0_15] : memref<48x48xf32, #tpu.memory_space<vmem>>, vector<48x48xf32>
    %c0_16 = arith.constant 0 : index
    %c0_17 = arith.constant 0 : index
    %21 = vector.load %arg29[%c0_16, %c0_17] : memref<48x32xf32, #tpu.memory_space<vmem>>, vector<48x32xf32>
    %cst_18 = arith.constant dense<0.000000e+00> : vector<48xf32>
    %22 = vector.multi_reduction <add>, %21, %cst_18 [1] : vector<48x32xf32> to vector<48xf32>
    %23 = vector.shape_cast %22 : vector<48xf32> to vector<48x1xf32>
    %cst_19 = arith.constant 3.200000e+01 : f32
    %24 = vector.broadcast %cst_19 : f32 to vector<48x1xf32>
    %25 = arith.divf %23, %24 : vector<48x1xf32>
    %26 = vector.broadcast %25 : vector<48x1xf32> to vector<48x32xf32>
    %27 = arith.subf %21, %26 : vector<48x32xf32>
    %28 = arith.mulf %27, %27 : vector<48x32xf32>
    %cst_20 = arith.constant dense<0.000000e+00> : vector<48xf32>
    %29 = vector.multi_reduction <add>, %28, %cst_20 [1] : vector<48x32xf32> to vector<48xf32>
    %30 = vector.shape_cast %29 : vector<48xf32> to vector<48x1xf32>
    %cst_21 = arith.constant 3.200000e+01 : f32
    %31 = vector.broadcast %cst_21 : f32 to vector<48x1xf32>
    %32 = arith.divf %30, %31 : vector<48x1xf32>
    %cst_22 = arith.constant 9.99999974E-6 : f32
    %33 = vector.broadcast %cst_22 : f32 to vector<48x1xf32>
    %34 = arith.addf %32, %33 : vector<48x1xf32>
    %35 = math.rsqrt %34 : vector<48x1xf32>
    %36 = vector.broadcast %35 : vector<48x1xf32> to vector<48x32xf32>
    %37 = arith.mulf %27, %36 : vector<48x32xf32>
    %c0_23 = arith.constant 0 : index
    %c0_24 = arith.constant 0 : index
    %c0_25 = arith.constant 0 : index
    %38 = vector.load %arg8[%c0_23, %c0_24, %c0_25] : memref<2x32x768xbf16, #tpu.memory_space<vmem>>, vector<1x32x768xbf16>
    %39 = vector.shape_cast %38 : vector<1x32x768xbf16> to vector<32x768xbf16>
    %40 = arith.truncf %37 : vector<48x32xf32> to vector<48x32xbf16>
    %cst_26 = arith.constant dense<0.000000e+00> : vector<48x768xf32>
    %41 = tpu.matmul %40, %39, %cst_26 {dimension_numbers = #tpu.dot_dimension_numbers<[1], [0], [0], [1], [0, 0, 1, 1], [], []>} : vector<48x32xbf16>, vector<32x768xbf16>, vector<48x768xf32> -> vector<48x768xf32>
    %c0_27 = arith.constant 0 : index
    %c0_28 = arith.constant 0 : index
    %c0_29 = arith.constant 0 : index
    %42 = vector.load %arg9[%c0_27, %c0_28, %c0_29] : memref<2x1x768xf32, #tpu.memory_space<vmem>>, vector<1x1x768xf32>
    %43 = vector.shape_cast %42 : vector<1x1x768xf32> to vector<1x768xf32>
    %44 = vector.broadcast %43 : vector<1x768xf32> to vector<48x768xf32>
    %45 = arith.addf %41, %44 : vector<48x768xf32>
    %46 = arith.truncf %45 : vector<48x768xf32> to vector<48x768xbf16>
    %cst_30 = arith.constant 0.000000e+00 : f32
    %47 = vector.broadcast %cst_30 : f32 to vector<48x32xf32>
    %48 = vector.extract_strided_slice %46 {offsets = [0, 0], sizes = [48, 128], strides = [1, 1]} : vector<48x768xbf16> to vector<48x128xbf16>
    %49 = vector.extract_strided_slice %46 {offsets = [0, 128], sizes = [48, 128], strides = [1, 1]} : vector<48x768xbf16> to vector<48x128xbf16>
    %50 = vector.extract_strided_slice %46 {offsets = [0, 256], sizes = [48, 128], strides = [1, 1]} : vector<48x768xbf16> to vector<48x128xbf16>
    %cst_31 = arith.constant dense<0.000000e+00> : vector<48x48xf32>
    %51 = tpu.matmul %48, %49, %cst_31 {dimension_numbers = #tpu.dot_dimension_numbers<[1], [1], [0], [0], [0, 0, 1, 0], [], []>} : vector<48x128xbf16>, vector<48x128xbf16>, vector<48x48xf32> -> vector<48x48xf32>
    %cst_32 = arith.constant 2.500000e-01 : f32
    %52 = vector.broadcast %cst_32 : f32 to vector<48x48xf32>
    %53 = arith.mulf %51, %52 : vector<48x48xf32>
    %54 = arith.addf %53, %20 : vector<48x48xf32>
    %cst_33 = arith.constant dense<0xFF800000> : vector<48xf32>
    %55 = vector.multi_reduction <maximumf>, %54, %cst_33 [1] : vector<48x48xf32> to vector<48xf32>
    %56 = vector.shape_cast %55 : vector<48xf32> to vector<48x1xf32>
    %57 = vector.broadcast %56 : vector<48x1xf32> to vector<48x48xf32>
    %58 = arith.subf %54, %57 : vector<48x48xf32>
    %59 = math.exp %58 : vector<48x48xf32>
    %cst_34 = arith.constant dense<0.000000e+00> : vector<48xf32>
    %60 = vector.multi_reduction <add>, %59, %cst_34 [1] : vector<48x48xf32> to vector<48xf32>
    %61 = vector.shape_cast %60 : vector<48xf32> to vector<48x1xf32>
    %62 = tpu.reciprocal %61 {approx = true} : vector<48x1xf32> -> vector<48x1xf32>
    %63 = vector.broadcast %62 : vector<48x1xf32> to vector<48x48xf32>
    %64 = arith.mulf %59, %63 : vector<48x48xf32>
    %65 = arith.truncf %64 : vector<48x48xf32> to vector<48x48xbf16>
    %cst_35 = arith.constant dense<0.000000e+00> : vector<48x128xf32>
    %66 = tpu.matmul %65, %50, %cst_35 {dimension_numbers = #tpu.dot_dimension_numbers<[1], [0], [0], [1], [0, 0, 1, 1], [], []>} : vector<48x48xbf16>, vector<48x128xbf16>, vector<48x128xf32> -> vector<48x128xf32>
    %67 = arith.truncf %66 : vector<48x128xf32> to vector<48x128xbf16>
    %c0_36 = arith.constant 0 : index
    %c0_37 = arith.constant 0 : index
    %c0_38 = arith.constant 0 : index
    %c0_39 = arith.constant 0 : index
    %68 = vector.load %arg10[%c0_36, %c0_37, %c0_38, %c0_39] : memref<2x2x128x32xbf16, #tpu.memory_space<vmem>>, vector<1x1x128x32xbf16>
    %69 = vector.shape_cast %68 : vector<1x1x128x32xbf16> to vector<128x32xbf16>
    %cst_40 = arith.constant dense<0.000000e+00> : vector<48x32xf32>
    %70 = tpu.matmul %67, %69, %cst_40 {dimension_numbers = #tpu.dot_dimension_numbers<[1], [0], [0], [1], [0, 0, 1, 1], [], []>} : vector<48x128xbf16>, vector<128x32xbf16>, vector<48x32xf32> -> vector<48x32xf32>
    %71 = arith.addf %47, %70 : vector<48x32xf32>
    %72 = vector.extract_strided_slice %46 {offsets = [0, 384], sizes = [48, 128], strides = [1, 1]} : vector<48x768xbf16> to vector<48x128xbf16>
    %73 = vector.extract_strided_slice %46 {offsets = [0, 512], sizes = [48, 128], strides = [1, 1]} : vector<48x768xbf16> to vector<48x128xbf16>
    %74 = vector.extract_strided_slice %46 {offsets = [0, 640], sizes = [48, 128], strides = [1, 1]} : vector<48x768xbf16> to vector<48x128xbf16>
    %cst_41 = arith.constant dense<0.000000e+00> : vector<48x48xf32>
    %75 = tpu.matmul %72, %73, %cst_41 {dimension_numbers = #tpu.dot_dimension_numbers<[1], [1], [0], [0], [0, 0, 1, 0], [], []>} : vector<48x128xbf16>, vector<48x128xbf16>, vector<48x48xf32> -> vector<48x48xf32>
    %cst_42 = arith.constant 2.500000e-01 : f32
    %76 = vector.broadcast %cst_42 : f32 to vector<48x48xf32>
    %77 = arith.mulf %75, %76 : vector<48x48xf32>
    %78 = arith.addf %77, %20 : vector<48x48xf32>
    %cst_43 = arith.constant dense<0xFF800000> : vector<48xf32>
    %79 = vector.multi_reduction <maximumf>, %78, %cst_43 [1] : vector<48x48xf32> to vector<48xf32>
    %80 = vector.shape_cast %79 : vector<48xf32> to vector<48x1xf32>
    %81 = vector.broadcast %80 : vector<48x1xf32> to vector<48x48xf32>
    %82 = arith.subf %78, %81 : vector<48x48xf32>
    %83 = math.exp %82 : vector<48x48xf32>
    %cst_44 = arith.constant dense<0.000000e+00> : vector<48xf32>
    %84 = vector.multi_reduction <add>, %83, %cst_44 [1] : vector<48x48xf32> to vector<48xf32>
    %85 = vector.shape_cast %84 : vector<48xf32> to vector<48x1xf32>
    %86 = tpu.reciprocal %85 {approx = true} : vector<48x1xf32> -> vector<48x1xf32>
    %87 = vector.broadcast %86 : vector<48x1xf32> to vector<48x48xf32>
    %88 = arith.mulf %83, %87 : vector<48x48xf32>
    %89 = arith.truncf %88 : vector<48x48xf32> to vector<48x48xbf16>
    %cst_45 = arith.constant dense<0.000000e+00> : vector<48x128xf32>
    %90 = tpu.matmul %89, %74, %cst_45 {dimension_numbers = #tpu.dot_dimension_numbers<[1], [0], [0], [1], [0, 0, 1, 1], [], []>} : vector<48x48xbf16>, vector<48x128xbf16>, vector<48x128xf32> -> vector<48x128xf32>
    %91 = arith.truncf %90 : vector<48x128xf32> to vector<48x128xbf16>
    %c0_46 = arith.constant 0 : index
    %c1 = arith.constant 1 : index
    %c0_47 = arith.constant 0 : index
    %c0_48 = arith.constant 0 : index
    %92 = vector.load %arg10[%c0_46, %c1, %c0_47, %c0_48] : memref<2x2x128x32xbf16, #tpu.memory_space<vmem>>, vector<1x1x128x32xbf16>
    %93 = vector.shape_cast %92 : vector<1x1x128x32xbf16> to vector<128x32xbf16>
    %cst_49 = arith.constant dense<0.000000e+00> : vector<48x32xf32>
    %94 = tpu.matmul %91, %93, %cst_49 {dimension_numbers = #tpu.dot_dimension_numbers<[1], [0], [0], [1], [0, 0, 1, 1], [], []>} : vector<48x128xbf16>, vector<128x32xbf16>, vector<48x32xf32> -> vector<48x32xf32>
    %95 = arith.addf %71, %94 : vector<48x32xf32>
    %96 = arith.addf %21, %95 : vector<48x32xf32>
    %c0_50 = arith.constant 0 : index
    %c0_51 = arith.constant 0 : index
    %c0_52 = arith.constant 0 : index
    %97 = vector.load %arg11[%c0_50, %c0_51, %c0_52] : memref<2x1x32xf32, #tpu.memory_space<vmem>>, vector<1x1x32xf32>
    %98 = vector.shape_cast %97 : vector<1x1x32xf32> to vector<1x32xf32>
    %99 = vector.broadcast %98 : vector<1x32xf32> to vector<48x32xf32>
    %100 = arith.addf %96, %99 : vector<48x32xf32>
    %c0_53 = arith.constant 0 : index
    %c0_54 = arith.constant 0 : index
    %101 = vector.load %arg29[%c0_53, %c0_54] : memref<48x32xf32, #tpu.memory_space<vmem>>, vector<48x32xf32>
    tpu.vector_store %arg29[%c0_53, %c0_54], %100 {strides = array<i32>} : memref<48x32xf32, #tpu.memory_space<vmem>>, vector<48x32xf32>,
    %c0_55 = arith.constant 0 : index
    %c0_56 = arith.constant 0 : index
    %102 = vector.load %arg29[%c0_55, %c0_56] : memref<48x32xf32, #tpu.memory_space<vmem>>, vector<48x32xf32>
    %cst_57 = arith.constant dense<0.000000e+00> : vector<48xf32>
    %103 = vector.multi_reduction <add>, %102, %cst_57 [1] : vector<48x32xf32> to vector<48xf32>
    %104 = vector.shape_cast %103 : vector<48xf32> to vector<48x1xf32>
    %cst_58 = arith.constant 3.200000e+01 : f32
    %105 = vector.broadcast %cst_58 : f32 to vector<48x1xf32>
    %106 = arith.divf %104, %105 : vector<48x1xf32>
    %107 = vector.broadcast %106 : vector<48x1xf32> to vector<48x32xf32>
    %108 = arith.subf %102, %107 : vector<48x32xf32>
    %109 = arith.mulf %108, %108 : vector<48x32xf32>
    %cst_59 = arith.constant dense<0.000000e+00> : vector<48xf32>
    %110 = vector.multi_reduction <add>, %109, %cst_59 [1] : vector<48x32xf32> to vector<48xf32>
    %111 = vector.shape_cast %110 : vector<48xf32> to vector<48x1xf32>
    %cst_60 = arith.constant 3.200000e+01 : f32
    %112 = vector.broadcast %cst_60 : f32 to vector<48x1xf32>
    %113 = arith.divf %111, %112 : vector<48x1xf32>
    %cst_61 = arith.constant 9.99999974E-6 : f32
    %114 = vector.broadcast %cst_61 : f32 to vector<48x1xf32>
    %115 = arith.addf %113, %114 : vector<48x1xf32>
    %116 = math.rsqrt %115 : vector<48x1xf32>
    %117 = vector.broadcast %116 : vector<48x1xf32> to vector<48x32xf32>
    %118 = arith.mulf %108, %117 : vector<48x32xf32>
    %c0_62 = arith.constant 0 : index
    %c0_63 = arith.constant 0 : index
    %c0_64 = arith.constant 0 : index
    %119 = vector.load %arg12[%c0_62, %c0_63, %c0_64] : memref<2x32x64xbf16, #tpu.memory_space<vmem>>, vector<1x32x64xbf16>
    %120 = vector.shape_cast %119 : vector<1x32x64xbf16> to vector<32x64xbf16>
    %121 = arith.truncf %118 : vector<48x32xf32> to vector<48x32xbf16>
    %cst_65 = arith.constant dense<0.000000e+00> : vector<48x64xf32>
    %122 = tpu.matmul %121, %120, %cst_65 {dimension_numbers = #tpu.dot_dimension_numbers<[1], [0], [0], [1], [0, 0, 1, 1], [], []>} : vector<48x32xbf16>, vector<32x64xbf16>, vector<48x64xf32> -> vector<48x64xf32>
    %c0_66 = arith.constant 0 : index
    %c0_67 = arith.constant 0 : index
    %c0_68 = arith.constant 0 : index
    %123 = vector.load %arg13[%c0_66, %c0_67, %c0_68] : memref<2x1x64xf32, #tpu.memory_space<vmem>>, vector<1x1x64xf32>
    %124 = vector.shape_cast %123 : vector<1x1x64xf32> to vector<1x64xf32>
    %125 = vector.broadcast %124 : vector<1x64xf32> to vector<48x64xf32>
    %126 = arith.addf %122, %125 : vector<48x64xf32>
    %cst_69 = arith.constant 5.000000e-01 : f32
    %127 = vector.broadcast %cst_69 : f32 to vector<48x64xf32>
    %128 = arith.mulf %127, %126 : vector<48x64xf32>
    %cst_70 = arith.constant 4.471500e-02 : f32
    %129 = vector.broadcast %cst_70 : f32 to vector<48x64xf32>
    %130 = arith.mulf %129, %126 : vector<48x64xf32>
    %131 = arith.mulf %130, %126 : vector<48x64xf32>
    %132 = arith.mulf %131, %126 : vector<48x64xf32>
    %133 = arith.addf %126, %132 : vector<48x64xf32>
    %cst_71 = arith.constant 0.797884583 : f32
    %134 = vector.broadcast %cst_71 : f32 to vector<48x64xf32>
    %135 = arith.mulf %134, %133 : vector<48x64xf32>
    %136 = math.tanh %135 : vector<48x64xf32>
    %cst_72 = arith.constant 1.000000e+00 : f32
    %137 = vector.broadcast %cst_72 : f32 to vector<48x64xf32>
    %138 = arith.addf %137, %136 : vector<48x64xf32>
    %139 = arith.mulf %128, %138 : vector<48x64xf32>
    %c0_73 = arith.constant 0 : index
    %c0_74 = arith.constant 0 : index
    %c0_75 = arith.constant 0 : index
    %140 = vector.load %arg14[%c0_73, %c0_74, %c0_75] : memref<2x64x32xbf16, #tpu.memory_space<vmem>>, vector<1x64x32xbf16>
    %141 = vector.shape_cast %140 : vector<1x64x32xbf16> to vector<64x32xbf16>
    %142 = arith.truncf %139 : vector<48x64xf32> to vector<48x64xbf16>
    %cst_76 = arith.constant dense<0.000000e+00> : vector<48x32xf32>
    %143 = tpu.matmul %142, %141, %cst_76 {dimension_numbers = #tpu.dot_dimension_numbers<[1], [0], [0], [1], [0, 0, 1, 1], [], []>} : vector<48x64xbf16>, vector<64x32xbf16>, vector<48x32xf32> -> vector<48x32xf32>
    %144 = arith.addf %102, %143 : vector<48x32xf32>
    %c0_77 = arith.constant 0 : index
    %c0_78 = arith.constant 0 : index
    %c0_79 = arith.constant 0 : index
    %145 = vector.load %arg15[%c0_77, %c0_78, %c0_79] : memref<2x1x32xf32, #tpu.memory_space<vmem>>, vector<1x1x32xf32>
    %146 = vector.shape_cast %145 : vector<1x1x32xf32> to vector<1x32xf32>
    %147 = vector.broadcast %146 : vector<1x32xf32> to vector<48x32xf32>
    %148 = arith.addf %144, %147 : vector<48x32xf32>
    %c0_80 = arith.constant 0 : index
    %c0_81 = arith.constant 0 : index
    %149 = vector.load %arg29[%c0_80, %c0_81] : memref<48x32xf32, #tpu.memory_space<vmem>>, vector<48x32xf32>
    tpu.vector_store %arg29[%c0_80, %c0_81], %148 {strides = array<i32>} : memref<48x32xf32, #tpu.memory_space<vmem>>, vector<48x32xf32>,
    %c0_82 = arith.constant 0 : index
    %c0_83 = arith.constant 0 : index
    %150 = vector.load %arg29[%c0_82, %c0_83] : memref<48x32xf32, #tpu.memory_space<vmem>>, vector<48x32xf32>
    %cst_84 = arith.constant dense<0.000000e+00> : vector<48xf32>
    %151 = vector.multi_reduction <add>, %150, %cst_84 [1] : vector<48x32xf32> to vector<48xf32>
    %152 = vector.shape_cast %151 : vector<48xf32> to vector<48x1xf32>
    %cst_85 = arith.constant 3.200000e+01 : f32
    %153 = vector.broadcast %cst_85 : f32 to vector<48x1xf32>
    %154 = arith.divf %152, %153 : vector<48x1xf32>
    %155 = vector.broadcast %154 : vector<48x1xf32> to vector<48x32xf32>
    %156 = arith.subf %150, %155 : vector<48x32xf32>
    %157 = arith.mulf %156, %156 : vector<48x32xf32>
    %cst_86 = arith.constant dense<0.000000e+00> : vector<48xf32>
    %158 = vector.multi_reduction <add>, %157, %cst_86 [1] : vector<48x32xf32> to vector<48xf32>
    %159 = vector.shape_cast %158 : vector<48xf32> to vector<48x1xf32>
    %cst_87 = arith.constant 3.200000e+01 : f32
    %160 = vector.broadcast %cst_87 : f32 to vector<48x1xf32>
    %161 = arith.divf %159, %160 : vector<48x1xf32>
    %cst_88 = arith.constant 9.99999974E-6 : f32
    %162 = vector.broadcast %cst_88 : f32 to vector<48x1xf32>
    %163 = arith.addf %161, %162 : vector<48x1xf32>
    %164 = math.rsqrt %163 : vector<48x1xf32>
    %165 = vector.broadcast %164 : vector<48x1xf32> to vector<48x32xf32>
    %166 = arith.mulf %156, %165 : vector<48x32xf32>
    %c1_89 = arith.constant 1 : index
    %c0_90 = arith.constant 0 : index
    %c0_91 = arith.constant 0 : index
    %167 = vector.load %arg8[%c1_89, %c0_90, %c0_91] : memref<2x32x768xbf16, #tpu.memory_space<vmem>>, vector<1x32x768xbf16>
    %168 = vector.shape_cast %167 : vector<1x32x768xbf16> to vector<32x768xbf16>
    %169 = arith.truncf %166 : vector<48x32xf32> to vector<48x32xbf16>
    %cst_92 = arith.constant dense<0.000000e+00> : vector<48x768xf32>
    %170 = tpu.matmul %169, %168, %cst_92 {dimension_numbers = #tpu.dot_dimension_numbers<[1], [0], [0], [1], [0, 0, 1, 1], [], []>} : vector<48x32xbf16>, vector<32x768xbf16>, vector<48x768xf32> -> vector<48x768xf32>
    %c1_93 = arith.constant 1 : index
    %c0_94 = arith.constant 0 : index
    %c0_95 = arith.constant 0 : index
    %171 = vector.load %arg9[%c1_93, %c0_94, %c0_95] : memref<2x1x768xf32, #tpu.memory_space<vmem>>, vector<1x1x768xf32>
    %172 = vector.shape_cast %171 : vector<1x1x768xf32> to vector<1x768xf32>
    %173 = vector.broadcast %172 : vector<1x768xf32> to vector<48x768xf32>
    %174 = arith.addf %170, %173 : vector<48x768xf32>
    %175 = arith.truncf %174 : vector<48x768xf32> to vector<48x768xbf16>
    %cst_96 = arith.constant 0.000000e+00 : f32
    %176 = vector.broadcast %cst_96 : f32 to vector<48x32xf32>
    %177 = vector.extract_strided_slice %175 {offsets = [0, 0], sizes = [48, 128], strides = [1, 1]} : vector<48x768xbf16> to vector<48x128xbf16>
    %178 = vector.extract_strided_slice %175 {offsets = [0, 128], sizes = [48, 128], strides = [1, 1]} : vector<48x768xbf16> to vector<48x128xbf16>
    %179 = vector.extract_strided_slice %175 {offsets = [0, 256], sizes = [48, 128], strides = [1, 1]} : vector<48x768xbf16> to vector<48x128xbf16>
    %cst_97 = arith.constant dense<0.000000e+00> : vector<48x48xf32>
    %180 = tpu.matmul %177, %178, %cst_97 {dimension_numbers = #tpu.dot_dimension_numbers<[1], [1], [0], [0], [0, 0, 1, 0], [], []>} : vector<48x128xbf16>, vector<48x128xbf16>, vector<48x48xf32> -> vector<48x48xf32>
    %cst_98 = arith.constant 2.500000e-01 : f32
    %181 = vector.broadcast %cst_98 : f32 to vector<48x48xf32>
    %182 = arith.mulf %180, %181 : vector<48x48xf32>
    %183 = arith.addf %182, %20 : vector<48x48xf32>
    %cst_99 = arith.constant dense<0xFF800000> : vector<48xf32>
    %184 = vector.multi_reduction <maximumf>, %183, %cst_99 [1] : vector<48x48xf32> to vector<48xf32>
    %185 = vector.shape_cast %184 : vector<48xf32> to vector<48x1xf32>
    %186 = vector.broadcast %185 : vector<48x1xf32> to vector<48x48xf32>
    %187 = arith.subf %183, %186 : vector<48x48xf32>
    %188 = math.exp %187 : vector<48x48xf32>
    %cst_100 = arith.constant dense<0.000000e+00> : vector<48xf32>
    %189 = vector.multi_reduction <add>, %188, %cst_100 [1] : vector<48x48xf32> to vector<48xf32>
    %190 = vector.shape_cast %189 : vector<48xf32> to vector<48x1xf32>
    %191 = tpu.reciprocal %190 {approx = true} : vector<48x1xf32> -> vector<48x1xf32>
    %192 = vector.broadcast %191 : vector<48x1xf32> to vector<48x48xf32>
    %193 = arith.mulf %188, %192 : vector<48x48xf32>
    %194 = arith.truncf %193 : vector<48x48xf32> to vector<48x48xbf16>
    %cst_101 = arith.constant dense<0.000000e+00> : vector<48x128xf32>
    %195 = tpu.matmul %194, %179, %cst_101 {dimension_numbers = #tpu.dot_dimension_numbers<[1], [0], [0], [1], [0, 0, 1, 1], [], []>} : vector<48x48xbf16>, vector<48x128xbf16>, vector<48x128xf32> -> vector<48x128xf32>
    %196 = arith.truncf %195 : vector<48x128xf32> to vector<48x128xbf16>
    %c1_102 = arith.constant 1 : index
    %c0_103 = arith.constant 0 : index
    %c0_104 = arith.constant 0 : index
    %c0_105 = arith.constant 0 : index
    %197 = vector.load %arg10[%c1_102, %c0_103, %c0_104, %c0_105] : memref<2x2x128x32xbf16, #tpu.memory_space<vmem>>, vector<1x1x128x32xbf16>
    %198 = vector.shape_cast %197 : vector<1x1x128x32xbf16> to vector<128x32xbf16>
    %cst_106 = arith.constant dense<0.000000e+00> : vector<48x32xf32>
    %199 = tpu.matmul %196, %198, %cst_106 {dimension_numbers = #tpu.dot_dimension_numbers<[1], [0], [0], [1], [0, 0, 1, 1], [], []>} : vector<48x128xbf16>, vector<128x32xbf16>, vector<48x32xf32> -> vector<48x32xf32>
    %200 = arith.addf %176, %199 : vector<48x32xf32>
    %201 = vector.extract_strided_slice %175 {offsets = [0, 384], sizes = [48, 128], strides = [1, 1]} : vector<48x768xbf16> to vector<48x128xbf16>
    %202 = vector.extract_strided_slice %175 {offsets = [0, 512], sizes = [48, 128], strides = [1, 1]} : vector<48x768xbf16> to vector<48x128xbf16>
    %203 = vector.extract_strided_slice %175 {offsets = [0, 640], sizes = [48, 128], strides = [1, 1]} : vector<48x768xbf16> to vector<48x128xbf16>
    %cst_107 = arith.constant dense<0.000000e+00> : vector<48x48xf32>
    %204 = tpu.matmul %201, %202, %cst_107 {dimension_numbers = #tpu.dot_dimension_numbers<[1], [1], [0], [0], [0, 0, 1, 0], [], []>} : vector<48x128xbf16>, vector<48x128xbf16>, vector<48x48xf32> -> vector<48x48xf32>
    %cst_108 = arith.constant 2.500000e-01 : f32
    %205 = vector.broadcast %cst_108 : f32 to vector<48x48xf32>
    %206 = arith.mulf %204, %205 : vector<48x48xf32>
    %207 = arith.addf %206, %20 : vector<48x48xf32>
    %cst_109 = arith.constant dense<0xFF800000> : vector<48xf32>
    %208 = vector.multi_reduction <maximumf>, %207, %cst_109 [1] : vector<48x48xf32> to vector<48xf32>
    %209 = vector.shape_cast %208 : vector<48xf32> to vector<48x1xf32>
    %210 = vector.broadcast %209 : vector<48x1xf32> to vector<48x48xf32>
    %211 = arith.subf %207, %210 : vector<48x48xf32>
    %212 = math.exp %211 : vector<48x48xf32>
    %cst_110 = arith.constant dense<0.000000e+00> : vector<48xf32>
    %213 = vector.multi_reduction <add>, %212, %cst_110 [1] : vector<48x48xf32> to vector<48xf32>
    %214 = vector.shape_cast %213 : vector<48xf32> to vector<48x1xf32>
    %215 = tpu.reciprocal %214 {approx = true} : vector<48x1xf32> -> vector<48x1xf32>
    %216 = vector.broadcast %215 : vector<48x1xf32> to vector<48x48xf32>
    %217 = arith.mulf %212, %216 : vector<48x48xf32>
    %218 = arith.truncf %217 : vector<48x48xf32> to vector<48x48xbf16>
    %cst_111 = arith.constant dense<0.000000e+00> : vector<48x128xf32>
    %219 = tpu.matmul %218, %203, %cst_111 {dimension_numbers = #tpu.dot_dimension_numbers<[1], [0], [0], [1], [0, 0, 1, 1], [], []>} : vector<48x48xbf16>, vector<48x128xbf16>, vector<48x128xf32> -> vector<48x128xf32>
    %220 = arith.truncf %219 : vector<48x128xf32> to vector<48x128xbf16>
    %c1_112 = arith.constant 1 : index
    %c1_113 = arith.constant 1 : index
    %c0_114 = arith.constant 0 : index
    %c0_115 = arith.constant 0 : index
    %221 = vector.load %arg10[%c1_112, %c1_113, %c0_114, %c0_115] : memref<2x2x128x32xbf16, #tpu.memory_space<vmem>>, vector<1x1x128x32xbf16>
    %222 = vector.shape_cast %221 : vector<1x1x128x32xbf16> to vector<128x32xbf16>
    %cst_116 = arith.constant dense<0.000000e+00> : vector<48x32xf32>
    %223 = tpu.matmul %220, %222, %cst_116 {dimension_numbers = #tpu.dot_dimension_numbers<[1], [0], [0], [1], [0, 0, 1, 1], [], []>} : vector<48x128xbf16>, vector<128x32xbf16>, vector<48x32xf32> -> vector<48x32xf32>
    %224 = arith.addf %200, %223 : vector<48x32xf32>
    %225 = arith.addf %150, %224 : vector<48x32xf32>
    %c1_117 = arith.constant 1 : index
    %c0_118 = arith.constant 0 : index
    %c0_119 = arith.constant 0 : index
    %226 = vector.load %arg11[%c1_117, %c0_118, %c0_119] : memref<2x1x32xf32, #tpu.memory_space<vmem>>, vector<1x1x32xf32>
    %227 = vector.shape_cast %226 : vector<1x1x32xf32> to vector<1x32xf32>
    %228 = vector.broadcast %227 : vector<1x32xf32> to vector<48x32xf32>
    %229 = arith.addf %225, %228 : vector<48x32xf32>
    %c0_120 = arith.constant 0 : index
    %c0_121 = arith.constant 0 : index
    %230 = vector.load %arg29[%c0_120, %c0_121] : memref<48x32xf32, #tpu.memory_space<vmem>>, vector<48x32xf32>
    tpu.vector_store %arg29[%c0_120, %c0_121], %229 {strides = array<i32>} : memref<48x32xf32, #tpu.memory_space<vmem>>, vector<48x32xf32>,
    %c0_122 = arith.constant 0 : index
    %c0_123 = arith.constant 0 : index
    %231 = vector.load %arg29[%c0_122, %c0_123] : memref<48x32xf32, #tpu.memory_space<vmem>>, vector<48x32xf32>
    %cst_124 = arith.constant dense<0.000000e+00> : vector<48xf32>
    %232 = vector.multi_reduction <add>, %231, %cst_124 [1] : vector<48x32xf32> to vector<48xf32>
    %233 = vector.shape_cast %232 : vector<48xf32> to vector<48x1xf32>
    %cst_125 = arith.constant 3.200000e+01 : f32
    %234 = vector.broadcast %cst_125 : f32 to vector<48x1xf32>
    %235 = arith.divf %233, %234 : vector<48x1xf32>
    %236 = vector.broadcast %235 : vector<48x1xf32> to vector<48x32xf32>
    %237 = arith.subf %231, %236 : vector<48x32xf32>
    %238 = arith.mulf %237, %237 : vector<48x32xf32>
    %cst_126 = arith.constant dense<0.000000e+00> : vector<48xf32>
    %239 = vector.multi_reduction <add>, %238, %cst_126 [1] : vector<48x32xf32> to vector<48xf32>
    %240 = vector.shape_cast %239 : vector<48xf32> to vector<48x1xf32>
    %cst_127 = arith.constant 3.200000e+01 : f32
    %241 = vector.broadcast %cst_127 : f32 to vector<48x1xf32>
    %242 = arith.divf %240, %241 : vector<48x1xf32>
    %cst_128 = arith.constant 9.99999974E-6 : f32
    %243 = vector.broadcast %cst_128 : f32 to vector<48x1xf32>
    %244 = arith.addf %242, %243 : vector<48x1xf32>
    %245 = math.rsqrt %244 : vector<48x1xf32>
    %246 = vector.broadcast %245 : vector<48x1xf32> to vector<48x32xf32>
    %247 = arith.mulf %237, %246 : vector<48x32xf32>
    %c1_129 = arith.constant 1 : index
    %c0_130 = arith.constant 0 : index
    %c0_131 = arith.constant 0 : index
    %248 = vector.load %arg12[%c1_129, %c0_130, %c0_131] : memref<2x32x64xbf16, #tpu.memory_space<vmem>>, vector<1x32x64xbf16>
    %249 = vector.shape_cast %248 : vector<1x32x64xbf16> to vector<32x64xbf16>
    %250 = arith.truncf %247 : vector<48x32xf32> to vector<48x32xbf16>
    %cst_132 = arith.constant dense<0.000000e+00> : vector<48x64xf32>
    %251 = tpu.matmul %250, %249, %cst_132 {dimension_numbers = #tpu.dot_dimension_numbers<[1], [0], [0], [1], [0, 0, 1, 1], [], []>} : vector<48x32xbf16>, vector<32x64xbf16>, vector<48x64xf32> -> vector<48x64xf32>
    %c1_133 = arith.constant 1 : index
    %c0_134 = arith.constant 0 : index
    %c0_135 = arith.constant 0 : index
    %252 = vector.load %arg13[%c1_133, %c0_134, %c0_135] : memref<2x1x64xf32, #tpu.memory_space<vmem>>, vector<1x1x64xf32>
    %253 = vector.shape_cast %252 : vector<1x1x64xf32> to vector<1x64xf32>
    %254 = vector.broadcast %253 : vector<1x64xf32> to vector<48x64xf32>
    %255 = arith.addf %251, %254 : vector<48x64xf32>
    %cst_136 = arith.constant 5.000000e-01 : f32
    %256 = vector.broadcast %cst_136 : f32 to vector<48x64xf32>
    %257 = arith.mulf %256, %255 : vector<48x64xf32>
    %cst_137 = arith.constant 4.471500e-02 : f32
    %258 = vector.broadcast %cst_137 : f32 to vector<48x64xf32>
    %259 = arith.mulf %258, %255 : vector<48x64xf32>
    %260 = arith.mulf %259, %255 : vector<48x64xf32>
    %261 = arith.mulf %260, %255 : vector<48x64xf32>
    %262 = arith.addf %255, %261 : vector<48x64xf32>
    %cst_138 = arith.constant 0.797884583 : f32
    %263 = vector.broadcast %cst_138 : f32 to vector<48x64xf32>
    %264 = arith.mulf %263, %262 : vector<48x64xf32>
    %265 = math.tanh %264 : vector<48x64xf32>
    %cst_139 = arith.constant 1.000000e+00 : f32
    %266 = vector.broadcast %cst_139 : f32 to vector<48x64xf32>
    %267 = arith.addf %266, %265 : vector<48x64xf32>
    %268 = arith.mulf %257, %267 : vector<48x64xf32>
    %c1_140 = arith.constant 1 : index
    %c0_141 = arith.constant 0 : index
    %c0_142 = arith.constant 0 : index
    %269 = vector.load %arg14[%c1_140, %c0_141, %c0_142] : memref<2x64x32xbf16, #tpu.memory_space<vmem>>, vector<1x64x32xbf16>
    %270 = vector.shape_cast %269 : vector<1x64x32xbf16> to vector<64x32xbf16>
    %271 = arith.truncf %268 : vector<48x64xf32> to vector<48x64xbf16>
    %cst_143 = arith.constant dense<0.000000e+00> : vector<48x32xf32>
    %272 = tpu.matmul %271, %270, %cst_143 {dimension_numbers = #tpu.dot_dimension_numbers<[1], [0], [0], [1], [0, 0, 1, 1], [], []>} : vector<48x64xbf16>, vector<64x32xbf16>, vector<48x32xf32> -> vector<48x32xf32>
    %273 = arith.addf %231, %272 : vector<48x32xf32>
    %c1_144 = arith.constant 1 : index
    %c0_145 = arith.constant 0 : index
    %c0_146 = arith.constant 0 : index
    %274 = vector.load %arg15[%c1_144, %c0_145, %c0_146] : memref<2x1x32xf32, #tpu.memory_space<vmem>>, vector<1x1x32xf32>
    %275 = vector.shape_cast %274 : vector<1x1x32xf32> to vector<1x32xf32>
    %276 = vector.broadcast %275 : vector<1x32xf32> to vector<48x32xf32>
    %277 = arith.addf %273, %276 : vector<48x32xf32>
    %c0_147 = arith.constant 0 : index
    %c0_148 = arith.constant 0 : index
    %278 = vector.load %arg29[%c0_147, %c0_148] : memref<48x32xf32, #tpu.memory_space<vmem>>, vector<48x32xf32>
    tpu.vector_store %arg29[%c0_147, %c0_148], %277 {strides = array<i32>} : memref<48x32xf32, #tpu.memory_space<vmem>>, vector<48x32xf32>,
    %c16 = arith.constant 16 : index
    %c0_149 = arith.constant 0 : index
    %279 = vector.load %arg29[%c16, %c0_149] : memref<48x32xf32, #tpu.memory_space<vmem>>, vector<1x32xf32>
    %c40 = arith.constant 40 : index
    %c0_150 = arith.constant 0 : index
    %280 = vector.load %arg29[%c40, %c0_150] : memref<48x32xf32, #tpu.memory_space<vmem>>, vector<1x32xf32>
    %281 = tpu.concatenate %279, %280 in 0 : vector<1x32xf32>, vector<1x32xf32> -> vector<2x32xf32>
    %c0_151 = arith.constant 0 : index
    %c0_152 = arith.constant 0 : index
    %282 = vector.load %arg16[%c0_151, %c0_152] : memref<2x32xf32, #tpu.memory_space<vmem>>, vector<2x32xf32>
    %283 = arith.addf %281, %282 : vector<2x32xf32>
    %c0_153 = arith.constant 0 : index
    %c0_154 = arith.constant 0 : index
    %284 = vector.load %arg17[%c0_153, %c0_154] : memref<1x32xf32, #tpu.memory_space<vmem>>, vector<1x32xf32>
    %cst_155 = arith.constant 0.000000e+00 : f32
    %285 = vector.broadcast %cst_155 : f32 to vector<5x32xf32>
    %286 = tpu.concatenate %283, %284, %285 in 0 : vector<2x32xf32>, vector<1x32xf32>, vector<5x32xf32> -> vector<8x32xf32>
    %c0_156 = arith.constant 0 : index
    %c0_157 = arith.constant 0 : index
    %287 = vector.load %arg29[%c0_156, %c0_157] : memref<48x32xf32, #tpu.memory_space<vmem>>, vector<8x32xf32>
    tpu.vector_store %arg29[%c0_156, %c0_157], %286 {strides = array<i32>} : memref<48x32xf32, #tpu.memory_space<vmem>>, vector<8x32xf32>,
    %c0_158 = arith.constant 0 : index
    %c0_159 = arith.constant 0 : index
    %288 = vector.load %arg3[%c0_158, %c0_159] : memref<8x8xf32, #tpu.memory_space<vmem>>, vector<8x8xf32>
    %c0_160 = arith.constant 0 : index
    %c0_161 = arith.constant 0 : index
    %289 = vector.load %arg29[%c0_160, %c0_161] : memref<48x32xf32, #tpu.memory_space<vmem>>, vector<8x32xf32>
    %cst_162 = arith.constant dense<0.000000e+00> : vector<8xf32>
    %290 = vector.multi_reduction <add>, %289, %cst_162 [1] : vector<8x32xf32> to vector<8xf32>
    %291 = vector.shape_cast %290 : vector<8xf32> to vector<8x1xf32>
    %cst_163 = arith.constant 3.200000e+01 : f32
    %292 = vector.broadcast %cst_163 : f32 to vector<8x1xf32>
    %293 = arith.divf %291, %292 : vector<8x1xf32>
    %294 = vector.broadcast %293 : vector<8x1xf32> to vector<8x32xf32>
    %295 = arith.subf %289, %294 : vector<8x32xf32>
    %296 = arith.mulf %295, %295 : vector<8x32xf32>
    %cst_164 = arith.constant dense<0.000000e+00> : vector<8xf32>
    %297 = vector.multi_reduction <add>, %296, %cst_164 [1] : vector<8x32xf32> to vector<8xf32>
    %298 = vector.shape_cast %297 : vector<8xf32> to vector<8x1xf32>
    %cst_165 = arith.constant 3.200000e+01 : f32
    %299 = vector.broadcast %cst_165 : f32 to vector<8x1xf32>
    %300 = arith.divf %298, %299 : vector<8x1xf32>
    %cst_166 = arith.constant 9.99999974E-6 : f32
    %301 = vector.broadcast %cst_166 : f32 to vector<8x1xf32>
    %302 = arith.addf %300, %301 : vector<8x1xf32>
    %303 = math.rsqrt %302 : vector<8x1xf32>
    %304 = vector.broadcast %303 : vector<8x1xf32> to vector<8x32xf32>
    %305 = arith.mulf %295, %304 : vector<8x32xf32>
    %c0_167 = arith.constant 0 : index
    %c0_168 = arith.constant 0 : index
    %c0_169 = arith.constant 0 : index
    %306 = vector.load %arg18[%c0_167, %c0_168, %c0_169] : memref<2x32x768xbf16, #tpu.memory_space<vmem>>, vector<1x32x768xbf16>
    %307 = vector.shape_cast %306 : vector<1x32x768xbf16> to vector<32x768xbf16>
    %308 = arith.truncf %305 : vector<8x32xf32> to vector<8x32xbf16>
    %cst_170 = arith.constant dense<0.000000e+00> : vector<8x768xf32>
    %309 = tpu.matmul %308, %307, %cst_170 {dimension_numbers = #tpu.dot_dimension_numbers<[1], [0], [0], [1], [0, 0, 1, 1], [], []>} : vector<8x32xbf16>, vector<32x768xbf16>, vector<8x768xf32> -> vector<8x768xf32>
    %c0_171 = arith.constant 0 : index
    %c0_172 = arith.constant 0 : index
    %c0_173 = arith.constant 0 : index
    %310 = vector.load %arg19[%c0_171, %c0_172, %c0_173] : memref<2x1x768xf32, #tpu.memory_space<vmem>>, vector<1x1x768xf32>
    %311 = vector.shape_cast %310 : vector<1x1x768xf32> to vector<1x768xf32>
    %312 = vector.broadcast %311 : vector<1x768xf32> to vector<8x768xf32>
    %313 = arith.addf %309, %312 : vector<8x768xf32>
    %314 = arith.truncf %313 : vector<8x768xf32> to vector<8x768xbf16>
    %cst_174 = arith.constant 0.000000e+00 : f32
    %315 = vector.broadcast %cst_174 : f32 to vector<8x32xf32>
    %316 = vector.extract_strided_slice %314 {offsets = [0, 0], sizes = [8, 128], strides = [1, 1]} : vector<8x768xbf16> to vector<8x128xbf16>
    %317 = vector.extract_strided_slice %314 {offsets = [0, 128], sizes = [8, 128], strides = [1, 1]} : vector<8x768xbf16> to vector<8x128xbf16>
    %318 = vector.extract_strided_slice %314 {offsets = [0, 256], sizes = [8, 128], strides = [1, 1]} : vector<8x768xbf16> to vector<8x128xbf16>
    %cst_175 = arith.constant dense<0.000000e+00> : vector<8x8xf32>
    %319 = tpu.matmul %316, %317, %cst_175 {dimension_numbers = #tpu.dot_dimension_numbers<[1], [1], [0], [0], [0, 0, 1, 0], [], []>} : vector<8x128xbf16>, vector<8x128xbf16>, vector<8x8xf32> -> vector<8x8xf32>
    %cst_176 = arith.constant 2.500000e-01 : f32
    %320 = vector.broadcast %cst_176 : f32 to vector<8x8xf32>
    %321 = arith.mulf %319, %320 : vector<8x8xf32>
    %322 = arith.addf %321, %288 : vector<8x8xf32>
    %cst_177 = arith.constant dense<0xFF800000> : vector<8xf32>
    %323 = vector.multi_reduction <maximumf>, %322, %cst_177 [1] : vector<8x8xf32> to vector<8xf32>
    %324 = vector.shape_cast %323 : vector<8xf32> to vector<8x1xf32>
    %325 = vector.broadcast %324 : vector<8x1xf32> to vector<8x8xf32>
    %326 = arith.subf %322, %325 : vector<8x8xf32>
    %327 = math.exp %326 : vector<8x8xf32>
    %cst_178 = arith.constant dense<0.000000e+00> : vector<8xf32>
    %328 = vector.multi_reduction <add>, %327, %cst_178 [1] : vector<8x8xf32> to vector<8xf32>
    %329 = vector.shape_cast %328 : vector<8xf32> to vector<8x1xf32>
    %330 = tpu.reciprocal %329 {approx = true} : vector<8x1xf32> -> vector<8x1xf32>
    %331 = vector.broadcast %330 : vector<8x1xf32> to vector<8x8xf32>
    %332 = arith.mulf %327, %331 : vector<8x8xf32>
    %333 = arith.truncf %332 : vector<8x8xf32> to vector<8x8xbf16>
    %cst_179 = arith.constant dense<0.000000e+00> : vector<8x128xf32>
    %334 = tpu.matmul %333, %318, %cst_179 {dimension_numbers = #tpu.dot_dimension_numbers<[1], [0], [0], [1], [0, 0, 1, 1], [], []>} : vector<8x8xbf16>, vector<8x128xbf16>, vector<8x128xf32> -> vector<8x128xf32>
    %335 = arith.truncf %334 : vector<8x128xf32> to vector<8x128xbf16>
    %c0_180 = arith.constant 0 : index
    %c0_181 = arith.constant 0 : index
    %c0_182 = arith.constant 0 : index
    %c0_183 = arith.constant 0 : index
    %336 = vector.load %arg20[%c0_180, %c0_181, %c0_182, %c0_183] : memref<2x2x128x32xbf16, #tpu.memory_space<vmem>>, vector<1x1x128x32xbf16>
    %337 = vector.shape_cast %336 : vector<1x1x128x32xbf16> to vector<128x32xbf16>
    %cst_184 = arith.constant dense<0.000000e+00> : vector<8x32xf32>
    %338 = tpu.matmul %335, %337, %cst_184 {dimension_numbers = #tpu.dot_dimension_numbers<[1], [0], [0], [1], [0, 0, 1, 1], [], []>} : vector<8x128xbf16>, vector<128x32xbf16>, vector<8x32xf32> -> vector<8x32xf32>
    %339 = arith.addf %315, %338 : vector<8x32xf32>
    %340 = vector.extract_strided_slice %314 {offsets = [0, 384], sizes = [8, 128], strides = [1, 1]} : vector<8x768xbf16> to vector<8x128xbf16>
    %341 = vector.extract_strided_slice %314 {offsets = [0, 512], sizes = [8, 128], strides = [1, 1]} : vector<8x768xbf16> to vector<8x128xbf16>
    %342 = vector.extract_strided_slice %314 {offsets = [0, 640], sizes = [8, 128], strides = [1, 1]} : vector<8x768xbf16> to vector<8x128xbf16>
    %cst_185 = arith.constant dense<0.000000e+00> : vector<8x8xf32>
    %343 = tpu.matmul %340, %341, %cst_185 {dimension_numbers = #tpu.dot_dimension_numbers<[1], [1], [0], [0], [0, 0, 1, 0], [], []>} : vector<8x128xbf16>, vector<8x128xbf16>, vector<8x8xf32> -> vector<8x8xf32>
    %cst_186 = arith.constant 2.500000e-01 : f32
    %344 = vector.broadcast %cst_186 : f32 to vector<8x8xf32>
    %345 = arith.mulf %343, %344 : vector<8x8xf32>
    %346 = arith.addf %345, %288 : vector<8x8xf32>
    %cst_187 = arith.constant dense<0xFF800000> : vector<8xf32>
    %347 = vector.multi_reduction <maximumf>, %346, %cst_187 [1] : vector<8x8xf32> to vector<8xf32>
    %348 = vector.shape_cast %347 : vector<8xf32> to vector<8x1xf32>
    %349 = vector.broadcast %348 : vector<8x1xf32> to vector<8x8xf32>
    %350 = arith.subf %346, %349 : vector<8x8xf32>
    %351 = math.exp %350 : vector<8x8xf32>
    %cst_188 = arith.constant dense<0.000000e+00> : vector<8xf32>
    %352 = vector.multi_reduction <add>, %351, %cst_188 [1] : vector<8x8xf32> to vector<8xf32>
    %353 = vector.shape_cast %352 : vector<8xf32> to vector<8x1xf32>
    %354 = tpu.reciprocal %353 {approx = true} : vector<8x1xf32> -> vector<8x1xf32>
    %355 = vector.broadcast %354 : vector<8x1xf32> to vector<8x8xf32>
    %356 = arith.mulf %351, %355 : vector<8x8xf32>
    %357 = arith.truncf %356 : vector<8x8xf32> to vector<8x8xbf16>
    %cst_189 = arith.constant dense<0.000000e+00> : vector<8x128xf32>
    %358 = tpu.matmul %357, %342, %cst_189 {dimension_numbers = #tpu.dot_dimension_numbers<[1], [0], [0], [1], [0, 0, 1, 1], [], []>} : vector<8x8xbf16>, vector<8x128xbf16>, vector<8x128xf32> -> vector<8x128xf32>
    %359 = arith.truncf %358 : vector<8x128xf32> to vector<8x128xbf16>
    %c0_190 = arith.constant 0 : index
    %c1_191 = arith.constant 1 : index
    %c0_192 = arith.constant 0 : index
    %c0_193 = arith.constant 0 : index
    %360 = vector.load %arg20[%c0_190, %c1_191, %c0_192, %c0_193] : memref<2x2x128x32xbf16, #tpu.memory_space<vmem>>, vector<1x1x128x32xbf16>
    %361 = vector.shape_cast %360 : vector<1x1x128x32xbf16> to vector<128x32xbf16>
    %cst_194 = arith.constant dense<0.000000e+00> : vector<8x32xf32>
    %362 = tpu.matmul %359, %361, %cst_194 {dimension_numbers = #tpu.dot_dimension_numbers<[1], [0], [0], [1], [0, 0, 1, 1], [], []>} : vector<8x128xbf16>, vector<128x32xbf16>, vector<8x32xf32> -> vector<8x32xf32>
    %363 = arith.addf %339, %362 : vector<8x32xf32>
    %364 = arith.addf %289, %363 : vector<8x32xf32>
    %c0_195 = arith.constant 0 : index
    %c0_196 = arith.constant 0 : index
    %c0_197 = arith.constant 0 : index
    %365 = vector.load %arg21[%c0_195, %c0_196, %c0_197] : memref<2x1x32xf32, #tpu.memory_space<vmem>>, vector<1x1x32xf32>
    %366 = vector.shape_cast %365 : vector<1x1x32xf32> to vector<1x32xf32>
    %367 = vector.broadcast %366 : vector<1x32xf32> to vector<8x32xf32>
    %368 = arith.addf %364, %367 : vector<8x32xf32>
    %c0_198 = arith.constant 0 : index
    %c0_199 = arith.constant 0 : index
    %369 = vector.load %arg29[%c0_198, %c0_199] : memref<48x32xf32, #tpu.memory_space<vmem>>, vector<8x32xf32>
    tpu.vector_store %arg29[%c0_198, %c0_199], %368 {strides = array<i32>} : memref<48x32xf32, #tpu.memory_space<vmem>>, vector<8x32xf32>,
    %c0_200 = arith.constant 0 : index
    %c0_201 = arith.constant 0 : index
    %370 = vector.load %arg29[%c0_200, %c0_201] : memref<48x32xf32, #tpu.memory_space<vmem>>, vector<8x32xf32>
    %cst_202 = arith.constant dense<0.000000e+00> : vector<8xf32>
    %371 = vector.multi_reduction <add>, %370, %cst_202 [1] : vector<8x32xf32> to vector<8xf32>
    %372 = vector.shape_cast %371 : vector<8xf32> to vector<8x1xf32>
    %cst_203 = arith.constant 3.200000e+01 : f32
    %373 = vector.broadcast %cst_203 : f32 to vector<8x1xf32>
    %374 = arith.divf %372, %373 : vector<8x1xf32>
    %375 = vector.broadcast %374 : vector<8x1xf32> to vector<8x32xf32>
    %376 = arith.subf %370, %375 : vector<8x32xf32>
    %377 = arith.mulf %376, %376 : vector<8x32xf32>
    %cst_204 = arith.constant dense<0.000000e+00> : vector<8xf32>
    %378 = vector.multi_reduction <add>, %377, %cst_204 [1] : vector<8x32xf32> to vector<8xf32>
    %379 = vector.shape_cast %378 : vector<8xf32> to vector<8x1xf32>
    %cst_205 = arith.constant 3.200000e+01 : f32
    %380 = vector.broadcast %cst_205 : f32 to vector<8x1xf32>
    %381 = arith.divf %379, %380 : vector<8x1xf32>
    %cst_206 = arith.constant 9.99999974E-6 : f32
    %382 = vector.broadcast %cst_206 : f32 to vector<8x1xf32>
    %383 = arith.addf %381, %382 : vector<8x1xf32>
    %384 = math.rsqrt %383 : vector<8x1xf32>
    %385 = vector.broadcast %384 : vector<8x1xf32> to vector<8x32xf32>
    %386 = arith.mulf %376, %385 : vector<8x32xf32>
    %c0_207 = arith.constant 0 : index
    %c0_208 = arith.constant 0 : index
    %c0_209 = arith.constant 0 : index
    %387 = vector.load %arg22[%c0_207, %c0_208, %c0_209] : memref<2x32x64xbf16, #tpu.memory_space<vmem>>, vector<1x32x64xbf16>
    %388 = vector.shape_cast %387 : vector<1x32x64xbf16> to vector<32x64xbf16>
    %389 = arith.truncf %386 : vector<8x32xf32> to vector<8x32xbf16>
    %cst_210 = arith.constant dense<0.000000e+00> : vector<8x64xf32>
    %390 = tpu.matmul %389, %388, %cst_210 {dimension_numbers = #tpu.dot_dimension_numbers<[1], [0], [0], [1], [0, 0, 1, 1], [], []>} : vector<8x32xbf16>, vector<32x64xbf16>, vector<8x64xf32> -> vector<8x64xf32>
    %c0_211 = arith.constant 0 : index
    %c0_212 = arith.constant 0 : index
    %c0_213 = arith.constant 0 : index
    %391 = vector.load %arg23[%c0_211, %c0_212, %c0_213] : memref<2x1x64xf32, #tpu.memory_space<vmem>>, vector<1x1x64xf32>
    %392 = vector.shape_cast %391 : vector<1x1x64xf32> to vector<1x64xf32>
    %393 = vector.broadcast %392 : vector<1x64xf32> to vector<8x64xf32>
    %394 = arith.addf %390, %393 : vector<8x64xf32>
    %cst_214 = arith.constant 5.000000e-01 : f32
    %395 = vector.broadcast %cst_214 : f32 to vector<8x64xf32>
    %396 = arith.mulf %395, %394 : vector<8x64xf32>
    %cst_215 = arith.constant 4.471500e-02 : f32
    %397 = vector.broadcast %cst_215 : f32 to vector<8x64xf32>
    %398 = arith.mulf %397, %394 : vector<8x64xf32>
    %399 = arith.mulf %398, %394 : vector<8x64xf32>
    %400 = arith.mulf %399, %394 : vector<8x64xf32>
    %401 = arith.addf %394, %400 : vector<8x64xf32>
    %cst_216 = arith.constant 0.797884583 : f32
    %402 = vector.broadcast %cst_216 : f32 to vector<8x64xf32>
    %403 = arith.mulf %402, %401 : vector<8x64xf32>
    %404 = math.tanh %403 : vector<8x64xf32>
    %cst_217 = arith.constant 1.000000e+00 : f32
    %405 = vector.broadcast %cst_217 : f32 to vector<8x64xf32>
    %406 = arith.addf %405, %404 : vector<8x64xf32>
    %407 = arith.mulf %396, %406 : vector<8x64xf32>
    %c0_218 = arith.constant 0 : index
    %c0_219 = arith.constant 0 : index
    %c0_220 = arith.constant 0 : index
    %408 = vector.load %arg24[%c0_218, %c0_219, %c0_220] : memref<2x64x32xbf16, #tpu.memory_space<vmem>>, vector<1x64x32xbf16>
    %409 = vector.shape_cast %408 : vector<1x64x32xbf16> to vector<64x32xbf16>
    %410 = arith.truncf %407 : vector<8x64xf32> to vector<8x64xbf16>
    %cst_221 = arith.constant dense<0.000000e+00> : vector<8x32xf32>
    %411 = tpu.matmul %410, %409, %cst_221 {dimension_numbers = #tpu.dot_dimension_numbers<[1], [0], [0], [1], [0, 0, 1, 1], [], []>} : vector<8x64xbf16>, vector<64x32xbf16>, vector<8x32xf32> -> vector<8x32xf32>
    %412 = arith.addf %370, %411 : vector<8x32xf32>
    %c0_222 = arith.constant 0 : index
    %c0_223 = arith.constant 0 : index
    %c0_224 = arith.constant 0 : index
    %413 = vector.load %arg25[%c0_222, %c0_223, %c0_224] : memref<2x1x32xf32, #tpu.memory_space<vmem>>, vector<1x1x32xf32>
    %414 = vector.shape_cast %413 : vector<1x1x32xf32> to vector<1x32xf32>
    %415 = vector.broadcast %414 : vector<1x32xf32> to vector<8x32xf32>
    %416 = arith.addf %412, %415 : vector<8x32xf32>
    %c0_225 = arith.constant 0 : index
    %c0_226 = arith.constant 0 : index
    %417 = vector.load %arg29[%c0_225, %c0_226] : memref<48x32xf32, #tpu.memory_space<vmem>>, vector<8x32xf32>
    tpu.vector_store %arg29[%c0_225, %c0_226], %416 {strides = array<i32>} : memref<48x32xf32, #tpu.memory_space<vmem>>, vector<8x32xf32>,
    %c0_227 = arith.constant 0 : index
    %c0_228 = arith.constant 0 : index
    %418 = vector.load %arg29[%c0_227, %c0_228] : memref<48x32xf32, #tpu.memory_space<vmem>>, vector<8x32xf32>
    %cst_229 = arith.constant dense<0.000000e+00> : vector<8xf32>
    %419 = vector.multi_reduction <add>, %418, %cst_229 [1] : vector<8x32xf32> to vector<8xf32>
    %420 = vector.shape_cast %419 : vector<8xf32> to vector<8x1xf32>
    %cst_230 = arith.constant 3.200000e+01 : f32
    %421 = vector.broadcast %cst_230 : f32 to vector<8x1xf32>
    %422 = arith.divf %420, %421 : vector<8x1xf32>
    %423 = vector.broadcast %422 : vector<8x1xf32> to vector<8x32xf32>
    %424 = arith.subf %418, %423 : vector<8x32xf32>
    %425 = arith.mulf %424, %424 : vector<8x32xf32>
    %cst_231 = arith.constant dense<0.000000e+00> : vector<8xf32>
    %426 = vector.multi_reduction <add>, %425, %cst_231 [1] : vector<8x32xf32> to vector<8xf32>
    %427 = vector.shape_cast %426 : vector<8xf32> to vector<8x1xf32>
    %cst_232 = arith.constant 3.200000e+01 : f32
    %428 = vector.broadcast %cst_232 : f32 to vector<8x1xf32>
    %429 = arith.divf %427, %428 : vector<8x1xf32>
    %cst_233 = arith.constant 9.99999974E-6 : f32
    %430 = vector.broadcast %cst_233 : f32 to vector<8x1xf32>
    %431 = arith.addf %429, %430 : vector<8x1xf32>
    %432 = math.rsqrt %431 : vector<8x1xf32>
    %433 = vector.broadcast %432 : vector<8x1xf32> to vector<8x32xf32>
    %434 = arith.mulf %424, %433 : vector<8x32xf32>
    %c1_234 = arith.constant 1 : index
    %c0_235 = arith.constant 0 : index
    %c0_236 = arith.constant 0 : index
    %435 = vector.load %arg18[%c1_234, %c0_235, %c0_236] : memref<2x32x768xbf16, #tpu.memory_space<vmem>>, vector<1x32x768xbf16>
    %436 = vector.shape_cast %435 : vector<1x32x768xbf16> to vector<32x768xbf16>
    %437 = arith.truncf %434 : vector<8x32xf32> to vector<8x32xbf16>
    %cst_237 = arith.constant dense<0.000000e+00> : vector<8x768xf32>
    %438 = tpu.matmul %437, %436, %cst_237 {dimension_numbers = #tpu.dot_dimension_numbers<[1], [0], [0], [1], [0, 0, 1, 1], [], []>} : vector<8x32xbf16>, vector<32x768xbf16>, vector<8x768xf32> -> vector<8x768xf32>
    %c1_238 = arith.constant 1 : index
    %c0_239 = arith.constant 0 : index
    %c0_240 = arith.constant 0 : index
    %439 = vector.load %arg19[%c1_238, %c0_239, %c0_240] : memref<2x1x768xf32, #tpu.memory_space<vmem>>, vector<1x1x768xf32>
    %440 = vector.shape_cast %439 : vector<1x1x768xf32> to vector<1x768xf32>
    %441 = vector.broadcast %440 : vector<1x768xf32> to vector<8x768xf32>
    %442 = arith.addf %438, %441 : vector<8x768xf32>
    %443 = arith.truncf %442 : vector<8x768xf32> to vector<8x768xbf16>
    %cst_241 = arith.constant 0.000000e+00 : f32
    %444 = vector.broadcast %cst_241 : f32 to vector<8x32xf32>
    %445 = vector.extract_strided_slice %443 {offsets = [0, 0], sizes = [8, 128], strides = [1, 1]} : vector<8x768xbf16> to vector<8x128xbf16>
    %446 = vector.extract_strided_slice %443 {offsets = [0, 128], sizes = [8, 128], strides = [1, 1]} : vector<8x768xbf16> to vector<8x128xbf16>
    %447 = vector.extract_strided_slice %443 {offsets = [0, 256], sizes = [8, 128], strides = [1, 1]} : vector<8x768xbf16> to vector<8x128xbf16>
    %cst_242 = arith.constant dense<0.000000e+00> : vector<8x8xf32>
    %448 = tpu.matmul %445, %446, %cst_242 {dimension_numbers = #tpu.dot_dimension_numbers<[1], [1], [0], [0], [0, 0, 1, 0], [], []>} : vector<8x128xbf16>, vector<8x128xbf16>, vector<8x8xf32> -> vector<8x8xf32>
    %cst_243 = arith.constant 2.500000e-01 : f32
    %449 = vector.broadcast %cst_243 : f32 to vector<8x8xf32>
    %450 = arith.mulf %448, %449 : vector<8x8xf32>
    %451 = arith.addf %450, %288 : vector<8x8xf32>
    %cst_244 = arith.constant dense<0xFF800000> : vector<8xf32>
    %452 = vector.multi_reduction <maximumf>, %451, %cst_244 [1] : vector<8x8xf32> to vector<8xf32>
    %453 = vector.shape_cast %452 : vector<8xf32> to vector<8x1xf32>
    %454 = vector.broadcast %453 : vector<8x1xf32> to vector<8x8xf32>
    %455 = arith.subf %451, %454 : vector<8x8xf32>
    %456 = math.exp %455 : vector<8x8xf32>
    %cst_245 = arith.constant dense<0.000000e+00> : vector<8xf32>
    %457 = vector.multi_reduction <add>, %456, %cst_245 [1] : vector<8x8xf32> to vector<8xf32>
    %458 = vector.shape_cast %457 : vector<8xf32> to vector<8x1xf32>
    %459 = tpu.reciprocal %458 {approx = true} : vector<8x1xf32> -> vector<8x1xf32>
    %460 = vector.broadcast %459 : vector<8x1xf32> to vector<8x8xf32>
    %461 = arith.mulf %456, %460 : vector<8x8xf32>
    %462 = arith.truncf %461 : vector<8x8xf32> to vector<8x8xbf16>
    %cst_246 = arith.constant dense<0.000000e+00> : vector<8x128xf32>
    %463 = tpu.matmul %462, %447, %cst_246 {dimension_numbers = #tpu.dot_dimension_numbers<[1], [0], [0], [1], [0, 0, 1, 1], [], []>} : vector<8x8xbf16>, vector<8x128xbf16>, vector<8x128xf32> -> vector<8x128xf32>
    %464 = arith.truncf %463 : vector<8x128xf32> to vector<8x128xbf16>
    %c1_247 = arith.constant 1 : index
    %c0_248 = arith.constant 0 : index
    %c0_249 = arith.constant 0 : index
    %c0_250 = arith.constant 0 : index
    %465 = vector.load %arg20[%c1_247, %c0_248, %c0_249, %c0_250] : memref<2x2x128x32xbf16, #tpu.memory_space<vmem>>, vector<1x1x128x32xbf16>
    %466 = vector.shape_cast %465 : vector<1x1x128x32xbf16> to vector<128x32xbf16>
    %cst_251 = arith.constant dense<0.000000e+00> : vector<8x32xf32>
    %467 = tpu.matmul %464, %466, %cst_251 {dimension_numbers = #tpu.dot_dimension_numbers<[1], [0], [0], [1], [0, 0, 1, 1], [], []>} : vector<8x128xbf16>, vector<128x32xbf16>, vector<8x32xf32> -> vector<8x32xf32>
    %468 = arith.addf %444, %467 : vector<8x32xf32>
    %469 = vector.extract_strided_slice %443 {offsets = [0, 384], sizes = [8, 128], strides = [1, 1]} : vector<8x768xbf16> to vector<8x128xbf16>
    %470 = vector.extract_strided_slice %443 {offsets = [0, 512], sizes = [8, 128], strides = [1, 1]} : vector<8x768xbf16> to vector<8x128xbf16>
    %471 = vector.extract_strided_slice %443 {offsets = [0, 640], sizes = [8, 128], strides = [1, 1]} : vector<8x768xbf16> to vector<8x128xbf16>
    %cst_252 = arith.constant dense<0.000000e+00> : vector<8x8xf32>
    %472 = tpu.matmul %469, %470, %cst_252 {dimension_numbers = #tpu.dot_dimension_numbers<[1], [1], [0], [0], [0, 0, 1, 0], [], []>} : vector<8x128xbf16>, vector<8x128xbf16>, vector<8x8xf32> -> vector<8x8xf32>
    %cst_253 = arith.constant 2.500000e-01 : f32
    %473 = vector.broadcast %cst_253 : f32 to vector<8x8xf32>
    %474 = arith.mulf %472, %473 : vector<8x8xf32>
    %475 = arith.addf %474, %288 : vector<8x8xf32>
    %cst_254 = arith.constant dense<0xFF800000> : vector<8xf32>
    %476 = vector.multi_reduction <maximumf>, %475, %cst_254 [1] : vector<8x8xf32> to vector<8xf32>
    %477 = vector.shape_cast %476 : vector<8xf32> to vector<8x1xf32>
    %478 = vector.broadcast %477 : vector<8x1xf32> to vector<8x8xf32>
    %479 = arith.subf %475, %478 : vector<8x8xf32>
    %480 = math.exp %479 : vector<8x8xf32>
    %cst_255 = arith.constant dense<0.000000e+00> : vector<8xf32>
    %481 = vector.multi_reduction <add>, %480, %cst_255 [1] : vector<8x8xf32> to vector<8xf32>
    %482 = vector.shape_cast %481 : vector<8xf32> to vector<8x1xf32>
    %483 = tpu.reciprocal %482 {approx = true} : vector<8x1xf32> -> vector<8x1xf32>
    %484 = vector.broadcast %483 : vector<8x1xf32> to vector<8x8xf32>
    %485 = arith.mulf %480, %484 : vector<8x8xf32>
    %486 = arith.truncf %485 : vector<8x8xf32> to vector<8x8xbf16>
    %cst_256 = arith.constant dense<0.000000e+00> : vector<8x128xf32>
    %487 = tpu.matmul %486, %471, %cst_256 {dimension_numbers = #tpu.dot_dimension_numbers<[1], [0], [0], [1], [0, 0, 1, 1], [], []>} : vector<8x8xbf16>, vector<8x128xbf16>, vector<8x128xf32> -> vector<8x128xf32>
    %488 = arith.truncf %487 : vector<8x128xf32> to vector<8x128xbf16>
    %c1_257 = arith.constant 1 : index
    %c1_258 = arith.constant 1 : index
    %c0_259 = arith.constant 0 : index
    %c0_260 = arith.constant 0 : index
    %489 = vector.load %arg20[%c1_257, %c1_258, %c0_259, %c0_260] : memref<2x2x128x32xbf16, #tpu.memory_space<vmem>>, vector<1x1x128x32xbf16>
    %490 = vector.shape_cast %489 : vector<1x1x128x32xbf16> to vector<128x32xbf16>
    %cst_261 = arith.constant dense<0.000000e+00> : vector<8x32xf32>
    %491 = tpu.matmul %488, %490, %cst_261 {dimension_numbers = #tpu.dot_dimension_numbers<[1], [0], [0], [1], [0, 0, 1, 1], [], []>} : vector<8x128xbf16>, vector<128x32xbf16>, vector<8x32xf32> -> vector<8x32xf32>
    %492 = arith.addf %468, %491 : vector<8x32xf32>
    %493 = arith.addf %418, %492 : vector<8x32xf32>
    %c1_262 = arith.constant 1 : index
    %c0_263 = arith.constant 0 : index
    %c0_264 = arith.constant 0 : index
    %494 = vector.load %arg21[%c1_262, %c0_263, %c0_264] : memref<2x1x32xf32, #tpu.memory_space<vmem>>, vector<1x1x32xf32>
    %495 = vector.shape_cast %494 : vector<1x1x32xf32> to vector<1x32xf32>
    %496 = vector.broadcast %495 : vector<1x32xf32> to vector<8x32xf32>
    %497 = arith.addf %493, %496 : vector<8x32xf32>
    %c0_265 = arith.constant 0 : index
    %c0_266 = arith.constant 0 : index
    %498 = vector.load %arg29[%c0_265, %c0_266] : memref<48x32xf32, #tpu.memory_space<vmem>>, vector<8x32xf32>
    tpu.vector_store %arg29[%c0_265, %c0_266], %497 {strides = array<i32>} : memref<48x32xf32, #tpu.memory_space<vmem>>, vector<8x32xf32>,
    %c0_267 = arith.constant 0 : index
    %c0_268 = arith.constant 0 : index
    %499 = vector.load %arg29[%c0_267, %c0_268] : memref<48x32xf32, #tpu.memory_space<vmem>>, vector<8x32xf32>
    %cst_269 = arith.constant dense<0.000000e+00> : vector<8xf32>
    %500 = vector.multi_reduction <add>, %499, %cst_269 [1] : vector<8x32xf32> to vector<8xf32>
    %501 = vector.shape_cast %500 : vector<8xf32> to vector<8x1xf32>
    %cst_270 = arith.constant 3.200000e+01 : f32
    %502 = vector.broadcast %cst_270 : f32 to vector<8x1xf32>
    %503 = arith.divf %501, %502 : vector<8x1xf32>
    %504 = vector.broadcast %503 : vector<8x1xf32> to vector<8x32xf32>
    %505 = arith.subf %499, %504 : vector<8x32xf32>
    %506 = arith.mulf %505, %505 : vector<8x32xf32>
    %cst_271 = arith.constant dense<0.000000e+00> : vector<8xf32>
    %507 = vector.multi_reduction <add>, %506, %cst_271 [1] : vector<8x32xf32> to vector<8xf32>
    %508 = vector.shape_cast %507 : vector<8xf32> to vector<8x1xf32>
    %cst_272 = arith.constant 3.200000e+01 : f32
    %509 = vector.broadcast %cst_272 : f32 to vector<8x1xf32>
    %510 = arith.divf %508, %509 : vector<8x1xf32>
    %cst_273 = arith.constant 9.99999974E-6 : f32
    %511 = vector.broadcast %cst_273 : f32 to vector<8x1xf32>
    %512 = arith.addf %510, %511 : vector<8x1xf32>
    %513 = math.rsqrt %512 : vector<8x1xf32>
    %514 = vector.broadcast %513 : vector<8x1xf32> to vector<8x32xf32>
    %515 = arith.mulf %505, %514 : vector<8x32xf32>
    %c1_274 = arith.constant 1 : index
    %c0_275 = arith.constant 0 : index
    %c0_276 = arith.constant 0 : index
    %516 = vector.load %arg22[%c1_274, %c0_275, %c0_276] : memref<2x32x64xbf16, #tpu.memory_space<vmem>>, vector<1x32x64xbf16>
    %517 = vector.shape_cast %516 : vector<1x32x64xbf16> to vector<32x64xbf16>
    %518 = arith.truncf %515 : vector<8x32xf32> to vector<8x32xbf16>
    %cst_277 = arith.constant dense<0.000000e+00> : vector<8x64xf32>
    %519 = tpu.matmul %518, %517, %cst_277 {dimension_numbers = #tpu.dot_dimension_numbers<[1], [0], [0], [1], [0, 0, 1, 1], [], []>} : vector<8x32xbf16>, vector<32x64xbf16>, vector<8x64xf32> -> vector<8x64xf32>
    %c1_278 = arith.constant 1 : index
    %c0_279 = arith.constant 0 : index
    %c0_280 = arith.constant 0 : index
    %520 = vector.load %arg23[%c1_278, %c0_279, %c0_280] : memref<2x1x64xf32, #tpu.memory_space<vmem>>, vector<1x1x64xf32>
    %521 = vector.shape_cast %520 : vector<1x1x64xf32> to vector<1x64xf32>
    %522 = vector.broadcast %521 : vector<1x64xf32> to vector<8x64xf32>
    %523 = arith.addf %519, %522 : vector<8x64xf32>
    %cst_281 = arith.constant 5.000000e-01 : f32
    %524 = vector.broadcast %cst_281 : f32 to vector<8x64xf32>
    %525 = arith.mulf %524, %523 : vector<8x64xf32>
    %cst_282 = arith.constant 4.471500e-02 : f32
    %526 = vector.broadcast %cst_282 : f32 to vector<8x64xf32>
    %527 = arith.mulf %526, %523 : vector<8x64xf32>
    %528 = arith.mulf %527, %523 : vector<8x64xf32>
    %529 = arith.mulf %528, %523 : vector<8x64xf32>
    %530 = arith.addf %523, %529 : vector<8x64xf32>
    %cst_283 = arith.constant 0.797884583 : f32
    %531 = vector.broadcast %cst_283 : f32 to vector<8x64xf32>
    %532 = arith.mulf %531, %530 : vector<8x64xf32>
    %533 = math.tanh %532 : vector<8x64xf32>
    %cst_284 = arith.constant 1.000000e+00 : f32
    %534 = vector.broadcast %cst_284 : f32 to vector<8x64xf32>
    %535 = arith.addf %534, %533 : vector<8x64xf32>
    %536 = arith.mulf %525, %535 : vector<8x64xf32>
    %c1_285 = arith.constant 1 : index
    %c0_286 = arith.constant 0 : index
    %c0_287 = arith.constant 0 : index
    %537 = vector.load %arg24[%c1_285, %c0_286, %c0_287] : memref<2x64x32xbf16, #tpu.memory_space<vmem>>, vector<1x64x32xbf16>
    %538 = vector.shape_cast %537 : vector<1x64x32xbf16> to vector<64x32xbf16>
    %539 = arith.truncf %536 : vector<8x64xf32> to vector<8x64xbf16>
    %cst_288 = arith.constant dense<0.000000e+00> : vector<8x32xf32>
    %540 = tpu.matmul %539, %538, %cst_288 {dimension_numbers = #tpu.dot_dimension_numbers<[1], [0], [0], [1], [0, 0, 1, 1], [], []>} : vector<8x64xbf16>, vector<64x32xbf16>, vector<8x32xf32> -> vector<8x32xf32>
    %541 = arith.addf %499, %540 : vector<8x32xf32>
    %c1_289 = arith.constant 1 : index
    %c0_290 = arith.constant 0 : index
    %c0_291 = arith.constant 0 : index
    %542 = vector.load %arg25[%c1_289, %c0_290, %c0_291] : memref<2x1x32xf32, #tpu.memory_space<vmem>>, vector<1x1x32xf32>
    %543 = vector.shape_cast %542 : vector<1x1x32xf32> to vector<1x32xf32>
    %544 = vector.broadcast %543 : vector<1x32xf32> to vector<8x32xf32>
    %545 = arith.addf %541, %544 : vector<8x32xf32>
    %c0_292 = arith.constant 0 : index
    %c0_293 = arith.constant 0 : index
    %546 = vector.load %arg29[%c0_292, %c0_293] : memref<48x32xf32, #tpu.memory_space<vmem>>, vector<8x32xf32>
    tpu.vector_store %arg29[%c0_292, %c0_293], %545 {strides = array<i32>} : memref<48x32xf32, #tpu.memory_space<vmem>>, vector<8x32xf32>,
    %c2 = arith.constant 2 : index
    %c0_294 = arith.constant 0 : index
    %547 = vector.load %arg29[%c2, %c0_294] : memref<48x32xf32, #tpu.memory_space<vmem>>, vector<1x32xf32>
    %c0_295 = arith.constant 0 : index
    %c0_296 = arith.constant 0 : index
    %548 = vector.load %arg26[%c0_295, %c0_296] : memref<32x10xf32, #tpu.memory_space<vmem>>, vector<32x10xf32>
    %cst_297 = arith.constant dense<0.000000e+00> : vector<1x10xf32>
    %549 = tpu.matmul %547, %548, %cst_297 {dimension_numbers = #tpu.dot_dimension_numbers<[1], [0], [0], [1], [0, 0, 1, 1], [], []>} : vector<1x32xf32>, vector<32x10xf32>, vector<1x10xf32> -> vector<1x10xf32>
    %c0_298 = arith.constant 0 : index
    %c0_299 = arith.constant 0 : index
    %550 = vector.load %arg27[%c0_298, %c0_299] : memref<1x10xf32, #tpu.memory_space<vmem>>, vector<1x10xf32>
    %551 = arith.addf %549, %550 : vector<1x10xf32>
    %cst_300 = arith.constant dense<0xFF800000> : vector<1xf32>
    %552 = vector.multi_reduction <maximumf>, %551, %cst_300 [1] : vector<1x10xf32> to vector<1xf32>
    %553 = vector.shape_cast %552 : vector<1xf32> to vector<1x1xf32>
    %554 = vector.broadcast %553 : vector<1x1xf32> to vector<1x10xf32>
    %555 = arith.subf %551, %554 : vector<1x10xf32>
    %556 = math.exp %555 : vector<1x10xf32>
    %cst_301 = arith.constant dense<0.000000e+00> : vector<1xf32>
    %557 = vector.multi_reduction <add>, %556, %cst_301 [1] : vector<1x10xf32> to vector<1xf32>
    %558 = vector.shape_cast %557 : vector<1xf32> to vector<1x1xf32>
    %559 = math.log %558 : vector<1x1xf32>
    %560 = vector.broadcast %559 : vector<1x1xf32> to vector<1x10xf32>
    %561 = arith.subf %555, %560 : vector<1x10xf32>
    %cst_302 = arith.constant 0.000000e+00 : f32
    %562 = vector.broadcast %cst_302 : f32 to vector<1x118xf32>
    %563 = tpu.concatenate %561, %562 in 1 : vector<1x10xf32>, vector<1x118xf32> -> vector<1x128xf32>
    %cst_303 = arith.constant 0.000000e+00 : f32
    %564 = vector.broadcast %cst_303 : f32 to vector<7x128xf32>
    %565 = tpu.concatenate %563, %564 in 0 : vector<1x128xf32>, vector<7x128xf32> -> vector<8x128xf32>
    %c0_304 = arith.constant 0 : index
    %c0_305 = arith.constant 0 : index
    %c0_306 = arith.constant 0 : index
    %566 = vector.load %arg28[%c0_304, %c0_305, %c0_306] : memref<1x8x128xf32, #tpu.memory_space<vmem>>, vector<1x8x128xf32>
    %567 = vector.shape_cast %566 : vector<1x8x128xf32> to vector<8x128xf32>
    %568 = vector.shape_cast %565 : vector<8x128xf32> to vector<1x8x128xf32>
    tpu.vector_store %arg28[%c0_304, %c0_305, %c0_306], %568 {strides = array<i32>} : memref<1x8x128xf32, #tpu.memory_space<vmem>>, vector<1x8x128xf32>,
    return
  }
  func.func @transform_0(%arg0: i32) -> (i32, i32, i32) {
    %c0_i32 = arith.constant 0 : i32
    %c0_i32_0 = arith.constant 0 : i32
    %c0_i32_1 = arith.constant 0 : i32
    return %arg0, %c0_i32, %c0_i32_0 : i32, i32, i32
  }
  func.func @transform_1(%arg0: i32) -> (i32, i32) {
    %c0_i32 = arith.constant 0 : i32
    %c0_i32_0 = arith.constant 0 : i32
    %c0_i32_1 = arith.constant 0 : i32
    return %c0_i32, %c0_i32_0 : i32, i32
  }
  func.func @transform_2(%arg0: i32) -> (i32, i32) {
    %c0_i32 = arith.constant 0 : i32
    %c0_i32_0 = arith.constant 0 : i32
    %c0_i32_1 = arith.constant 0 : i32
    return %c0_i32, %c0_i32_0 : i32, i32
  }
  func.func @transform_3(%arg0: i32) -> (i32, i32) {
    %c0_i32 = arith.constant 0 : i32
    %c0_i32_0 = arith.constant 0 : i32
    %c0_i32_1 = arith.constant 0 : i32
    return %c0_i32, %c0_i32_0 : i32, i32
  }
  func.func @transform_4(%arg0: i32) -> (i32, i32) {
    %c0_i32 = arith.constant 0 : i32
    %c0_i32_0 = arith.constant 0 : i32
    %c0_i32_1 = arith.constant 0 : i32
    return %c0_i32, %c0_i32_0 : i32, i32
  }
  func.func @transform_5(%arg0: i32) -> (i32, i32) {
    %c0_i32 = arith.constant 0 : i32
    %c0_i32_0 = arith.constant 0 : i32
    %c0_i32_1 = arith.constant 0 : i32
    return %c0_i32, %c0_i32_0 : i32, i32
  }
  func.func @transform_6(%arg0: i32) -> (i32, i32) {
    %c0_i32 = arith.constant 0 : i32
    %c0_i32_0 = arith.constant 0 : i32
    %c0_i32_1 = arith.constant 0 : i32
    return %c0_i32, %c0_i32_0 : i32, i32
  }
  func.func @transform_7(%arg0: i32) -> (i32, i32, i32) {
    %c0_i32 = arith.constant 0 : i32
    %c0_i32_0 = arith.constant 0 : i32
    %c0_i32_1 = arith.constant 0 : i32
    %c0_i32_2 = arith.constant 0 : i32
    return %c0_i32, %c0_i32_0, %c0_i32_1 : i32, i32, i32
  }
  func.func @transform_8(%arg0: i32) -> (i32, i32, i32) {
    %c0_i32 = arith.constant 0 : i32
    %c0_i32_0 = arith.constant 0 : i32
    %c0_i32_1 = arith.constant 0 : i32
    %c0_i32_2 = arith.constant 0 : i32
    return %c0_i32, %c0_i32_0, %c0_i32_1 : i32, i32, i32
  }
  func.func @transform_9(%arg0: i32) -> (i32, i32, i32, i32) {
    %c0_i32 = arith.constant 0 : i32
    %c0_i32_0 = arith.constant 0 : i32
    %c0_i32_1 = arith.constant 0 : i32
    %c0_i32_2 = arith.constant 0 : i32
    %c0_i32_3 = arith.constant 0 : i32
    return %c0_i32, %c0_i32_0, %c0_i32_1, %c0_i32_2 : i32, i32, i32, i32
  }
  func.func @transform_10(%arg0: i32) -> (i32, i32, i32) {
    %c0_i32 = arith.constant 0 : i32
    %c0_i32_0 = arith.constant 0 : i32
    %c0_i32_1 = arith.constant 0 : i32
    %c0_i32_2 = arith.constant 0 : i32
    return %c0_i32, %c0_i32_0, %c0_i32_1 : i32, i32, i32
  }
  func.func @transform_11(%arg0: i32) -> (i32, i32, i32) {
    %c0_i32 = arith.constant 0 : i32
    %c0_i32_0 = arith.constant 0 : i32
    %c0_i32_1 = arith.constant 0 : i32
    %c0_i32_2 = arith.constant 0 : i32
    return %c0_i32, %c0_i32_0, %c0_i32_1 : i32, i32, i32
  }
  func.func @transform_12(%arg0: i32) -> (i32, i32, i32) {
    %c0_i32 = arith.constant 0 : i32
    %c0_i32_0 = arith.constant 0 : i32
    %c0_i32_1 = arith.constant 0 : i32
    %c0_i32_2 = arith.constant 0 : i32
    return %c0_i32, %c0_i32_0, %c0_i32_1 : i32, i32, i32
  }
  func.func @transform_13(%arg0: i32) -> (i32, i32, i32) {
    %c0_i32 = arith.constant 0 : i32
    %c0_i32_0 = arith.constant 0 : i32
    %c0_i32_1 = arith.constant 0 : i32
    %c0_i32_2 = arith.constant 0 : i32
    return %c0_i32, %c0_i32_0, %c0_i32_1 : i32, i32, i32
  }
  func.func @transform_14(%arg0: i32) -> (i32, i32, i32) {
    %c0_i32 = arith.constant 0 : i32
    %c0_i32_0 = arith.constant 0 : i32
    %c0_i32_1 = arith.constant 0 : i32
    %c0_i32_2 = arith.constant 0 : i32
    return %c0_i32, %c0_i32_0, %c0_i32_1 : i32, i32, i32
  }
  func.func @transform_15(%arg0: i32) -> (i32, i32) {
    %c0_i32 = arith.constant 0 : i32
    %c0_i32_0 = arith.constant 0 : i32
    %c0_i32_1 = arith.constant 0 : i32
    return %c0_i32, %c0_i32_0 : i32, i32
  }
  func.func @transform_16(%arg0: i32) -> (i32, i32) {
    %c0_i32 = arith.constant 0 : i32
    %c0_i32_0 = arith.constant 0 : i32
    %c0_i32_1 = arith.constant 0 : i32
    return %c0_i32, %c0_i32_0 : i32, i32
  }
  func.func @transform_17(%arg0: i32) -> (i32, i32, i32) {
    %c0_i32 = arith.constant 0 : i32
    %c0_i32_0 = arith.constant 0 : i32
    %c0_i32_1 = arith.constant 0 : i32
    %c0_i32_2 = arith.constant 0 : i32
    return %c0_i32, %c0_i32_0, %c0_i32_1 : i32, i32, i32
  }
  func.func @transform_18(%arg0: i32) -> (i32, i32, i32) {
    %c0_i32 = arith.constant 0 : i32
    %c0_i32_0 = arith.constant 0 : i32
    %c0_i32_1 = arith.constant 0 : i32
    %c0_i32_2 = arith.constant 0 : i32
    return %c0_i32, %c0_i32_0, %c0_i32_1 : i32, i32, i32
  }
  func.func @transform_19(%arg0: i32) -> (i32, i32, i32, i32) {
    %c0_i32 = arith.constant 0 : i32
    %c0_i32_0 = arith.constant 0 : i32
    %c0_i32_1 = arith.constant 0 : i32
    %c0_i32_2 = arith.constant 0 : i32
    %c0_i32_3 = arith.constant 0 : i32
    return %c0_i32, %c0_i32_0, %c0_i32_1, %c0_i32_2 : i32, i32, i32, i32
  }
  func.func @transform_20(%arg0: i32) -> (i32, i32, i32) {
    %c0_i32 = arith.constant 0 : i32
    %c0_i32_0 = arith.constant 0 : i32
    %c0_i32_1 = arith.constant 0 : i32
    %c0_i32_2 = arith.constant 0 : i32
    return %c0_i32, %c0_i32_0, %c0_i32_1 : i32, i32, i32
  }
  func.func @transform_21(%arg0: i32) -> (i32, i32, i32) {
    %c0_i32 = arith.constant 0 : i32
    %c0_i32_0 = arith.constant 0 : i32
    %c0_i32_1 = arith.constant 0 : i32
    %c0_i32_2 = arith.constant 0 : i32
    return %c0_i32, %c0_i32_0, %c0_i32_1 : i32, i32, i32
  }
  func.func @transform_22(%arg0: i32) -> (i32, i32, i32) {
    %c0_i32 = arith.constant 0 : i32
    %c0_i32_0 = arith.constant 0 : i32
    %c0_i32_1 = arith.constant 0 : i32
    %c0_i32_2 = arith.constant 0 : i32
    return %c0_i32, %c0_i32_0, %c0_i32_1 : i32, i32, i32
  }
  func.func @transform_23(%arg0: i32) -> (i32, i32, i32) {
    %c0_i32 = arith.constant 0 : i32
    %c0_i32_0 = arith.constant 0 : i32
    %c0_i32_1 = arith.constant 0 : i32
    %c0_i32_2 = arith.constant 0 : i32
    return %c0_i32, %c0_i32_0, %c0_i32_1 : i32, i32, i32
  }
  func.func @transform_24(%arg0: i32) -> (i32, i32, i32) {
    %c0_i32 = arith.constant 0 : i32
    %c0_i32_0 = arith.constant 0 : i32
    %c0_i32_1 = arith.constant 0 : i32
    %c0_i32_2 = arith.constant 0 : i32
    return %c0_i32, %c0_i32_0, %c0_i32_1 : i32, i32, i32
  }
  func.func @transform_25(%arg0: i32) -> (i32, i32) {
    %c0_i32 = arith.constant 0 : i32
    %c0_i32_0 = arith.constant 0 : i32
    %c0_i32_1 = arith.constant 0 : i32
    return %c0_i32, %c0_i32_0 : i32, i32
  }
  func.func @transform_26(%arg0: i32) -> (i32, i32) {
    %c0_i32 = arith.constant 0 : i32
    %c0_i32_0 = arith.constant 0 : i32
    %c0_i32_1 = arith.constant 0 : i32
    return %c0_i32, %c0_i32_0 : i32, i32
  }
  func.func @transform_27(%arg0: i32) -> (i32, i32, i32) {
    %c0_i32 = arith.constant 0 : i32
    %c0_i32_0 = arith.constant 0 : i32
    %c0_i32_1 = arith.constant 0 : i32
    return %arg0, %c0_i32, %c0_i32_0 : i32, i32, i32
  }
}

</mosaic_0001>

<bundles_post_ra>
// kernel: _lambda_.1
= control target key start
LH: loop header
LB: loop body
LE: loop exit
PB: predicated region body
PF: predicated region fallthrough
CT: control target
= control target key end

     0   :  { %s8921_s0 = inlined_call_operand.vmem [shape: f32[2,32,48], index: 0, kind: input, shape index: {}]   ;;  %s8922_s1 = inlined_call_operand.vmem [shape: f32[48,48], index: 1, kind: input, shape index: {}]   ;;  %s8923_s2 = inlined_call_operand.vmem [shape: f32[8,8], index: 2, kind: input, shape index: {}]   ;;  %s8924_s3 = inlined_call_operand.vmem [shape: bf16[48,32], index: 3, kind: input, shape index: {}]   ;;  %s8925_s4 = inlined_call_operand.vmem [shape: f32[1,32], index: 4, kind: input, shape index: {}]   ;;  %s8926_s5 = inlined_call_operand.vmem [shape: f32[16,32], index: 5, kind: input, shape index: {}]   ;;  %s8927_s6 = inlined_call_operand.vmem [shape: f32[1,32], index: 6, kind: input, shape index: {}]   ;;  %s8928_s7 = inlined_call_operand.vmem [shape: bf16[2,32,768], index: 7, kind: input, shape index: {}]   ;;  %s8929_s8 = inlined_call_operand.vmem [shape: f32[2,1,768], index: 8, kind: input, shape index: {}]   ;;  %s8930_s9 = inlined_call_operand.vmem [shape: bf16[2,2,128,32], index: 9, kind: input, shape index: {}]   ;;  %s8931_s10 = inlined_call_operand.vmem [shape: f32[2,1,32], index: 10, kind: input, shape index: {}]   ;;  %s8932_s11 = inlined_call_operand.vmem [shape: bf16[2,32,64], index: 11, kind: input, shape index: {}]   ;;  %s8933_s12 = inlined_call_operand.vmem [shape: f32[2,1,64], index: 12, kind: input, shape index: {}]   ;;  %s8934_s13 = inlined_call_operand.vmem [shape: bf16[2,64,32], index: 13, kind: input, shape index: {}]   ;;  %s8935_s14 = inlined_call_operand.vmem [shape: f32[2,1,32], index: 14, kind: input, shape index: {}]   ;;  %s8936_s15 = inlined_call_operand.vmem [shape: f32[2,32], index: 15, kind: input, shape index: {}]   ;;  %s8937_s16 = inlined_call_operand.vmem [shape: f32[1,32], index: 16, kind: input, shape index: {}]   ;;  %s8938_s17 = inlined_call_operand.vmem [shape: bf16[2,32,768], index: 17, kind: input, shape index: {}]   ;;  %s8939_s18 = inlined_call_operand.vmem [shape: f32[2,1,768], index: 18, kind: input, shape index: {}]   ;;  %s8940_s19 = inlined_call_operand.vmem [shape: bf16[2,2,128,32], index: 19, kind: input, shape index: {}]   ;;  %s8941_s20 = inlined_call_operand.vmem [shape: f32[2,1,32], index: 20, kind: input, shape index: {}]   ;;  %s8942_s21 = inlined_call_operand.vmem [shape: bf16[2,32,64], index: 21, kind: input, shape index: {}]   ;;  %s8943_s22 = inlined_call_operand.vmem [shape: f32[2,1,64], index: 22, kind: input, shape index: {}]   ;;  %s8944_s23 = inlined_call_operand.vmem [shape: bf16[2,64,32], index: 23, kind: input, shape index: {}]   ;;  %s8945_s24 = inlined_call_operand.vmem [shape: f32[2,1,32], index: 24, kind: input, shape index: {}]   ;;  %s8946_s25 = inlined_call_operand.vmem [shape: f32[32,10], index: 25, kind: input, shape index: {}]   ;;  %s8947_s26 = inlined_call_operand.vmem [shape: f32[1,10], index: 26, kind: input, shape index: {}]   ;;  %s8948_s27 = inlined_call_operand.vmem [shape: f32[2,8,128], index: 27, kind: output, shape index: {}]  }
   0x1   :  { %8961 = sst [smem:[#allocation5_spill]] %s8921_s0 }
   0x2   :  { %8962 = sst [smem:[#allocation6_spill]] %s8922_s1 }
   0x3   :  { %8963 = sst [smem:[#allocation7_spill]] %s8923_s2 }
   0x4   :  { %8964 = sst [smem:[#allocation8_spill]] %s8924_s3 }
   0x5   :  { %8965 = sst [smem:[#allocation9_spill]] %s8925_s4 }
   0x6   :  { %8966 = sst [smem:[#allocation10_spill]] %s8926_s5 }
   0x7   :  { %8967 = sst [smem:[#allocation11_spill]] %s8927_s6 }
   0x8   :  { %8968 = sst [smem:[#allocation12_spill]] %s8928_s7  ;;  %s7338_s7 = smov 0  }
   0x9   :  { %8969 = sst [smem:[#allocation13_spill]] %s8929_s8 }
   0xa   :  { %8970 = sst [smem:[#allocation14_spill]] %s8930_s9 }
   0xb   :  { %8971 = sst [smem:[#allocation15_spill]] %s8931_s10 }
   0xc   :  { %8972 = sst [smem:[#allocation16_spill]] %s8932_s11 }
   0xd   :  { %8973 = sst [smem:[#allocation17_spill]] %s8948_s27 }
   0xe LB: > { %8974 = sst [smem:[#allocation3_spill]] %s7193_s7  ;;  %s5709_s4 = sadd.s32 4294967295, %s7193_s7   ;;  %s7193_s7 = sphi %s7338_s7, %s37_s7  }
   0xf   : > { %p5713_p0 = scmp.ge.s32.totalorder %s7193_s7, 1  ;;  %p737_p1 = scmp.lt.s32.totalorder %s7193_s7, 3 }
  0x11   : > { %p738_p2 = pnand %p5713_p0, %p737_p1 }
  0x13   : > { %741 = sbr.rel (%p738_p2) target bundleno = 9617 (0x2591), region = 128 }
  0x18   : > { %s8975_s9 = sld [smem:[#allocation8_spill]]  ;;  %p808_p3 = scmp.lt.s32.totalorder %s5709_s4, 1  ;;  %vm855_vm0 = vcmask 392192   ;;  %vm916_vm1 = vcmask 1040384   ;;  %vm920_vm2 = vcmask 261120   ;;  %vm7197_vm3 = vmmov 0  }
  0x19   : > { %s8977_s11 = sld [smem:[#allocation5_spill]]  ;;  %vm2288_vm4 = vcmask 523264   ;;  %vm3848_vm5 = vcmask 1041408   ;;  %vm3850_vm6 = vcmask 1042432   ;;  %vm4163_vm7 = vcmask 1043456  }
  0x1a   : > { %s8992_s4 = smov (!%p808_p3, %s5709_s4), 1  ;;  %s8978_s30 = sld [smem:[#allocation11_spill]]  ;;  %vm4147_vm8 = vcmask 64512   ;;  %vm5639_vm9 = vcmask 73728   ;;  %vm5652_vm10 = vcmask 80896  }
  0x1b   : > { %8976 = sst [smem:[#allocation4_spill]] %s8992_s4  ;;  %s6083_s29 = sshll.u32 %s8992_s4, 5 }
  0x1c   : > { %s8979_s0 = sld [smem:[#allocation9_spill]] }
  0x1d   : > { %s8980_s1 = sld [smem:[#allocation10_spill]] }
  0x1e   : > { %v6806_v0 = vld [vmem:[%s8975_s9 + $0x10] sm:$0xff]   ;;  %v6807_v1 = vld [vmem:[%s8975_s9 + $0x8] sm:$0xff]   ;;  %v6808_v2 = vld [vmem:[%s8975_s9] sm:$0xff]   ;;  %s8981_s8 = sld [smem:[#allocation12_spill]] }
  0x1f   : > { %6278 = vmatprep.subr.bf16.mxu0 %v6806_v0  ;;  %s812_s2 = scalar_lea.vmem %s8977_s11, %s6083_s29  ;;  %s8982_s10 = sld [smem:[#allocation13_spill]] }
  0x20   : > { %6279 = vmatpush3.bf16.msra.mxu0 %v6806_v0  ;;  %v818_v3 = vld [vmem:[%s812_s2] sm:$0xff]  ;;  %v819_v4 = vld [vmem:[%s812_s2 + $0x8] sm:$0xff]  ;;  %v820_v5 = vld [vmem:[%s812_s2 + $0x10] sm:$0xff]  ;;  %s8983_s11 = sld [smem:[#allocation6_spill]] }
  0x21   : > { %6280 = vmatprep.subr.bf16.mxu0 %v6807_v1  ;;  %v828_v6 = vpack.c.bf16 %v819_v4, %v818_v3  ;;  %v821_v7 = vld [vmem:[%s812_s2 + $0x18] sm:$0xff]  ;;  %v913_v9 = vld [vmem:[%s8978_s30] sm:$0x1]  ;;  %s8984_s28 = sld [smem:[#allocation14_spill]] }
  0x22   : > { %v829_v8 = vpack.c.bf16 %v821_v7, %v820_v5  ;;  %v917_v10 = vsel %vm916_vm1, %v913_v9, 0.0  ;;  %v5717_v13 = vld [vmem:[%s8979_s0] ss:$0 sm:$0xff]  ;;  %s8985_s29 = sld [smem:[#allocation15_spill]] }
  0x23   : > { %6284 = vmatprep.mubr.msk.bf16.mxu0 %vm855_vm0, %v828_v6  ;;  %923 = vst.msk [vmem:[#allocation2 + $0x10] sm:$0xff] %vm920_vm2, %v917_v10  ;;  %926 = vst.msk [vmem:[#allocation2 + $0x28] sm:$0xff] %vm920_vm2, %v917_v10  ;;  %v911_v15 = vld [vmem:[%s8980_s1] sm:$0xff]  ;;  %v912_v21 = vld [vmem:[%s8980_s1 + $0x8] sm:$0xff]  ;;  %s8986_s3 = sld [smem:[#allocation16_spill]] }
  0x24   : > { %6281 = vmatpush3.bf16.msra.mxu0 %v6807_v1  ;;  %v6809_v4 = vld [vmem:[%s8981_s8 + $0x34] ss:$24 sps:$4 sm:$0xff]   ;;  %v6811_v5 = vld [vmem:[%s8981_s8 + $0x38] ss:$24 sps:$4 sm:$0xff]   ;;  %v6817_v10 = vld [vmem:[%s8981_s8 + $0x8] ss:$24 sps:$4 sm:$0xff]  }
  0x25   : > { %6282 = vmatprep.subr.bf16.mxu0 %v6808_v2  ;;  %v6813_v6 = vld [vmem:[%s8981_s8 + $0x3c] ss:$24 sps:$4 sm:$0xff]   ;;  %v6814_v7 = vld [vmem:[%s8981_s8 + $0x30] ss:$24 sps:$4 sm:$0xff]   ;;  %1146 = vmatprep.subr.bf16.mxu1 %v6809_v4  ;;  %v6819_v9 = vld [vmem:[%s8981_s8 + $0xc] ss:$24 sps:$4 sm:$0xff]  }
  0x26   : > { %1147 = vmatpush1.bf16.msra.mxu1 %v6814_v7  ;;  %s8987_s6 = sld [smem:[#allocation7_spill]] }
  0x27   : > { %s8988_s4 = sld [smem:[#allocation4_spill]] }
  0x28   : > { %6283 = vmatpush3.bf16.msra.mxu0 %v6808_v2  ;;  %s8989_s2 = sld [smem:[#allocation17_spill]] }
  0x29   : > { %1209 = vmatprep.subr.bf16.mxu0 %v6813_v6  ;;  %v7510_v6 = vld [vmem:[%s8982_s10] sm:$0x3f] }
  0x2a   : > { %v935_v11 = vld [vmem:[#allocation2 + $0x10] sm:$0xff]  ;;  %v938_v29 = vld [vmem:[#allocation2 + $0x28] sm:$0xff] }
  0x2b   : > { %6285 = vmatmul.mubr.msk.bf16.vlgmr.msra.gmra.mxu0 %vm855_vm0, %v829_v8  ;;  %v945_v12 = vsel %vm920_vm2, %v935_v11, 0.0  ;;  %v954_v33 = vsel %vm920_vm2, %v938_v29, 0.0  ;;  %v6815_v8 = vld [vmem:[%s8981_s8 + $0x4] ss:$24 sps:$4 sm:$0xff]  }
  0x2c   : > { %946 = vadd.xlane.f32.xlu1 %v945_v12  ;;  %1210 = vmatpush1.bf16.msra.mxu0 %v6811_v5  ;;  %v7195_v12 = vmov 0  }
  0x2d   : > { %1148 = vmatprep.subr.bf16.mxu1 %v6815_v8  ;;  %1211 = vmatprep.subr.bf16.mxu0 %v6819_v9  ;;  %s5716_s7 = sshll.u32 %s8988_s4, 3 }
  0x2e   : > { %1166 = vmatprep.mubr.bf16.mxu1 %v7195_v12  ;;  %1229 = vmatprep.mubr.bf16.mxu0 %v7195_v12  ;;  %s816_s30 = scalar_lea.vmem %s8989_s2, %s5716_s7 }
  0x30   : > { %1212 = vmatpush1.bf16.msra.mxu0 %v6817_v10 }
  0xb5   : > { %v947_v38 = vpop.xlane.xlu1 %946 }
  0xb6   : > { %v960_v39 = vmul.f32 0.03125, %v947_v38  ;;  %v6826_v38 = vld [vmem:[%s8981_s8 + $0x14] ss:$24 sps:$4 sm:$0xff]  }
  0xb8   : > { %v7388_v42 = vsub.f32 %v935_v11, %v960_v39  ;;  %v6820_v11 = vld [vmem:[%s8981_s8] ss:$24 sps:$4 sm:$0xff]  }
  0xb9   : > { %1149 = vmatpush1.bf16.msra.mxu1 %v6820_v11 }
  0xba   : > { %v972_v51 = vmul.f32 %v7388_v42, %v7388_v42 }
  0xbc   : > { %v982_v58 = vsel %vm920_vm2, %v972_v51, 0.0 }
  0xeb   : > { %v6286_v14 = vpop.f32.mrf.mxu0 }
  0xec   : > { %v905_v16 = vadd.f32 %v6286_v14, %v5717_v13 }
  0xed   : > { %v896_v17 = vpop.f32.mrf.mxu0 }
  0xee   : > { %v918_v18 = vadd.f32 %v911_v15, %v905_v16  ;;  %v897_v19 = vadd.f32 %v5717_v13, %v896_v17 }
  0xef   : > { %v6287_v20 = vpop.f32.mrf.mxu0 }
  0xf0   : > { %924 = vst.msk [vmem:[#allocation2 + $0x18] sm:$0xff] %vm920_vm2, %v918_v18  ;;  %v914_v22 = vadd.f32 %v911_v15, %v897_v19  ;;  %v908_v23 = vadd.f32 %v6287_v20, %v5717_v13 }
  0xf1   : > { %v899_v24 = vpop.f32.mrf.mxu0 }
  0xf2   : > { %921 = vst.msk [vmem:[#allocation2] sm:$0xff] %vm920_vm2, %v914_v22  ;;  %v919_v25 = vadd.f32 %v912_v21, %v908_v23  ;;  %v900_v26 = vadd.f32 %v5717_v13, %v899_v24  ;;  %v6823_v13 = vld [vmem:[%s8981_s8 + $0x44] ss:$24 sps:$4 sm:$0xff]  }
  0xf3   : > { %1272 = vmatprep.subr.bf16.mxu1 %v6823_v13 }
  0xf4   : > { %925 = vst.msk [vmem:[#allocation2 + $0x20] sm:$0xff] %vm920_vm2, %v919_v25  ;;  %v915_v27 = vadd.f32 %v912_v21, %v900_v26 }
  0xf6   : > { %922 = vst.msk [vmem:[#allocation2 + $0x8] sm:$0xff] %vm920_vm2, %v915_v27 }
  0xf7   : > { %v936_v28 = vld [vmem:[#allocation2 + $0x18] sm:$0xff] }
  0xf8   : > { %v948_v30 = vsel %vm920_vm2, %v936_v28, 0.0 }
  0xf9   : > { %949 = vadd.xlane.f32.xlu1 %v948_v30  ;;  %v933_v31 = vld [vmem:[#allocation2] sm:$0xff] }
  0xfa   : > { %v939_v32 = vsel %vm920_vm2, %v933_v31, 0.0 }
  0xfb   : > { %940 = vadd.xlane.f32.xlu0 %v939_v32  ;;  %v937_v36 = vld [vmem:[#allocation2 + $0x20] sm:$0xff] }
  0xfc   : > { %v951_v37 = vsel %vm920_vm2, %v937_v36, 0.0 }
  0xfd   : > { %v934_v34 = vld [vmem:[#allocation2 + $0x8] sm:$0xff]  ;;  %955 = vadd.xlane.f32.xlu1 %v954_v33 }
  0xfe   : > { %v942_v35 = vsel %vm920_vm2, %v934_v34, 0.0 }
  0xff   : > { %943 = vadd.xlane.f32.xlu0 %v942_v35 }
 0x103   : > { %952 = vadd.xlane.f32.xlu0 %v951_v37 }
 0x182   : > { %v950_v40 = vpop.xlane.xlu1 %949 }
 0x183   : > { %v961_v45 = vmul.f32 0.03125, %v950_v40 }
 0x184   : > { %v941_v41 = vpop.xlane.xlu0 %940 }
 0x185   : > { %v958_v43 = vmul.f32 0.03125, %v941_v41  ;;  %v7396_v52 = vsub.f32 %v936_v28, %v961_v45  ;;  %v6824_v41 = vld [vmem:[%s8981_s8 + $0x10] ss:$24 sps:$4 sm:$0xff]  }
 0x186   : > { %v956_v44 = vpop.xlane.xlu1 %955 }
 0x187   : > { %v7390_v46 = vsub.f32 %v933_v31, %v958_v43  ;;  %v963_v50 = vmul.f32 0.03125, %v956_v44  ;;  %v973_v62 = vmul.f32 %v7396_v52, %v7396_v52 }
 0x188   : > { %v944_v47 = vpop.xlane.xlu0 %943 }
 0x189   : > { %v959_v48 = vmul.f32 0.03125, %v944_v47  ;;  %v970_v49 = vmul.f32 %v7390_v46, %v7390_v46  ;;  %v7401_v57 = vsub.f32 %v938_v29, %v963_v50  ;;  %v985_v1 = vsel %vm920_vm2, %v973_v62, 0.0 }
 0x18b   : > { %v7398_v53 = vsub.f32 %v934_v34, %v959_v48  ;;  %v976_v54 = vsel %vm920_vm2, %v970_v49, 0.0  ;;  %v975_v0 = vmul.f32 %v7401_v57, %v7401_v57 }
 0x18c   : > { %977 = vadd.xlane.f32.xlu0 %v976_v54  ;;  %v953_v55 = vpop.xlane.xlu0 %952 }
 0x18d   : > { %v962_v56 = vmul.f32 0.03125, %v953_v55  ;;  %v971_v59 = vmul.f32 %v7398_v53, %v7398_v53  ;;  %v991_v3 = vsel %vm920_vm2, %v975_v0, 0.0 }
 0x18f   : > { %v7406_v60 = vsub.f32 %v937_v36, %v962_v56  ;;  %v979_v61 = vsel %vm920_vm2, %v971_v59, 0.0  ;;  %v6821_v36 = vld [vmem:[%s8981_s8 + $0x40] ss:$24 sps:$4 sm:$0xff]   ;;  %v1035_v59 = vlaneseq }
 0x190   : > { %983 = vadd.xlane.f32.xlu0 %v982_v58  ;;  %980 = vadd.xlane.f32.xlu1 %v979_v61 }
 0x191   : > { %v974_v63 = vmul.f32 %v7406_v60, %v7406_v60  ;;  %v7498_v0 = vshrl.u32 %v1035_v59, 7 }
 0x193   : > { %v988_v2 = vsel %vm920_vm2, %v974_v63, 0.0  ;;  %v7505_v5 = vsub.s32 2, %v7498_v0  ;;  %v7515_v9 = vsub.s32 1, %v7498_v0 }
 0x194   : > { %986 = vadd.xlane.f32.xlu1 %v985_v1  ;;  %989 = vadd.xlane.f32.xlu0 %v988_v2 }
 0x195   : > { %v1046_v13 = vrot.slane %v7510_v6, %v7505_v5 }
 0x198   : > { %992 = vadd.xlane.f32.xlu1 %v991_v3 }
 0x215   : > { %v978_v14 = vpop.xlane.xlu0 %977 }
 0x216   : > { %v994_v15 = vmul.f32 0.03125, %v978_v14 }
 0x218   : > { %v1000_v16 = vadd.f32 1e-05, %v994_v15 }
 0x219   : > { %v981_v17 = vpop.xlane.xlu1 %980  ;;  %v984_v18 = vpop.xlane.xlu0 %983 }
 0x21a   : > { %v995_v19 = vmul.f32 0.03125, %v981_v17  ;;  %6969 = vrsqrt.f32 %v1000_v16  ;;  %v996_v21 = vmul.f32 0.03125, %v984_v18  ;;  %v1042_v16 = vrot.slane %v7510_v6, %v7515_v9 }
 0x21c   : > { %v1001_v20 = vadd.f32 1e-05, %v995_v19  ;;  %v1002_v24 = vadd.f32 1e-05, %v996_v21 }
 0x21d   : > { %v987_v22 = vpop.xlane.xlu1 %986  ;;  %v990_v26 = vpop.xlane.xlu0 %989 }
 0x21e   : > { %6971 = vrsqrt.f32 %v1001_v20  ;;  %v997_v23 = vmul.f32 0.03125, %v987_v22  ;;  %v998_v29 = vmul.f32 0.03125, %v990_v26 }
 0x220   : > { %v1003_v25 = vadd.f32 1e-05, %v997_v23  ;;  %v1004_v31 = vadd.f32 1e-05, %v998_v29 }
 0x221   : > { %v993_v27 = vpop.xlane.xlu1 %992 }
 0x222   : > { %6973 = vrsqrt.f32 %v1003_v25  ;;  %v999_v28 = vmul.f32 0.03125, %v993_v27 }
 0x223   : > { %6975 = vrsqrt.f32 %v1002_v24 }
 0x224   : > { %v1005_v30 = vadd.f32 1e-05, %v999_v28 }
 0x226   : > { %6977 = vrsqrt.f32 %v1005_v30 }
 0x227   : > { %v6970_v32 = vpop.eup %6969  ;;  %6979 = vrsqrt.f32 %v1004_v31 }
 0x228   : > { %v1012_v34 = vmul.f32 %v6970_v32, %v7390_v46 }
 0x22b   : > { %v6972_v33 = vpop.eup %6971 }
 0x22c   : > { %v1013_v35 = vmul.f32 %v6972_v33, %v7398_v53 }
 0x22e   : > { %v1030_v37 = vpack.c.bf16 %v1013_v35, %v1012_v34 }
 0x22f   : > { %v6974_v39 = vpop.eup %6973 }
 0x230   : > { %5735 = vmatmul.mubr.msk.bf16.vlgmr.msra.gmra.mxu1 %vm920_vm2, %v1030_v37  ;;  %5738 = vmatmul.mubr.msk.bf16.vlgmr.msra.gmra.mxu0 %vm920_vm2, %v1030_v37  ;;  %v6976_v40 = vpop.eup %6975  ;;  %v1015_v43 = vmul.f32 %v6974_v39, %v7396_v52 }
 0x231   : > { %1273 = vmatpush1.bf16.msra.mxu1 %v6821_v36  ;;  %1176 = vmatprep.mubr.bf16.mxu1 %v7195_v12  ;;  %v1014_v44 = vmul.f32 %v6976_v40, %v7388_v42  ;;  %v7196_v42 = vmov 0.0  }
 0x232   : > { %1239 = vmatprep.mubr.bf16.mxu0 %v7195_v12  ;;  %1274 = vmatprep.subr.bf16.mxu1 %v6826_v38 }
 0x233   : > { %v1031_v45 = vpack.c.bf16 %v1015_v43, %v1014_v44  ;;  %v6978_v46 = vpop.eup %6977  ;;  %6288 = vmatprep.subr.bf16.mxu0 %v7196_v42 }
 0x234   : > { %v6980_v47 = vpop.eup %6979  ;;  %v1017_v48 = vmul.f32 %v6978_v46, %v7401_v57 }
 0x235   : > { %1275 = vmatpush1.bf16.msra.mxu1 %v6824_v41  ;;  %v1016_v49 = vmul.f32 %v6980_v47, %v7406_v60  ;;  %v7539_v41 = vsub.s32 0, %v7498_v0 }
 0x236   : > { %6306 = vmatprep.subr.bf16.mxu1 %v7196_v42 }
 0x237   : > { %v1032_v50 = vpack.c.bf16 %v1017_v48, %v1016_v49  ;;  %v1038_v48 = vrot.slane %v7510_v6, %v7539_v41 }
 0x238   : > { %5736 = vmatmul.mubr.msk.bf16.gmra.mxu1 %vm920_vm2, %v1031_v45  ;;  %5739 = vmatmul.mubr.msk.bf16.gmra.mxu0 %vm920_vm2, %v1031_v45 }
 0x239   : > { %1186 = vmatprep.mubr.bf16.mxu1 %v7195_v12  ;;  %1249 = vmatprep.mubr.bf16.mxu0 %v7195_v12 }
 0x240   : > { %5737 = vmatmul.mubr.msk.bf16.gmra.mxu1 %vm920_vm2, %v1032_v50  ;;  %5740 = vmatmul.mubr.msk.bf16.gmra.mxu0 %vm920_vm2, %v1032_v50 }
 0x241   : > { %1292 = vmatprep.mubr.bf16.mxu1 %v7195_v12  ;;  %6294 = vmatprep.mubr.msk.bf16.mxu0 %vm7197_vm3, %v7196_v42 }
 0x248   : > { %5741 = vmatmul.mubr.msk.bf16.vlgmr.msra.gmra.mxu1 %vm920_vm2, %v1030_v37 }
 0x249   : > { %1302 = vmatprep.mubr.bf16.mxu1 %v7195_v12 }
 0x250   : > { %5742 = vmatmul.mubr.msk.bf16.gmra.mxu1 %vm920_vm2, %v1031_v45  ;;  %v7545_v45 = vsub.s32 4, %v7498_v0 }
 0x251   : > { %1312 = vmatprep.mubr.bf16.mxu1 %v7195_v12 }
 0x258   : > { %5743 = vmatmul.mubr.msk.bf16.gmra.mxu1 %vm920_vm2, %v1032_v50  ;;  %v1054_v50 = vrot.slane %v7510_v6, %v7545_v45 }
 0x259   : > { %6312 = vmatprep.mubr.msk.bf16.mxu1 %vm7197_vm3, %v7196_v42 }
 0x2f0   : > { %v7484_v51 = vpop.f32.mrf.mxu1  ;;  %v1231_v52 = vpop.f32.mrf.mxu0 }
 0x2f1   : > { %v1232_v31 = vadd.f32 %v1231_v52, %v1046_v13 }
 0x2f2   : > { %v7486_v53 = vpop.f32.mrf.mxu1  ;;  %v7488_v54 = vpop.f32.mrf.mxu0 }
 0x2f3   : > { %v1171_v44 = vadd.f32 %v7486_v53, %v1042_v16 }
 0x2f4   : > { %v7490_v55 = vpop.f32.mrf.mxu1  ;;  %v1235_v56 = vpop.f32.mrf.mxu0 }
 0x2f5   : > { %v1236_v28 = vadd.f32 %v1235_v56, %v1046_v13  ;;  %v1173_v52 = vadd.f32 %v7490_v55, %v1038_v48 }
 0x2f6   : > { %v1174_v57 = vpop.f32.mrf.mxu1  ;;  %v7492_v58 = vpop.f32.mrf.mxu0 }
 0x2f7   : > { %v1325_v34 = vpack.c.bf16 %v1236_v28, %v1232_v31  ;;  %v1175_v40 = vadd.f32 %v1174_v57, %v1042_v16  ;;  %v1169_v57 = vadd.f32 %v7484_v51, %v1038_v48  ;;  %v928_v31 = vld [vmem:[%s8983_s11 + $0x8] sm:$0xff] }
 0x2f8   : > { %v7494_v60 = vpop.f32.mrf.mxu1  ;;  %v1241_v61 = vpop.f32.mrf.mxu0 }
 0x2f9   : > { %v1242_v25 = vadd.f32 %v1241_v61, %v1046_v13  ;;  %v1324_v47 = vpack.c.bf16 %v1175_v40, %v1171_v44  ;;  %v1323_v61 = vpack.c.bf16 %v1173_v52, %v1169_v57  ;;  %v1179_v55 = vadd.f32 %v7494_v60, %v1038_v48 }
 0x2fa   : > { %v1180_v62 = vpop.f32.mrf.mxu1  ;;  %v7496_v63 = vpop.f32.mrf.mxu0 }
 0x2fb   : > { %v1181_v35 = vadd.f32 %v1180_v62, %v1042_v16 }
 0x2fc   : > { %v7500_v1 = vpop.f32.mrf.mxu1  ;;  %v1245_v2 = vpop.f32.mrf.mxu0 }
 0x2fd   : > { %v1246_v20 = vadd.f32 %v1245_v2, %v1046_v13  ;;  %v1183_v2 = vadd.f32 %v7500_v1, %v1038_v48  ;;  %v7566_v1 = vsub.s32 3, %v7498_v0 }
 0x2fe   : > { %v1184_v3 = vpop.f32.mrf.mxu1  ;;  %v7502_v4 = vpop.f32.mrf.mxu0 }
 0x2ff   : > { %v1331_v29 = vpack.c.bf16 %v1246_v20, %v1242_v25  ;;  %v1185_v32 = vadd.f32 %v1184_v3, %v1042_v16 }
 0x300   : > { %v7512_v7 = vpop.f32.mrf.mxu1  ;;  %v1251_v8 = vpop.f32.mrf.mxu0 }
 0x301   : > { %v1252_v17 = vadd.f32 %v1251_v8, %v1046_v13  ;;  %v1330_v37 = vpack.c.bf16 %v1185_v32, %v1181_v35 }
 0x302   : > { %v1190_v10 = vpop.f32.mrf.mxu1  ;;  %v7517_v11 = vpop.f32.mrf.mxu0 }
 0x303   : > { %v1191_v21 = vadd.f32 %v1190_v10, %v1042_v16  ;;  %v1329_v10 = vpack.c.bf16 %v1183_v2, %v1179_v55 }
 0x304   : > { %v7521_v14 = vpop.f32.mrf.mxu1  ;;  %v1255_v15 = vpop.f32.mrf.mxu0 }
 0x305   : > { %v1256_v18 = vadd.f32 %v1255_v15, %v1046_v13  ;;  %v1193_v51 = vadd.f32 %v7521_v14, %v1038_v48 }
 0x306   : > { %v1194_v19 = vpop.f32.mrf.mxu1 }
 0x307   : > { %v1337_v22 = vpack.c.bf16 %v1256_v18, %v1252_v17  ;;  %v1195_v23 = vadd.f32 %v1194_v19, %v1042_v16  ;;  %v1189_v16 = vadd.f32 %v7512_v7, %v1038_v48  ;;  %v1050_v19 = vrot.slane %v7510_v6, %v7566_v1  ;;  %v930_v48 = vld [vmem:[%s8983_s11 + $0x18] sm:$0xff] }
 0x308   : > { %v7525_v24 = vpop.f32.mrf.mxu1 }
 0x309   : > { %v1336_v26 = vpack.c.bf16 %v1195_v23, %v1191_v21  ;;  %6307 = vmatpush3.bf16.msra.mxu1 %v1337_v22  ;;  %v1295_v60 = vadd.f32 %v7525_v24, %v1054_v50  ;;  %v1335_v17 = vpack.c.bf16 %v1193_v51, %v1189_v16  ;;  %v1238_v14 = vadd.f32 %v7492_v58, %v1050_v19  ;;  %v1257_v24 = vpop.f32.mrf.mxu0 }
 0x30a   : > { %v7527_v27 = vpop.f32.mrf.mxu1  ;;  %6308 = vmatprep.subr.bf16.mxu1 %v7196_v42  ;;  %v1234_v20 = vadd.f32 %v7488_v54, %v1050_v19  ;;  %v1248_v7 = vadd.f32 %v7502_v4, %v1050_v19  ;;  %v1244_v22 = vadd.f32 %v7496_v63, %v1050_v19  ;;  %v1258_v58 = vadd.f32 %v1257_v24, %v1050_v19  ;;  %v927_v4 = vld [vmem:[%s8983_s11] sm:$0xff] }
 0x30b   : > { %6289 = vmatpush3.bf16.xpose.msra.mxu0 %v1336_v26  ;;  %v1254_v25 = vadd.f32 %v7517_v11, %v1050_v19 }
 0x30c   : > { %v1298_v30 = vpop.f32.mrf.mxu1  ;;  %6290 = vmatprep.subr.bf16.mxu0 %v7196_v42  ;;  %v1326_v21 = vpack.c.bf16 %v1238_v14, %v1234_v20  ;;  %v1332_v23 = vpack.c.bf16 %v1248_v7, %v1244_v22 }
 0x30d   : > { %6309 = vmatpush3.bf16.msra.mxu1 %v1331_v29  ;;  %v1299_v15 = vadd.f32 %v1298_v30, %v1054_v50  ;;  %v1338_v26 = vpack.c.bf16 %v1258_v58, %v1254_v25 }
 0x30e   : > { %v7531_v33 = vpop.f32.mrf.mxu1  ;;  %6310 = vmatprep.subr.bf16.mxu1 %v7196_v42 }
 0x30f   : > { %v1327_v18 = vpack.c.bf16 %v1299_v15, %v1295_v60 }
 0x310   : > { %v1304_v36 = vpop.f32.mrf.mxu1 }
 0x311   : > { %6311 = vmatpush3.bf16.msra.mxu1 %v1325_v34  ;;  %v1305_v8 = vadd.f32 %v1304_v36, %v1054_v50 }
 0x312   : > { %v7534_v38 = vpop.f32.mrf.mxu1  ;;  %6342 = vmatprep.subr.bf16.mxu1 %v7196_v42 }
 0x313   : > { %6291 = vmatpush3.bf16.xpose.msra.mxu0 %v1330_v37  ;;  %v929_v37 = vld [vmem:[%s8983_s11 + $0x10] sm:$0xff] }
 0x314   : > { %v1308_v39 = vpop.f32.mrf.mxu1  ;;  %6292 = vmatprep.subr.bf16.mxu0 %v7196_v42 }
 0x315   : > { %v1309_v3 = vadd.f32 %v1308_v39, %v1054_v50 }
 0x316   : > { %v7541_v43 = vpop.f32.mrf.mxu1 }
 0x317   : > { %v1333_v13 = vpack.c.bf16 %v1309_v3, %v1305_v8  ;;  %v932_v8 = vld [vmem:[%s8983_s11 + $0x28] sm:$0xff] }
 0x318   : > { %v1314_v46 = vpop.f32.mrf.mxu1 }
 0x319   : > { %v1315_v59 = vadd.f32 %v1314_v46, %v1054_v50 }
 0x31a   : > { %v7549_v49 = vpop.f32.mrf.mxu1 }
 0x31b   : > { %6293 = vmatpush3.bf16.xpose.msra.mxu0 %v1324_v47 }
 0x31c   : > { %v1318_v56 = vpop.f32.mrf.mxu1  ;;  %6324 = vmatprep.subr.bf16.mxu0 %v7196_v42 }
 0x31d   : > { %v1319_v53 = vadd.f32 %v1318_v56, %v1054_v50 }
 0x31f   : > { %v1339_v62 = vpack.c.bf16 %v1319_v53, %v1315_v59  ;;  %v931_v59 = vld [vmem:[%s8983_s11 + $0x20] sm:$0xff] }
 0x322   : > { %6295 = vmatmul.mubr.bf16.vlgmr.msra.gmra.mxu0 %v1323_v61 }
 0x323   : > { %6325 = vmatpush3.bf16.xpose.msra.mxu0 %v1339_v62  ;;  %6298 = vmatprep.mubr.msk.bf16.mxu0 %vm7197_vm3, %v7196_v42 }
 0x324   : > { %6326 = vmatprep.subr.bf16.mxu0 %v7196_v42 }
 0x32a   : > { %6299 = vmatmul.mubr.bf16.gmra.mxu0 %v1329_v10 }
 0x32b   : > { %6327 = vmatpush3.bf16.xpose.msra.mxu0 %v1333_v13  ;;  %6302 = vmatprep.mubr.msk.bf16.mxu0 %vm7197_vm3, %v7196_v42 }
 0x32c   : > { %6328 = vmatprep.subr.bf16.mxu0 %v7196_v42 }
 0x332   : > { %6303 = vmatmul.mubr.bf16.gmra.mxu0 %v1335_v17 }
 0x333   : > { %6329 = vmatpush3.bf16.xpose.msra.mxu0 %v1327_v18  ;;  %6330 = vmatprep.mubr.msk.bf16.mxu0 %vm7197_vm3, %v7196_v42 }
 0x334   : > { %6360 = vmatprep.subr.bf16.mxu0 %v7196_v42 }
 0x33a   : > { %6331 = vmatmul.mubr.bf16.vlgmr.msra.gmra.mxu0 %v1326_v21 }
 0x33b   : > { %6334 = vmatprep.mubr.msk.bf16.mxu0 %vm7197_vm3, %v7196_v42 }
 0x342   : > { %6335 = vmatmul.mubr.bf16.gmra.mxu0 %v1332_v23 }
 0x343   : > { %6338 = vmatprep.mubr.msk.bf16.mxu0 %vm7197_vm3, %v7196_v42 }
 0x34a   : > { %6339 = vmatmul.mubr.bf16.gmra.mxu0 %v1338_v26 }
 0x34b   : > { %6376 = vmatprep.mubr.msk.bf16.mxu0 %vm7197_vm3, %v7196_v42 }
 0x3e2   : > { %v1375_v54 = vpop.f32.mrf.mxu0 }
 0x3e3   : > { %v1398_v63 = vmul.f32 0.25, %v1375_v54 }
 0x3e4   : > { %v6296_v28 = vpop.f32.mrf.mxu0 }
 0x3e5   : > { %v7589_v29 = vadd.f32 %v1398_v63, %v927_v4 }
 0x3e6   : > { %v1378_v30 = vpop.f32.mrf.mxu0 }
 0x3e7   : > { %v1399_v11 = vmul.f32 0.25, %v1378_v30  ;;  %v1410_v32 = vsel %vm855_vm0, %v7589_v29, -inf }
 0x3e8   : > { %1411 = vmax.xlane.f32.xlu0 %v1410_v32  ;;  %v6297_v34 = vpop.f32.mrf.mxu0 }
 0x3e9   : > { %v7596_v35 = vadd.f32 %v1399_v11, %v928_v31 }
 0x3ea   : > { %v1383_v36 = vpop.f32.mrf.mxu0 }
 0x3eb   : > { %v1400_v39 = vmul.f32 0.25, %v1383_v36  ;;  %v1413_v40 = vsel %vm855_vm0, %v7596_v35, -inf }
 0x3ec   : > { %1414 = vmax.xlane.f32.xlu1 %v1413_v40  ;;  %v6300_v44 = vpop.f32.mrf.mxu0 }
 0x3ed   : > { %v7603_v46 = vadd.f32 %v1400_v39, %v929_v37 }
 0x3ee   : > { %v1386_v47 = vpop.f32.mrf.mxu0 }
 0x3ef   : > { %v1401_v50 = vmul.f32 0.25, %v1386_v47  ;;  %v1416_v52 = vsel %vm855_vm0, %v7603_v46, -inf }
 0x3f0   : > { %1417 = vmax.xlane.f32.xlu0 %v1416_v52  ;;  %v6301_v56 = vpop.f32.mrf.mxu0 }
 0x3f1   : > { %v7610_v53 = vadd.f32 %v1401_v50, %v930_v48 }
 0x3f2   : > { %v1391_v57 = vpop.f32.mrf.mxu0 }
 0x3f3   : > { %v1402_v61 = vmul.f32 0.25, %v1391_v57  ;;  %v1419_v62 = vsel %vm855_vm0, %v7610_v53, -inf }
 0x3f4   : > { %1420 = vmax.xlane.f32.xlu1 %v1419_v62  ;;  %v6304_v2 = vpop.f32.mrf.mxu0 }
 0x3f5   : > { %v7617_v3 = vadd.f32 %v1402_v61, %v931_v59 }
 0x3f6   : > { %v1394_v55 = vpop.f32.mrf.mxu0 }
 0x3f7   : > { %v1403_v10 = vmul.f32 0.25, %v1394_v55  ;;  %v1422_v13 = vsel %vm855_vm0, %v7617_v3, -inf }
 0x3f8   : > { %1423 = vmax.xlane.f32.xlu0 %v1422_v13  ;;  %v6305_v51 = vpop.f32.mrf.mxu0 }
 0x3f9   : > { %v7624_v15 = vadd.f32 %v1403_v10, %v932_v8 }
 0x3fa   : > { %v1598_v16 = vpop.f32.mrf.mxu0 }
 0x3fb   : > { %v1621_v60 = vmul.f32 0.25, %v1598_v16  ;;  %v1425_v17 = vsel %vm855_vm0, %v7624_v15, -inf }
 0x3fc   : > { %1426 = vmax.xlane.f32.xlu1 %v1425_v17  ;;  %v6332_v18 = vpop.f32.mrf.mxu0 }
 0x3fd   : > { %v7628_v19 = vadd.f32 %v1621_v60, %v927_v4 }
 0x3fe   : > { %v1601_v14 = vpop.f32.mrf.mxu0 }
 0x3ff   : > { %v1622_v20 = vmul.f32 0.25, %v1601_v14  ;;  %v1633_v21 = vsel %vm855_vm0, %v7628_v19, -inf }
 0x400   : > { %1634 = vmax.xlane.f32.xlu0 %v1633_v21  ;;  %v6333_v7 = vpop.f32.mrf.mxu0 }
 0x401   : > { %v7632_v22 = vadd.f32 %v1622_v20, %v928_v31 }
 0x402   : > { %v1606_v23 = vpop.f32.mrf.mxu0 }
 0x403   : > { %v1623_v24 = vmul.f32 0.25, %v1606_v23  ;;  %v1636_v58 = vsel %vm855_vm0, %v7632_v22, -inf }
 0x404   : > { %1637 = vmax.xlane.f32.xlu1 %v1636_v58  ;;  %v6336_v25 = vpop.f32.mrf.mxu0 }
 0x405   : > { %v7636_v26 = vadd.f32 %v1623_v24, %v929_v37 }
 0x406   : > { %v1609_v54 = vpop.f32.mrf.mxu0 }
 0x407   : > { %v1624_v4 = vmul.f32 0.25, %v1609_v54  ;;  %v1639_v63 = vsel %vm855_vm0, %v7636_v26, -inf }
 0x408   : > { %1640 = vmax.xlane.f32.xlu0 %v1639_v63  ;;  %v6337_v28 = vpop.f32.mrf.mxu0 }
 0x409   : > { %v7640_v30 = vadd.f32 %v1624_v4, %v930_v48 }
 0x40a   : > { %v1614_v31 = vpop.f32.mrf.mxu0 }
 0x40b   : > { %v1625_v11 = vmul.f32 0.25, %v1614_v31  ;;  %v1642_v32 = vsel %vm855_vm0, %v7640_v30, -inf }
 0x40c   : > { %1643 = vmax.xlane.f32.xlu1 %v1642_v32  ;;  %v6340_v34 = vpop.f32.mrf.mxu0 }
 0x40d   : > { %v7644_v36 = vadd.f32 %v1625_v11, %v931_v59 }
 0x40e   : > { %v1617_v37 = vpop.f32.mrf.mxu0 }
 0x40f   : > { %v1626_v39 = vmul.f32 0.25, %v1617_v37  ;;  %v1645_v40 = vsel %vm855_vm0, %v7644_v36, -inf }
 0x410   : > { %1646 = vmax.xlane.f32.xlu0 %v1645_v40  ;;  %v6341_v44 = vpop.f32.mrf.mxu0 }
 0x411   : > { %v7648_v47 = vadd.f32 %v1626_v39, %v932_v8 }
 0x413   : > { %v1648_v48 = vsel %vm855_vm0, %v7648_v47, -inf }
 0x414   : > { %1649 = vmax.xlane.f32.xlu1 %v1648_v48 }
 0x471   : > { %v1412_v50 = vpop.xlane.xlu0 %1411 }
 0x472   : > { %v1428_v52 = vsub.f32 %v7589_v29, %v1412_v50 }
 0x474   : > { %v1434_v56 = vmul.f32 1.442695, %v1428_v52 }
 0x475   : > { %v1415_v57 = vpop.xlane.xlu1 %1414 }
 0x476   : > { %6981 = vpow2.f32 %v1434_v56  ;;  %v1429_v59 = vsub.f32 %v7596_v35, %v1415_v57 }
 0x478   : > { %v1436_v61 = vmul.f32 1.442695, %v1429_v59 }
 0x479   : > { %v1418_v62 = vpop.xlane.xlu0 %1417 }
 0x47a   : > { %6983 = vpow2.f32 %v1436_v61  ;;  %v1430_v2 = vsub.f32 %v7603_v46, %v1418_v62 }
 0x47c   : > { %v1438_v55 = vmul.f32 1.442695, %v1430_v2 }
 0x47d   : > { %v1421_v8 = vpop.xlane.xlu1 %1420 }
 0x47e   : > { %6985 = vpow2.f32 %v1438_v55  ;;  %v1431_v10 = vsub.f32 %v7610_v53, %v1421_v8 }
 0x480   : > { %v1440_v13 = vmul.f32 1.442695, %v1431_v10 }
 0x481   : > { %v1424_v51 = vpop.xlane.xlu0 %1423 }
 0x482   : > { %6987 = vpow2.f32 %v1440_v13  ;;  %v1432_v29 = vsub.f32 %v7617_v3, %v1424_v51 }
 0x483   : > { %v7657_v16 = vpop.eup %6981 }
 0x484   : > { %v1442_v60 = vmul.f32 1.442695, %v1432_v29  ;;  %v1446_v35 = vsel %vm855_vm0, %v7657_v16, 0.0  ;;  %v7713_v29 = vsub.s32 5, %v7498_v0 }
 0x485   : > { %v1427_v17 = vpop.xlane.xlu1 %1426  ;;  %1447 = vadd.xlane.f32.xlu0 %v1446_v35  ;;  %v1320_v35 = vpop.f32.mrf.mxu1 }
 0x486   : > { %6989 = vpow2.f32 %v1442_v60  ;;  %v1433_v46 = vsub.f32 %v7624_v15, %v1427_v17 }
 0x487   : > { %v7662_v18 = vpop.eup %6983 }
 0x488   : > { %v1444_v14 = vmul.f32 1.442695, %v1433_v46  ;;  %v1449_v53 = vsel %vm855_vm0, %v7662_v18, 0.0  ;;  %v1058_v46 = vrot.slane %v7510_v6, %v7713_v29 }
 0x489   : > { %v1635_v20 = vpop.xlane.xlu0 %1634  ;;  %1450 = vadd.xlane.f32.xlu1 %v1449_v53 }
 0x48a   : > { %6991 = vpow2.f32 %v1444_v14  ;;  %v1651_v3 = vsub.f32 %v7628_v19, %v1635_v20  ;;  %v1321_v20 = vadd.f32 %v1320_v35, %v1058_v46  ;;  %v1307_v6 = vadd.f32 %v7534_v38, %v1058_v46  ;;  %v6832_v35 = vld [vmem:[%s8984_s28 + $0x10] sm:$0xff]  }
 0x48b   : > { %v7667_v21 = vpop.eup %6985 }
 0x48c   : > { %v1657_v7 = vmul.f32 1.442695, %v1651_v3  ;;  %v1452_v23 = vsel %vm855_vm0, %v7667_v21, 0.0 }
 0x48d   : > { %v1638_v24 = vpop.xlane.xlu1 %1637  ;;  %1453 = vadd.xlane.f32.xlu0 %v1452_v23  ;;  %v1317_v23 = vadd.f32 %v7549_v49, %v1058_v46  ;;  %v1301_v49 = vadd.f32 %v7531_v33, %v1058_v46 }
 0x48e   : > { %6993 = vpow2.f32 %v1657_v7  ;;  %v1652_v15 = vsub.f32 %v7632_v22, %v1638_v24 }
 0x48f   : > { %v7672_v58 = vpop.eup %6987 }
 0x490   : > { %v1659_v25 = vmul.f32 1.442695, %v1652_v15  ;;  %v1455_v54 = vsel %vm855_vm0, %v7672_v58, 0.0  ;;  %v1311_v15 = vadd.f32 %v7541_v43, %v1058_v46 }
 0x491   : > { %v1641_v4 = vpop.xlane.xlu0 %1640  ;;  %1456 = vadd.xlane.f32.xlu1 %v1455_v54 }
 0x492   : > { %6995 = vpow2.f32 %v1659_v25  ;;  %v1653_v19 = vsub.f32 %v7636_v26, %v1641_v4  ;;  %v1340_v25 = vpack.c.bf16 %v1321_v20, %v1317_v23  ;;  %v6839_v20 = vld [vmem:[%s8984_s28 + $0x58] sm:$0xff]   ;;  %v6842_v23 = vld [vmem:[%s8984_s28 + $0x40] sm:$0xff]  }
 0x493   : > { %v7677_v63 = vpop.eup %6989 }
 0x494   : > { %v1661_v28 = vmul.f32 1.442695, %v1653_v19  ;;  %v1458_v31 = vsel %vm855_vm0, %v7677_v63, 0.0 }
 0x495   : > { %v1644_v11 = vpop.xlane.xlu1 %1643  ;;  %1459 = vadd.xlane.f32.xlu0 %v1458_v31 }
 0x496   : > { %6997 = vpow2.f32 %v1661_v28  ;;  %v1654_v22 = vsub.f32 %v7640_v30, %v1644_v11  ;;  %v1297_v28 = vadd.f32 %v7527_v27, %v1058_v46  ;;  %v6836_v46 = vld [vmem:[%s8984_s28] sm:$0xff]  }
 0x497   : > { %v7682_v32 = vpop.eup %6991 }
 0x498   : > { %v1663_v34 = vmul.f32 1.442695, %v1654_v22  ;;  %v1461_v37 = vsel %vm855_vm0, %v7682_v32, 0.0  ;;  %v1328_v11 = vpack.c.bf16 %v1301_v49, %v1297_v28 }
 0x499   : > { %v1647_v39 = vpop.xlane.xlu0 %1646  ;;  %1462 = vadd.xlane.f32.xlu1 %v1461_v37 }
 0x49a   : > { %6999 = vpow2.f32 %v1663_v34  ;;  %v1655_v26 = vsub.f32 %v7644_v36, %v1647_v39 }
 0x49b   : > { %v7687_v40 = vpop.eup %6993 }
 0x49c   : > { %v1665_v44 = vmul.f32 1.442695, %v1655_v26  ;;  %v1669_v48 = vsel %vm855_vm0, %v7687_v40, 0.0 }
 0x49d   : > { %1670 = vadd.xlane.f32.xlu0 %v1669_v48  ;;  %v1650_v50 = vpop.xlane.xlu1 %1649 }
 0x49e   : > { %7001 = vpow2.f32 %v1665_v44  ;;  %v1656_v30 = vsub.f32 %v7648_v47, %v1650_v50 }
 0x49f   : > { %v7692_v52 = vpop.eup %6995 }
 0x4a0   : > { %v1667_v56 = vmul.f32 1.442695, %v1656_v30  ;;  %v1672_v57 = vsel %vm855_vm0, %v7692_v52, 0.0 }
 0x4a1   : > { %1673 = vadd.xlane.f32.xlu1 %v1672_v57 }
 0x4a2   : > { %7003 = vpow2.f32 %v1667_v56 }
 0x4a3   : > { %v7696_v36 = vpop.eup %6997 }
 0x4a4   : > { %v1675_v59 = vsel %vm855_vm0, %v7696_v36, 0.0 }
 0x4a5   : > { %1676 = vadd.xlane.f32.xlu0 %v1675_v59 }
 0x4a7   : > { %v7700_v61 = vpop.eup %6999 }
 0x4a8   : > { %v1678_v62 = vsel %vm855_vm0, %v7700_v61, 0.0 }
 0x4a9   : > { %1679 = vadd.xlane.f32.xlu1 %v1678_v62  ;;  %v6829_v62 = vld [vmem:[%s8984_s28 + $0x28] sm:$0xff]  }
 0x4ab   : > { %v7704_v47 = vpop.eup %7001 }
 0x4ac   : > { %v1681_v2 = vsel %vm855_vm0, %v7704_v47, 0.0 }
 0x4ad   : > { %1682 = vadd.xlane.f32.xlu0 %v1681_v2 }
 0x4af   : > { %v7708_v55 = vpop.eup %7003 }
 0x4b0   : > { %v1684_v8 = vsel %vm855_vm0, %v7708_v55, 0.0 }
 0x4b1   : > { %1685 = vadd.xlane.f32.xlu1 %v1684_v8 }
 0x50e   : > { %v1448_v10 = vpop.xlane.xlu0 %1447 }
 0x50f   : > { %7005 = vrcp.f32 %v1448_v10 }
 0x512   : > { %v1451_v13 = vpop.xlane.xlu1 %1450 }
 0x513   : > { %7007 = vrcp.f32 %v1451_v13 }
 0x516   : > { %v1454_v51 = vpop.xlane.xlu0 %1453 }
 0x517   : > { %7009 = vrcp.f32 %v1454_v51  ;;  %v6831_v51 = vld [vmem:[%s8984_s28 + $0x18] sm:$0xff]  }
 0x51a   : > { %v1457_v60 = vpop.xlane.xlu1 %1456 }
 0x51b   : > { %7011 = vrcp.f32 %v1457_v60 }
 0x51c   : > { %v7006_v17 = vpop.eup %7005 }
 0x51d   : > { %v1470_v3 = vmul.f32 %v7006_v17, %v7657_v16  ;;  %v6835_v17 = vld [vmem:[%s8984_s28 + $0x70] sm:$0xff]  }
 0x51e   : > { %v1460_v14 = vpop.xlane.xlu0 %1459 }
 0x51f   : > { %7013 = vrcp.f32 %v1460_v14  ;;  %v6837_v14 = vld [vmem:[%s8984_s28 + $0x68] sm:$0xff]  }
 0x520   : > { %v7008_v53 = vpop.eup %7007 }
 0x521   : > { %v1471_v7 = vmul.f32 %v7008_v53, %v7662_v18  ;;  %v1334_v18 = vpack.c.bf16 %v1311_v15, %v1307_v6  ;;  %v6838_v53 = vld [vmem:[%s8984_s28 + $0x60] sm:$0xff]  }
 0x522   : > { %v1463_v24 = vpop.xlane.xlu1 %1462 }
 0x523   : > { %v1476_v0 = vpack.c.bf16 %v1471_v7, %v1470_v3  ;;  %7015 = vrcp.f32 %v1463_v24  ;;  %v6840_v3 = vld [vmem:[%s8984_s28 + $0x50] sm:$0xff]   ;;  %v6841_v7 = vld [vmem:[%s8984_s28 + $0x48] sm:$0xff]  }
 0x524   : > { %v7010_v54 = vpop.eup %7009 }
 0x525   : > { %6313 = vmatmul.mubr.msk.bf16.vlgmr.msra.gmra.mxu1 %vm855_vm0, %v1476_v0  ;;  %v1472_v43 = vmul.f32 %v7010_v54, %v7667_v21 }
 0x526   : > { %6343 = vmatpush3.bf16.msra.mxu1 %v1340_v25  ;;  %v1671_v4 = vpop.xlane.xlu0 %1670  ;;  %6316 = vmatprep.mubr.msk.bf16.mxu1 %vm7197_vm3, %v7196_v42 }
 0x527   : > { %6344 = vmatprep.subr.bf16.mxu1 %v7196_v42  ;;  %7017 = vrcp.f32 %v1671_v4 }
 0x528   : > { %v7012_v16 = vpop.eup %7011 }
 0x529   : > { %v1473_v19 = vmul.f32 %v7012_v16, %v7672_v58 }
 0x52a   : > { %6345 = vmatpush3.bf16.msra.mxu1 %v1334_v18  ;;  %v1674_v38 = vpop.xlane.xlu1 %1673 }
 0x52b   : > { %7019 = vrcp.f32 %v1674_v38  ;;  %6346 = vmatprep.subr.bf16.mxu1 %v7196_v42  ;;  %v1477_v31 = vpack.c.bf16 %v1473_v19, %v1472_v43 }
 0x52c   : > { %v7014_v22 = vpop.eup %7013 }
 0x52d   : > { %6317 = vmatmul.mubr.msk.bf16.gmra.mxu1 %vm855_vm0, %v1477_v31  ;;  %v1474_v27 = vmul.f32 %v7014_v22, %v7677_v63  ;;  %v6827_v63 = vld [vmem:[%s8984_s28 + $0x38] sm:$0xff]  }
 0x52e   : > { %6347 = vmatpush3.bf16.msra.mxu1 %v1328_v11  ;;  %v1677_v33 = vpop.xlane.xlu0 %1676  ;;  %6320 = vmatprep.mubr.msk.bf16.mxu1 %vm7197_vm3, %v7196_v42 }
 0x52f   : > { %6388 = vmatprep.subr.bf16.mxu1 %v7196_v42  ;;  %7021 = vrcp.f32 %v1677_v33 }
 0x530   : > { %v7016_v21 = vpop.eup %7015 }
 0x531   : > { %v1475_v58 = vmul.f32 %v7016_v21, %v7682_v32 }
 0x532   : > { %v1680_v34 = vpop.xlane.xlu1 %1679 }
 0x533   : > { %7023 = vrcp.f32 %v1680_v34  ;;  %v1478_v37 = vpack.c.bf16 %v1475_v58, %v1474_v27 }
 0x534   : > { %v7018_v39 = vpop.eup %7017 }
 0x535   : > { %6321 = vmatmul.mubr.msk.bf16.gmra.mxu1 %vm855_vm0, %v1478_v37  ;;  %v1693_v48 = vmul.f32 %v7018_v39, %v7687_v40  ;;  %v6828_v40 = vld [vmem:[%s8984_s28 + $0x30] sm:$0xff]  }
 0x536   : > { %v1683_v26 = vpop.xlane.xlu0 %1682  ;;  %6348 = vmatprep.mubr.msk.bf16.mxu1 %vm7197_vm3, %v7196_v42 }
 0x537   : > { %7025 = vrcp.f32 %v1683_v26 }
 0x538   : > { %v7020_v44 = vpop.eup %7019 }
 0x539   : > { %v1694_v50 = vmul.f32 %v7020_v44, %v7692_v52 }
 0x53a   : > { %v1686_v30 = vpop.xlane.xlu1 %1685 }
 0x53b   : > { %v1699_v32 = vpack.c.bf16 %v1694_v50, %v1693_v48  ;;  %7027 = vrcp.f32 %v1686_v30 }
 0x53c   : > { %v7022_v56 = vpop.eup %7021 }
 0x53d   : > { %6349 = vmatmul.mubr.msk.bf16.vlgmr.msra.gmra.mxu1 %vm855_vm0, %v1699_v32  ;;  %v1695_v57 = vmul.f32 %v7022_v56, %v7696_v36  ;;  %v6830_v36 = vld [vmem:[%s8984_s28 + $0x20] sm:$0xff]  }
 0x53e   : > { %6352 = vmatprep.mubr.msk.bf16.mxu1 %vm7197_vm3, %v7196_v42  ;;  %6389 = vmatpush3.bf16.msra.mxu1 %v6827_v63 }
 0x53f   : > { %6390 = vmatprep.subr.bf16.mxu1 %v7196_v42 }
 0x540   : > { %v7024_v52 = vpop.eup %7023 }
 0x541   : > { %v1696_v59 = vmul.f32 %v7024_v52, %v7700_v61 }
 0x542   : > { %6391 = vmatpush3.bf16.msra.mxu1 %v6828_v40 }
 0x543   : > { %v1700_v2 = vpack.c.bf16 %v1696_v59, %v1695_v57  ;;  %6392 = vmatprep.subr.bf16.mxu1 %v7196_v42 }
 0x544   : > { %v7026_v8 = vpop.eup %7025 }
 0x545   : > { %6353 = vmatmul.mubr.msk.bf16.gmra.mxu1 %vm855_vm0, %v1700_v2  ;;  %v1697_v10 = vmul.f32 %v7026_v8, %v7704_v47  ;;  %v6833_v47 = vld [vmem:[%s8984_s28 + $0x78] sm:$0xff]  }
 0x546   : > { %6356 = vmatprep.mubr.msk.bf16.mxu1 %vm7197_vm3, %v7196_v42  ;;  %6393 = vmatpush3.bf16.msra.mxu1 %v6829_v62 }
 0x547   : > { %6394 = vmatprep.subr.bf16.mxu1 %v7196_v42  ;;  %6361 = vmatpush3.bf16.msra.mxu0 %v6833_v47  ;;  %v7169_v47 = vld [vmem:[#allocation2] sm:$0xff] }
 0x548   : > { %v7028_v61 = vpop.eup %7027  ;;  %6362 = vmatprep.subr.bf16.mxu0 %v7196_v42 }
 0x549   : > { %v1698_v13 = vmul.f32 %v7028_v61, %v7708_v55  ;;  %v6834_v55 = vld [vmem:[%s8984_s28 + $0x8] sm:$0xff]  }
 0x54a   : > { %6395 = vmatpush3.bf16.msra.mxu1 %v6830_v36 }
 0x54b   : > { %v1701_v60 = vpack.c.bf16 %v1698_v13, %v1697_v10  ;;  %6396 = vmatprep.subr.bf16.mxu1 %v7196_v42  ;;  %6363 = vmatpush3.bf16.msra.mxu0 %v6835_v17 }
 0x54c   : > { %6364 = vmatprep.subr.bf16.mxu0 %v7196_v42 }
 0x54d   : > { %6357 = vmatmul.mubr.msk.bf16.gmra.mxu1 %vm855_vm0, %v1701_v60  ;;  %v5782_v60 = vld [vmem:[%s8985_s29] ss:$0 sm:$0xff] }
 0x54e   : > { %6397 = vmatpush3.bf16.msra.mxu1 %v6831_v51  ;;  %6404 = vmatprep.mubr.msk.bf16.mxu1 %vm7197_vm3, %v7196_v42 }
 0x54f   : > { %6398 = vmatprep.subr.bf16.mxu1 %v7196_v42  ;;  %6365 = vmatpush3.bf16.msra.mxu0 %v6837_v14 }
 0x550   : > { %6366 = vmatprep.subr.bf16.mxu0 %v7196_v42 }
 0x552   : > { %6399 = vmatpush3.bf16.msra.mxu1 %v6832_v35 }
 0x553   : > { %6400 = vmatprep.subr.bf16.mxu1 %v7196_v42  ;;  %6367 = vmatpush3.bf16.msra.mxu0 %v6838_v53 }
 0x554   : > { %6368 = vmatprep.subr.bf16.mxu0 %v7196_v42 }
 0x556   : > { %6401 = vmatpush3.bf16.msra.mxu1 %v6834_v55 }
 0x557   : > { %6402 = vmatprep.subr.bf16.mxu1 %v7196_v42  ;;  %6369 = vmatpush3.bf16.msra.mxu0 %v6839_v20  ;;  %v7170_v20 = vld [vmem:[#allocation2 + $0x8] sm:$0xff] }
 0x558   : > { %6370 = vmatprep.subr.bf16.mxu0 %v7196_v42 }
 0x55a   : > { %6403 = vmatpush3.bf16.msra.mxu1 %v6836_v46 }
 0x55b   : > { %6432 = vmatprep.subr.bf16.mxu1 %v7196_v42  ;;  %6371 = vmatpush3.bf16.msra.mxu0 %v6840_v3 }
 0x55c   : > { %6372 = vmatprep.subr.bf16.mxu0 %v7196_v42 }
 0x55f   : > { %6373 = vmatpush3.bf16.msra.mxu0 %v6841_v7 }
 0x560   : > { %6374 = vmatprep.subr.bf16.mxu0 %v7196_v42 }
 0x563   : > { %6375 = vmatpush3.bf16.msra.mxu0 %v6842_v23 }
 0x564   : > { %6416 = vmatprep.subr.bf16.mxu0 %v7196_v42 }
 0x5e5   : > { %v1522_v24 = vpop.f32.mrf.mxu1 }
 0x5e7   : > { %v6314_v0 = vpop.f32.mrf.mxu1 }
 0x5e9   : > { %v1525_v15 = vpop.f32.mrf.mxu1 }
 0x5ea   : > { %v1545_v25 = vpack.c.bf16 %v1525_v15, %v1522_v24  ;;  %v7171_v15 = vld [vmem:[#allocation2 + $0x10] sm:$0xff] }
 0x5eb   : > { %v6315_v54 = vpop.f32.mrf.mxu1 }
 0x5ec   : > { %6405 = vmatmul.mubr.bf16.vlgmr.msra.gmra.mxu1 %v1545_v25 }
 0x5ed   : > { %v1530_v6 = vpop.f32.mrf.mxu1  ;;  %6408 = vmatprep.mubr.msk.bf16.mxu1 %vm7197_vm3, %v7196_v42 }
 0x5ef   : > { %v6318_v4 = vpop.f32.mrf.mxu1 }
 0x5f1   : > { %v1533_v16 = vpop.f32.mrf.mxu1 }
 0x5f2   : > { %v1546_v49 = vpack.c.bf16 %v1533_v16, %v1530_v6 }
 0x5f3   : > { %v6319_v18 = vpop.f32.mrf.mxu1 }
 0x5f4   : > { %6409 = vmatmul.mubr.bf16.gmra.mxu1 %v1546_v49  ;;  %v7172_v18 = vld [vmem:[#allocation2 + $0x18] sm:$0xff] }
 0x5f5   : > { %v1538_v43 = vpop.f32.mrf.mxu1  ;;  %6412 = vmatprep.mubr.msk.bf16.mxu1 %vm7197_vm3, %v7196_v42 }
 0x5f7   : > { %v6322_v19 = vpop.f32.mrf.mxu1 }
 0x5f9   : > { %v1541_v28 = vpop.f32.mrf.mxu1 }
 0x5fa   : > { %v1547_v38 = vpack.c.bf16 %v1541_v28, %v1538_v43 }
 0x5fb   : > { %v6323_v31 = vpop.f32.mrf.mxu1 }
 0x5fc   : > { %6413 = vmatmul.mubr.bf16.gmra.mxu1 %v1547_v38 }
 0x5fd   : > { %v1745_v11 = vpop.f32.mrf.mxu1  ;;  %6440 = vmatprep.mubr.msk.bf16.mxu1 %vm7197_vm3, %v7196_v42 }
 0x5ff   : > { %v6350_v22 = vpop.f32.mrf.mxu1 }
 0x601   : > { %v1748_v33 = vpop.f32.mrf.mxu1 }
 0x602   : > { %v1768_v21 = vpack.c.bf16 %v1748_v33, %v1745_v11  ;;  %v7173_v33 = vld [vmem:[#allocation2 + $0x20] sm:$0xff] }
 0x603   : > { %v6351_v27 = vpop.f32.mrf.mxu1 }
 0x604   : > { %6377 = vmatmul.mubr.bf16.vlgmr.msra.gmra.mxu0 %v1768_v21 }
 0x605   : > { %v1753_v58 = vpop.f32.mrf.mxu1  ;;  %6380 = vmatprep.mubr.msk.bf16.mxu0 %vm7197_vm3, %v7196_v42 }
 0x607   : > { %v6354_v34 = vpop.f32.mrf.mxu1 }
 0x609   : > { %v1756_v37 = vpop.f32.mrf.mxu1 }
 0x60a   : > { %v1769_v39 = vpack.c.bf16 %v1756_v37, %v1753_v58 }
 0x60b   : > { %v6355_v26 = vpop.f32.mrf.mxu1 }
 0x60c   : > { %6381 = vmatmul.mubr.bf16.gmra.mxu0 %v1769_v39 }
 0x60d   : > { %v1761_v44 = vpop.f32.mrf.mxu1  ;;  %6384 = vmatprep.mubr.msk.bf16.mxu0 %vm7197_vm3, %v7196_v42 }
 0x60f   : > { %v6358_v48 = vpop.f32.mrf.mxu1 }
 0x611   : > { %v1764_v50 = vpop.f32.mrf.mxu1 }
 0x612   : > { %v1770_v30 = vpack.c.bf16 %v1764_v50, %v1761_v44  ;;  %v7174_v44 = vld [vmem:[#allocation2 + $0x28] sm:$0xff] }
 0x613   : > { %v6359_v63 = vpop.f32.mrf.mxu1 }
 0x614   : > { %6385 = vmatmul.mubr.bf16.gmra.mxu0 %v1770_v30 }
 0x615   : > { %6420 = vmatprep.mubr.msk.bf16.mxu0 %vm7197_vm3, %v7196_v42 }
 0x6ac   : > { %v1975_v32 = vpop.f32.mrf.mxu1 }
 0x6ae   : > { %v6406_v56 = vpop.f32.mrf.mxu1 }
 0x6b0   : > { %v1978_v40 = vpop.f32.mrf.mxu1 }
 0x6b2   : > { %v6407_v52 = vpop.f32.mrf.mxu1 }
 0x6b4   : > { %v1983_v57 = vpop.f32.mrf.mxu1 }
 0x6b6   : > { %v6410_v59 = vpop.f32.mrf.mxu1 }
 0x6b8   : > { %v1986_v62 = vpop.f32.mrf.mxu1 }
 0x6ba   : > { %v6411_v2 = vpop.f32.mrf.mxu1 }
 0x6bc   : > { %v1991_v8 = vpop.f32.mrf.mxu1 }
 0x6be   : > { %v6414_v36 = vpop.f32.mrf.mxu1 }
 0x6c0   : > { %v1994_v61 = vpop.f32.mrf.mxu1 }
 0x6c2   : > { %v6415_v10 = vpop.f32.mrf.mxu1 }
 0x6c4   : > { %v1870_v13 = vpop.f32.mrf.mxu0 }
 0x6c5   : > { %v1976_v51 = vadd.f32 %v1975_v32, %v1870_v13 }
 0x6c6   : > { %v6378_v35 = vpop.f32.mrf.mxu0 }
 0x6c7   : > { %v1998_v55 = vadd.f32 %v7169_v47, %v1976_v51 }
 0x6c8   : > { %v1873_v17 = vpop.f32.mrf.mxu0 }
 0x6c9   : > { %v2011_v46 = vadd.f32 %v5782_v60, %v1998_v55  ;;  %v1979_v14 = vadd.f32 %v1978_v40, %v1873_v17 }
 0x6ca   : > { %v6379_v53 = vpop.f32.mrf.mxu0 }
 0x6cb   : > { %2017 = vst.msk [vmem:[#allocation2] sm:$0xff] %vm920_vm2, %v2011_v46  ;;  %v1999_v3 = vadd.f32 %v7170_v20, %v1979_v14 }
 0x6cc   : > { %v1878_v7 = vpop.f32.mrf.mxu0 }
 0x6cd   : > { %v2012_v23 = vadd.f32 %v5782_v60, %v1999_v3  ;;  %v1984_v24 = vadd.f32 %v1983_v57, %v1878_v7 }
 0x6ce   : > { %v6382_v0 = vpop.f32.mrf.mxu0 }
 0x6cf   : > { %2018 = vst.msk [vmem:[#allocation2 + $0x8] sm:$0xff] %vm920_vm2, %v2012_v23  ;;  %v2000_v25 = vadd.f32 %v7171_v15, %v1984_v24 }
 0x6d0   : > { %v1881_v54 = vpop.f32.mrf.mxu0 }
 0x6d1   : > { %v2013_v6 = vadd.f32 %v5782_v60, %v2000_v25  ;;  %v1987_v4 = vadd.f32 %v1986_v62, %v1881_v54 }
 0x6d2   : > { %v6383_v16 = vpop.f32.mrf.mxu0  ;;  %v7836_v49 = vld [vmem:[#allocation2] sm:$0xff] }
 0x6d3   : > { %2019 = vst.msk [vmem:[#allocation2 + $0x10] sm:$0xff] %vm920_vm2, %v2013_v6  ;;  %v2001_v43 = vadd.f32 %v7172_v18, %v1987_v4  ;;  %v2029_v19 = vsel %vm920_vm2, %v7836_v49, 0.0 }
 0x6d4   : > { %2030 = vadd.xlane.f32.xlu0 %v2029_v19  ;;  %v1886_v28 = vpop.f32.mrf.mxu0  ;;  %v6844_v19 = vld [vmem:[%s8986_s3] sm:$0xff]  }
 0x6d5   : > { %v2014_v38 = vadd.f32 %v5782_v60, %v2001_v43  ;;  %v1992_v31 = vadd.f32 %v1991_v8, %v1886_v28  ;;  %v6843_v43 = vld [vmem:[%s8986_s3 + $0x8] sm:$0xff]  }
 0x6d6   : > { %v6386_v11 = vpop.f32.mrf.mxu0  ;;  %v7841_v22 = vld [vmem:[#allocation2 + $0x8] sm:$0xff]  ;;  %6417 = vmatpush3.bf16.msra.mxu0 %v6843_v43 }
 0x6d7   : > { %2020 = vst.msk [vmem:[#allocation2 + $0x18] sm:$0xff] %vm920_vm2, %v2014_v38  ;;  %v2002_v21 = vadd.f32 %v7173_v33, %v1992_v31  ;;  %v2032_v27 = vsel %vm920_vm2, %v7841_v22, 0.0  ;;  %6418 = vmatprep.subr.bf16.mxu0 %v7196_v42 }
 0x6d8   : > { %2033 = vadd.xlane.f32.xlu1 %v2032_v27  ;;  %v1889_v58 = vpop.f32.mrf.mxu0 }
 0x6d9   : > { %v2015_v34 = vadd.f32 %v5782_v60, %v2002_v21  ;;  %v1995_v37 = vadd.f32 %v1994_v61, %v1889_v58 }
 0x6da   : > { %v6387_v39 = vpop.f32.mrf.mxu0  ;;  %v7846_v26 = vld [vmem:[#allocation2 + $0x10] sm:$0xff]  ;;  %6419 = vmatpush3.bf16.msra.mxu0 %v6844_v19 }
 0x6db   : > { %2021 = vst.msk [vmem:[#allocation2 + $0x20] sm:$0xff] %vm920_vm2, %v2015_v34  ;;  %v2003_v48 = vadd.f32 %v7174_v44, %v1995_v37  ;;  %v2035_v50 = vsel %vm920_vm2, %v7846_v26, 0.0 }
 0x6dc   : > { %2036 = vadd.xlane.f32.xlu0 %v2035_v50 }
 0x6dd   : > { %v2016_v30 = vadd.f32 %v5782_v60, %v2003_v48 }
 0x6de   : > { %v7851_v63 = vld [vmem:[#allocation2 + $0x18] sm:$0xff] }
 0x6df   : > { %2022 = vst.msk [vmem:[#allocation2 + $0x28] sm:$0xff] %vm920_vm2, %v2016_v30  ;;  %v2038_v32 = vsel %vm920_vm2, %v7851_v63, 0.0 }
 0x6e0   : > { %2039 = vadd.xlane.f32.xlu1 %v2038_v32 }
 0x6e2   : > { %v7856_v56 = vld [vmem:[#allocation2 + $0x20] sm:$0xff] }
 0x6e3   : > { %v2041_v40 = vsel %vm920_vm2, %v7856_v56, 0.0 }
 0x6e4   : > { %2042 = vadd.xlane.f32.xlu0 %v2041_v40 }
 0x6e6   : > { %v7860_v52 = vld [vmem:[#allocation2 + $0x28] sm:$0xff] }
 0x6e7   : > { %v2044_v57 = vsel %vm920_vm2, %v7860_v52, 0.0 }
 0x6e8   : > { %2045 = vadd.xlane.f32.xlu1 %v2044_v57 }
 0x75d   : > { %v2031_v59 = vpop.xlane.xlu0 %2030 }
 0x75e   : > { %v2047_v62 = vmul.f32 0.03125, %v2031_v59 }
 0x760   : > { %v2053_v2 = vsub.f32 %v7836_v49, %v2047_v62 }
 0x761   : > { %v2034_v8 = vpop.xlane.xlu1 %2033 }
 0x762   : > { %v2048_v36 = vmul.f32 0.03125, %v2034_v8  ;;  %v2059_v61 = vmul.f32 %v2053_v2, %v2053_v2 }
 0x764   : > { %v2054_v10 = vsub.f32 %v7841_v22, %v2048_v36  ;;  %v2065_v13 = vsel %vm920_vm2, %v2059_v61, 0.0 }
 0x765   : > { %v2037_v51 = vpop.xlane.xlu0 %2036  ;;  %2066 = vadd.xlane.f32.xlu0 %v2065_v13 }
 0x766   : > { %v2049_v60 = vmul.f32 0.03125, %v2037_v51  ;;  %v2060_v35 = vmul.f32 %v2054_v10, %v2054_v10 }
 0x768   : > { %v2055_v47 = vsub.f32 %v7846_v26, %v2049_v60  ;;  %v2068_v55 = vsel %vm920_vm2, %v2060_v35, 0.0 }
 0x769   : > { %v2040_v17 = vpop.xlane.xlu1 %2039  ;;  %2069 = vadd.xlane.f32.xlu1 %v2068_v55 }
 0x76a   : > { %v2050_v46 = vmul.f32 0.03125, %v2040_v17  ;;  %v2061_v14 = vmul.f32 %v2055_v47, %v2055_v47 }
 0x76c   : > { %v2056_v53 = vsub.f32 %v7851_v63, %v2050_v46  ;;  %v2071_v20 = vsel %vm920_vm2, %v2061_v14, 0.0 }
 0x76d   : > { %2072 = vadd.xlane.f32.xlu0 %v2071_v20  ;;  %v2043_v3 = vpop.xlane.xlu0 %2042  ;;  %v6847_v20 = vld [vmem:[%s8934_s13 + $0x8] sm:$0xff]  }
 0x76e   : > { %v2051_v7 = vmul.f32 0.03125, %v2043_v3  ;;  %v2062_v23 = vmul.f32 %v2056_v53, %v2056_v53  ;;  %v6848_v3 = vld [vmem:[%s8934_s13] sm:$0xff]  }
 0x770   : > { %v2057_v24 = vsub.f32 %v7856_v56, %v2051_v7  ;;  %v2074_v0 = vsel %vm920_vm2, %v2062_v23, 0.0  ;;  %v5783_v7 = vld [vmem:[%s8933_s12] ss:$0 sm:$0xff] }
 0x771   : > { %2075 = vadd.xlane.f32.xlu1 %v2074_v0  ;;  %v2046_v15 = vpop.xlane.xlu1 %2045 }
 0x772   : > { %v2052_v25 = vmul.f32 0.03125, %v2046_v15  ;;  %v2063_v54 = vmul.f32 %v2057_v24, %v2057_v24 }
 0x774   : > { %v2058_v6 = vsub.f32 %v7860_v52, %v2052_v25  ;;  %v2077_v4 = vsel %vm920_vm2, %v2063_v54, 0.0 }
 0x775   : > { %2078 = vadd.xlane.f32.xlu0 %v2077_v4 }
 0x776   : > { %v2064_v16 = vmul.f32 %v2058_v6, %v2058_v6 }
 0x778   : > { %v2080_v18 = vsel %vm920_vm2, %v2064_v16, 0.0 }
 0x779   : > { %2081 = vadd.xlane.f32.xlu1 %v2080_v18 }
 0x7ee   : > { %v2067_v28 = vpop.xlane.xlu0 %2066 }
 0x7ef   : > { %v2083_v38 = vmul.f32 0.03125, %v2067_v28 }
 0x7f1   : > { %v2089_v31 = vadd.f32 1e-05, %v2083_v38 }
 0x7f2   : > { %v2070_v11 = vpop.xlane.xlu1 %2069 }
 0x7f3   : > { %v2084_v33 = vmul.f32 0.03125, %v2070_v11  ;;  %7029 = vrsqrt.f32 %v2089_v31 }
 0x7f5   : > { %v2090_v21 = vadd.f32 1e-05, %v2084_v33 }
 0x7f6   : > { %v2073_v27 = vpop.xlane.xlu0 %2072 }
 0x7f7   : > { %7031 = vrsqrt.f32 %v2090_v21  ;;  %v2085_v58 = vmul.f32 0.03125, %v2073_v27 }
 0x7f9   : > { %v2091_v34 = vadd.f32 1e-05, %v2085_v58 }
 0x7fa   : > { %v2076_v37 = vpop.xlane.xlu1 %2075 }
 0x7fb   : > { %v2086_v39 = vmul.f32 0.03125, %v2076_v37  ;;  %7033 = vrsqrt.f32 %v2091_v34 }
 0x7fd   : > { %v2092_v44 = vadd.f32 1e-05, %v2086_v39 }
 0x7fe   : > { %v2079_v48 = vpop.xlane.xlu0 %2078 }
 0x7ff   : > { %7035 = vrsqrt.f32 %v2092_v44  ;;  %v2087_v50 = vmul.f32 0.03125, %v2079_v48 }
 0x800   : > { %v7030_v32 = vpop.eup %7029 }
 0x801   : > { %v2093_v30 = vadd.f32 1e-05, %v2087_v50  ;;  %v2101_v62 = vmul.f32 %v7030_v32, %v2053_v2 }
 0x802   : > { %v2082_v40 = vpop.xlane.xlu1 %2081 }
 0x803   : > { %v2088_v57 = vmul.f32 0.03125, %v2082_v40  ;;  %7037 = vrsqrt.f32 %v2093_v30 }
 0x804   : > { %v7032_v59 = vpop.eup %7031 }
 0x805   : > { %v2102_v8 = vmul.f32 %v7032_v59, %v2054_v10  ;;  %v2094_v36 = vadd.f32 1e-05, %v2088_v57 }
 0x807   : > { %7039 = vrsqrt.f32 %v2094_v36  ;;  %v2111_v61 = vpack.c.bf16 %v2102_v8, %v2101_v62 }
 0x808   : > { %v7034_v13 = vpop.eup %7033 }
 0x809   : > { %6421 = vmatmul.mubr.msk.bf16.vlgmr.msra.gmra.mxu0 %vm920_vm2, %v2111_v61  ;;  %v2103_v60 = vmul.f32 %v7034_v13, %v2055_v47  ;;  %v6845_v47 = vld [vmem:[%s8934_s13 + $0x18] sm:$0xff]  }
 0x80a   : > { %6424 = vmatprep.mubr.msk.bf16.mxu0 %vm7197_vm3, %v7196_v42  ;;  %6433 = vmatpush3.bf16.msra.mxu1 %v6845_v47 }
 0x80b   : > { %6434 = vmatprep.subr.bf16.mxu1 %v7196_v42 }
 0x80c   : > { %v7036_v51 = vpop.eup %7035 }
 0x80d   : > { %v2104_v35 = vmul.f32 %v7036_v51, %v2056_v53  ;;  %v6846_v53 = vld [vmem:[%s8934_s13 + $0x10] sm:$0xff]  }
 0x80e   : > { %6435 = vmatpush3.bf16.msra.mxu1 %v6846_v53 }
 0x80f   : > { %v2112_v55 = vpack.c.bf16 %v2104_v35, %v2103_v60  ;;  %6436 = vmatprep.subr.bf16.mxu1 %v7196_v42 }
 0x810   : > { %v7038_v17 = vpop.eup %7037 }
 0x811   : > { %6425 = vmatmul.mubr.msk.bf16.gmra.mxu0 %vm920_vm2, %v2112_v55  ;;  %v2105_v10 = vmul.f32 %v7038_v17, %v2057_v24 }
 0x812   : > { %6428 = vmatprep.mubr.msk.bf16.mxu0 %vm7197_vm3, %v7196_v42  ;;  %6437 = vmatpush3.bf16.msra.mxu1 %v6847_v20 }
 0x813   : > { %6438 = vmatprep.subr.bf16.mxu1 %v7196_v42 }
 0x814   : > { %v7040_v2 = vpop.eup %7039 }
 0x815   : > { %v2106_v46 = vmul.f32 %v7040_v2, %v2058_v6 }
 0x816   : > { %6439 = vmatpush3.bf16.msra.mxu1 %v6848_v3 }
 0x817   : > { %v2113_v14 = vpack.c.bf16 %v2106_v46, %v2105_v10 }
 0x819   : > { %6429 = vmatmul.mubr.msk.bf16.gmra.mxu0 %vm920_vm2, %v2113_v14 }
 0x81a   : > { %2614 = vmatprep.mubr.bf16.mxu0 %v7195_v12 }
 0x8c9   : > { %v2176_v23 = vpop.f32.mrf.mxu0 }
 0x8ca   : > { %v2177_v24 = vadd.f32 %v5783_v7, %v2176_v23 }
 0x8cb   : > { %v6422_v0 = vpop.f32.mrf.mxu0 }
 0x8cc   : > { %v2205_v15 = vmul.f32 0.044715, %v2177_v24  ;;  %v2199_v0 = vmul.f32 0.5, %v2177_v24 }
 0x8cd   : > { %v2179_v25 = vpop.f32.mrf.mxu0 }
 0x8ce   : > { %v2211_v54 = vmul.f32 %v2205_v15, %v2177_v24  ;;  %v2180_v6 = vadd.f32 %v5783_v7, %v2179_v25 }
 0x8cf   : > { %v6423_v4 = vpop.f32.mrf.mxu0 }
 0x8d0   : > { %v2217_v16 = vmul.f32 %v2211_v54, %v2177_v24  ;;  %v2206_v18 = vmul.f32 0.044715, %v2180_v6  ;;  %v2200_v15 = vmul.f32 0.5, %v2180_v6 }
 0x8d1   : > { %v2184_v43 = vpop.f32.mrf.mxu0 }
 0x8d2   : > { %v2223_v19 = vadd.f32 %v2217_v16, %v2177_v24  ;;  %v2212_v28 = vmul.f32 %v2206_v18, %v2180_v6  ;;  %v2185_v38 = vadd.f32 %v5783_v7, %v2184_v43 }
 0x8d3   : > { %v6426_v31 = vpop.f32.mrf.mxu0 }
 0x8d4   : > { %v2229_v11 = vmul.f32 0.7978846, %v2223_v19  ;;  %v2218_v33 = vmul.f32 %v2212_v28, %v2180_v6  ;;  %v2207_v21 = vmul.f32 0.044715, %v2185_v38  ;;  %v2201_v28 = vmul.f32 0.5, %v2185_v38 }
 0x8d5   : > { %v2187_v27 = vpop.f32.mrf.mxu0 }
 0x8d6   : > { %7041 = vtanh.f32 %v2229_v11  ;;  %v2224_v58 = vadd.f32 %v2218_v33, %v2180_v6  ;;  %v2213_v34 = vmul.f32 %v2207_v21, %v2185_v38  ;;  %v2188_v37 = vadd.f32 %v5783_v7, %v2187_v27 }
 0x8d7   : > { %v6427_v39 = vpop.f32.mrf.mxu0 }
 0x8d8   : > { %v2230_v44 = vmul.f32 0.7978846, %v2224_v58  ;;  %v2219_v48 = vmul.f32 %v2213_v34, %v2185_v38  ;;  %v2208_v50 = vmul.f32 0.044715, %v2188_v37  ;;  %v2202_v31 = vmul.f32 0.5, %v2188_v37 }
 0x8d9   : > { %v2192_v30 = vpop.f32.mrf.mxu0 }
 0x8da   : > { %7043 = vtanh.f32 %v2230_v44  ;;  %v2225_v32 = vadd.f32 %v2219_v48, %v2185_v38  ;;  %v2214_v40 = vmul.f32 %v2208_v50, %v2188_v37  ;;  %v2193_v57 = vadd.f32 %v5783_v7, %v2192_v30 }
 0x8db   : > { %v6430_v59 = vpop.f32.mrf.mxu0 }
 0x8dc   : > { %v2231_v62 = vmul.f32 0.7978846, %v2225_v32  ;;  %v2220_v8 = vmul.f32 %v2214_v40, %v2188_v37  ;;  %v2209_v36 = vmul.f32 0.044715, %v2193_v57  ;;  %v2203_v34 = vmul.f32 0.5, %v2193_v57 }
 0x8dd   : > { %v2195_v61 = vpop.f32.mrf.mxu0 }
 0x8de   : > { %7045 = vtanh.f32 %v2231_v62  ;;  %v2226_v13 = vadd.f32 %v2220_v8, %v2188_v37  ;;  %v2215_v51 = vmul.f32 %v2209_v36, %v2193_v57  ;;  %v2196_v60 = vadd.f32 %v5783_v7, %v2195_v61  ;;  %v5796_v37 = vld [vmem:[%s8935_s14] ss:$0 sm:$0xff] }
 0x8df   : > { %v6431_v35 = vpop.f32.mrf.mxu0 }
 0x8e0   : > { %v2232_v55 = vmul.f32 0.7978846, %v2226_v13  ;;  %v2221_v17 = vmul.f32 %v2215_v51, %v2193_v57  ;;  %v2210_v2 = vmul.f32 0.044715, %v2196_v60  ;;  %v2204_v39 = vmul.f32 0.5, %v2196_v60 }
 0x8e2   : > { %7047 = vtanh.f32 %v2232_v55  ;;  %v2227_v10 = vadd.f32 %v2221_v17, %v2193_v57  ;;  %v2216_v46 = vmul.f32 %v2210_v2, %v2196_v60 }
 0x8e3   : > { %v7042_v14 = vpop.eup %7041 }
 0x8e4   : > { %v2233_v47 = vmul.f32 0.7978846, %v2227_v10  ;;  %v2222_v53 = vmul.f32 %v2216_v46, %v2196_v60  ;;  %v2241_v20 = vadd.f32 1.0, %v7042_v14 }
 0x8e6   : > { %7049 = vtanh.f32 %v2233_v47  ;;  %v2228_v3 = vadd.f32 %v2222_v53, %v2196_v60  ;;  %v2247_v4 = vmul.f32 %v2241_v20, %v2199_v0 }
 0x8e7   : > { %v7044_v23 = vpop.eup %7043 }
 0x8e8   : > { %v2242_v25 = vadd.f32 1.0, %v7044_v23  ;;  %v2234_v54 = vmul.f32 0.7978846, %v2228_v3 }
 0x8ea   : > { %v2248_v7 = vmul.f32 %v2242_v25, %v2200_v15  ;;  %7051 = vtanh.f32 %v2234_v54 }
 0x8eb   : > { %v7046_v16 = vpop.eup %7045 }
 0x8ec   : > { %v2261_v18 = vpack.c.bf16 %v2248_v7, %v2247_v4  ;;  %v2243_v43 = vadd.f32 1.0, %v7046_v16 }
 0x8ee   : > { %6441 = vmatmul.mubr.msk.bf16.vlgmr.msra.gmra.mxu1 %vm2288_vm4, %v2261_v18  ;;  %v2249_v24 = vmul.f32 %v2243_v43, %v2201_v28 }
 0x8ef   : > { %v7048_v19 = vpop.eup %7047  ;;  %6444 = vmatprep.mubr.msk.bf16.mxu1 %vm7197_vm3, %v7196_v42 }
 0x8f0   : > { %v2244_v11 = vadd.f32 1.0, %v7048_v19 }
 0x8f2   : > { %v2250_v6 = vmul.f32 %v2244_v11, %v2202_v31 }
 0x8f3   : > { %v7050_v33 = vpop.eup %7049 }
 0x8f4   : > { %v2262_v21 = vpack.c.bf16 %v2250_v6, %v2249_v24  ;;  %v2245_v27 = vadd.f32 1.0, %v7050_v33 }
 0x8f6   : > { %6445 = vmatmul.mubr.msk.bf16.gmra.mxu1 %vm2288_vm4, %v2262_v21  ;;  %v2251_v48 = vmul.f32 %v2245_v27, %v2203_v34 }
 0x8f7   : > { %v7052_v58 = vpop.eup %7051  ;;  %6448 = vmatprep.mubr.msk.bf16.mxu1 %vm7197_vm3, %v7196_v42 }
 0x8f8   : > { %v2246_v44 = vadd.f32 1.0, %v7052_v58 }
 0x8fa   : > { %v2252_v50 = vmul.f32 %v2246_v44, %v2204_v39 }
 0x8fc   : > { %v2263_v30 = vpack.c.bf16 %v2252_v50, %v2251_v48 }
 0x8fe   : > { %6449 = vmatmul.mubr.msk.bf16.gmra.mxu1 %vm2288_vm4, %v2263_v30 }
 0x8ff   : > { %2677 = vmatprep.mubr.bf16.mxu1 %v7195_v12 }
 0x9ae   : > { %v2332_v38 = vpop.f32.mrf.mxu1 }
 0x9af   : > { %v2355_v32 = vadd.f32 %v2332_v38, %v7836_v49 }
 0x9b0   : > { %v6442_v40 = vpop.f32.mrf.mxu1 }
 0x9b1   : > { %v2368_v59 = vadd.f32 %v5796_v37, %v2355_v32 }
 0x9b2   : > { %v2335_v62 = vpop.f32.mrf.mxu1 }
 0x9b3   : > { %2374 = vst.msk [vmem:[#allocation2] sm:$0xff] %vm920_vm2, %v2368_v59  ;;  %v2356_v57 = vadd.f32 %v2335_v62, %v7841_v22 }
 0x9b4   : > { %v6443_v8 = vpop.f32.mrf.mxu1 }
 0x9b5   : > { %v2369_v36 = vadd.f32 %v5796_v37, %v2356_v57 }
 0x9b6   : > { %v2340_v61 = vpop.f32.mrf.mxu1 }
 0x9b7   : > { %2375 = vst.msk [vmem:[#allocation2 + $0x8] sm:$0xff] %vm920_vm2, %v2369_v36  ;;  %v2357_v13 = vadd.f32 %v2340_v61, %v7846_v26 }
 0x9b8   : > { %v6446_v51 = vpop.f32.mrf.mxu1 }
 0x9b9   : > { %v2370_v60 = vadd.f32 %v5796_v37, %v2357_v13  ;;  %v6851_v51 = vld [vmem:[%s8981_s8 + $0x94] ss:$24 sps:$4 sm:$0xff]  }
 0x9ba   : > { %v2343_v35 = vpop.f32.mrf.mxu1  ;;  %v2380_v55 = vld [vmem:[#allocation2] sm:$0xff]  ;;  %2594 = vmatprep.subr.bf16.mxu0 %v6851_v51 }
 0x9bb   : > { %2376 = vst.msk [vmem:[#allocation2 + $0x10] sm:$0xff] %vm920_vm2, %v2370_v60  ;;  %v2358_v49 = vadd.f32 %v2343_v35, %v7851_v63  ;;  %v2386_v17 = vsel %vm920_vm2, %v2380_v55, 0.0  ;;  %v6857_v60 = vld [vmem:[%s8981_s8 + $0x9c] ss:$24 sps:$4 sm:$0xff]   ;;  %v6849_v35 = vld [vmem:[%s8981_s8 + $0x90] ss:$24 sps:$4 sm:$0xff]  }
 0x9bc   : > { %2387 = vadd.xlane.f32.xlu0 %v2386_v17  ;;  %v6447_v2 = vpop.f32.mrf.mxu1  ;;  %2657 = vmatprep.subr.bf16.mxu1 %v6857_v60  ;;  %v6860_v17 = vld [vmem:[%s8981_s8 + $0x6c] ss:$24 sps:$4 sm:$0xff]  }
 0x9bd   : > { %v2371_v22 = vadd.f32 %v5796_v37, %v2358_v49  ;;  %2595 = vmatpush1.bf16.msra.mxu0 %v6849_v35  ;;  %v6854_v49 = vld [vmem:[%s8981_s8 + $0x64] ss:$24 sps:$4 sm:$0xff]   ;;  %v6852_v2 = vld [vmem:[%s8981_s8 + $0x60] ss:$24 sps:$4 sm:$0xff]  }
 0x9be   : > { %v2348_v10 = vpop.f32.mrf.mxu1  ;;  %v2381_v46 = vld [vmem:[#allocation2 + $0x8] sm:$0xff]  ;;  %2596 = vmatprep.subr.bf16.mxu0 %v6854_v49 }
 0x9bf   : > { %2377 = vst.msk [vmem:[#allocation2 + $0x18] sm:$0xff] %vm920_vm2, %v2371_v22  ;;  %v2359_v14 = vadd.f32 %v2348_v10, %v7856_v56  ;;  %v2389_v26 = vsel %vm920_vm2, %v2381_v46, 0.0  ;;  %v6858_v22 = vld [vmem:[%s8981_s8 + $0x68] ss:$24 sps:$4 sm:$0xff]   ;;  %v6863_v10 = vld [vmem:[%s8981_s8 + $0xa4] ss:$24 sps:$4 sm:$0xff]  }
 0x9c0   : > { %2390 = vadd.xlane.f32.xlu1 %v2389_v26  ;;  %v6450_v47 = vpop.f32.mrf.mxu1 }
 0x9c1   : > { %v2372_v53 = vadd.f32 %v5796_v37, %v2359_v14  ;;  %2597 = vmatpush1.bf16.msra.mxu0 %v6852_v2 }
 0x9c2   : > { %v2351_v20 = vpop.f32.mrf.mxu1  ;;  %v2382_v3 = vld [vmem:[#allocation2 + $0x10] sm:$0xff]  ;;  %2720 = vmatprep.subr.bf16.mxu0 %v6863_v10 }
 0x9c3   : > { %2378 = vst.msk [vmem:[#allocation2 + $0x20] sm:$0xff] %vm920_vm2, %v2372_v53  ;;  %v2360_v63 = vadd.f32 %v2351_v20, %v7860_v52  ;;  %v2392_v23 = vsel %vm920_vm2, %v2382_v3, 0.0 }
 0x9c4   : > { %2393 = vadd.xlane.f32.xlu0 %v2392_v23  ;;  %v6451_v0 = vpop.f32.mrf.mxu1 }
 0x9c5   : > { %v2373_v15 = vadd.f32 %v5796_v37, %v2360_v63 }
 0x9c6   : > { %v2383_v25 = vld [vmem:[#allocation2 + $0x18] sm:$0xff] }
 0x9c7   : > { %2379 = vst.msk [vmem:[#allocation2 + $0x28] sm:$0xff] %vm920_vm2, %v2373_v15  ;;  %v2395_v56 = vsel %vm920_vm2, %v2383_v25, 0.0 }
 0x9c8   : > { %2396 = vadd.xlane.f32.xlu1 %v2395_v56 }
 0x9ca   : > { %v2384_v54 = vld [vmem:[#allocation2 + $0x20] sm:$0xff] }
 0x9cb   : > { %v2398_v4 = vsel %vm920_vm2, %v2384_v54, 0.0 }
 0x9cc   : > { %2399 = vadd.xlane.f32.xlu0 %v2398_v4 }
 0x9ce   : > { %v2385_v7 = vld [vmem:[#allocation2 + $0x28] sm:$0xff] }
 0x9cf   : > { %v2401_v16 = vsel %vm920_vm2, %v2385_v7, 0.0 }
 0x9d0   : > { %2402 = vadd.xlane.f32.xlu1 %v2401_v16 }
 0xa45   : > { %v2388_v52 = vpop.xlane.xlu0 %2387 }
 0xa46   : > { %v2404_v18 = vmul.f32 0.03125, %v2388_v52 }
 0xa48   : > { %v7938_v43 = vsub.f32 %v2380_v55, %v2404_v18  ;;  %v6855_v55 = vld [vmem:[%s8981_s8 + $0x98] ss:$24 sps:$4 sm:$0xff]  }
 0xa49   : > { %v2391_v19 = vpop.xlane.xlu1 %2390  ;;  %2658 = vmatpush1.bf16.msra.mxu1 %v6855_v55 }
 0xa4a   : > { %v2405_v28 = vmul.f32 0.03125, %v2391_v19  ;;  %v2416_v31 = vmul.f32 %v7938_v43, %v7938_v43  ;;  %2659 = vmatprep.subr.bf16.mxu1 %v6860_v17  ;;  %v8051_v17 = vld [vmem:[%s8982_s10 + $0x6] sm:$0x3f] }
 0xa4c   : > { %v7942_v11 = vsub.f32 %v2381_v46, %v2405_v28  ;;  %v2422_v24 = vsel %vm920_vm2, %v2416_v31, 0.0 }
 0xa4d   : > { %v2394_v6 = vpop.xlane.xlu0 %2393  ;;  %2423 = vadd.xlane.f32.xlu0 %v2422_v24  ;;  %2660 = vmatpush1.bf16.msra.mxu1 %v6858_v22  ;;  %v6861_v24 = vld [vmem:[%s8981_s8 + $0xa0] ss:$24 sps:$4 sm:$0xff]  }
 0xa4e   : > { %v2406_v33 = vmul.f32 0.03125, %v2394_v6  ;;  %v2417_v21 = vmul.f32 %v7942_v11, %v7942_v11  ;;  %6452 = vmatprep.subr.bf16.mxu1 %v7196_v42 }
 0xa50   : > { %v7947_v27 = vsub.f32 %v2382_v3, %v2406_v33  ;;  %v2425_v58 = vsel %vm920_vm2, %v2417_v21, 0.0  ;;  %v6866_v33 = vld [vmem:[%s8981_s8 + $0x74] ss:$24 sps:$4 sm:$0xff]  }
 0xa51   : > { %v2397_v34 = vpop.xlane.xlu1 %2396  ;;  %2426 = vadd.xlane.f32.xlu1 %v2425_v58 }
 0xa52   : > { %v2407_v39 = vmul.f32 0.03125, %v2397_v34  ;;  %v2418_v44 = vmul.f32 %v7947_v27, %v7947_v27 }
 0xa54   : > { %v7952_v48 = vsub.f32 %v2383_v25, %v2407_v39  ;;  %v2428_v50 = vsel %vm920_vm2, %v2418_v44, 0.0 }
 0xa55   : > { %2429 = vadd.xlane.f32.xlu0 %v2428_v50  ;;  %v2400_v30 = vpop.xlane.xlu0 %2399 }
 0xa56   : > { %v2408_v38 = vmul.f32 0.03125, %v2400_v30  ;;  %v2419_v37 = vmul.f32 %v7952_v48, %v7952_v48 }
 0xa58   : > { %v7957_v32 = vsub.f32 %v2384_v54, %v2408_v38  ;;  %v2431_v40 = vsel %vm920_vm2, %v2419_v37, 0.0 }
 0xa59   : > { %2432 = vadd.xlane.f32.xlu1 %v2431_v40  ;;  %v2403_v59 = vpop.xlane.xlu1 %2402 }
 0xa5a   : > { %v2409_v62 = vmul.f32 0.03125, %v2403_v59  ;;  %v2420_v57 = vmul.f32 %v7957_v32, %v7957_v32 }
 0xa5c   : > { %v7962_v8 = vsub.f32 %v2385_v7, %v2409_v62  ;;  %v2434_v36 = vsel %vm920_vm2, %v2420_v57, 0.0 }
 0xa5d   : > { %2435 = vadd.xlane.f32.xlu0 %v2434_v36 }
 0xa5e   : > { %v2421_v61 = vmul.f32 %v7962_v8, %v7962_v8 }
 0xa60   : > { %v2437_v13 = vsel %vm920_vm2, %v2421_v61, 0.0 }
 0xa61   : > { %2438 = vadd.xlane.f32.xlu1 %v2437_v13 }
 0xad6   : > { %v2424_v46 = vpop.xlane.xlu0 %2423 }
 0xad7   : > { %v2440_v14 = vmul.f32 0.03125, %v2424_v46 }
 0xad9   : > { %v2446_v26 = vadd.f32 1e-05, %v2440_v14  ;;  %v2494_v14 = vrot.slane %v8051_v17, %v7505_v5 }
 0xada   : > { %v2427_v47 = vpop.xlane.xlu1 %2426 }
 0xadb   : > { %v2441_v53 = vmul.f32 0.03125, %v2427_v47  ;;  %7053 = vrsqrt.f32 %v2446_v26 }
 0xadd   : > { %v2447_v20 = vadd.f32 1e-05, %v2441_v53  ;;  %v2490_v53 = vrot.slane %v8051_v17, %v7515_v9 }
 0xade   : > { %v2430_v3 = vpop.xlane.xlu0 %2429 }
 0xadf   : > { %7055 = vrsqrt.f32 %v2447_v20  ;;  %v2442_v63 = vmul.f32 0.03125, %v2430_v3 }
 0xae1   : > { %v2448_v23 = vadd.f32 1e-05, %v2442_v63 }
 0xae2   : > { %v2433_v0 = vpop.xlane.xlu1 %2432 }
 0xae3   : > { %v2443_v15 = vmul.f32 0.03125, %v2433_v0  ;;  %7057 = vrsqrt.f32 %v2448_v23 }
 0xae5   : > { %v2449_v25 = vadd.f32 1e-05, %v2443_v15 }
 0xae6   : > { %v2436_v56 = vpop.xlane.xlu0 %2435 }
 0xae7   : > { %7059 = vrsqrt.f32 %v2449_v25  ;;  %v2444_v54 = vmul.f32 0.03125, %v2436_v56 }
 0xae8   : > { %v7054_v7 = vpop.eup %7053 }
 0xae9   : > { %v2450_v4 = vadd.f32 1e-05, %v2444_v54  ;;  %v2458_v19 = vmul.f32 %v7054_v7, %v7938_v43  ;;  %v6864_v43 = vld [vmem:[%s8981_s8 + $0x70] ss:$24 sps:$4 sm:$0xff]  }
 0xaea   : > { %v2439_v16 = vpop.xlane.xlu1 %2438 }
 0xaeb   : > { %v2445_v52 = vmul.f32 0.03125, %v2439_v16  ;;  %7061 = vrsqrt.f32 %v2450_v4 }
 0xaec   : > { %v7056_v18 = vpop.eup %7055 }
 0xaed   : > { %v2459_v28 = vmul.f32 %v7056_v18, %v7942_v11  ;;  %v2451_v31 = vadd.f32 1e-05, %v2445_v52  ;;  %v8068_v18 = vrot.slane %v8051_v17, %v7713_v29 }
 0xaef   : > { %7063 = vrsqrt.f32 %v2451_v31  ;;  %v2477_v6 = vpack.c.bf16 %v2459_v28, %v2458_v19 }
 0xaf0   : > { %v7058_v21 = vpop.eup %7057 }
 0xaf1   : > { %5822 = vmatmul.mubr.msk.bf16.vlgmr.msra.gmra.mxu0 %vm920_vm2, %v2477_v6  ;;  %5825 = vmatmul.mubr.msk.bf16.vlgmr.msra.gmra.mxu1 %vm920_vm2, %v2477_v6  ;;  %v2460_v58 = vmul.f32 %v7058_v21, %v7947_v27 }
 0xaf2   : > { %2721 = vmatpush1.bf16.msra.mxu0 %v6861_v24  ;;  %2624 = vmatprep.mubr.bf16.mxu0 %v7195_v12 }
 0xaf3   : > { %2687 = vmatprep.mubr.bf16.mxu1 %v7195_v12  ;;  %2722 = vmatprep.subr.bf16.mxu0 %v6866_v33 }
 0xaf4   : > { %v7060_v11 = vpop.eup %7059 }
 0xaf5   : > { %v2461_v34 = vmul.f32 %v7060_v11, %v7952_v48 }
 0xaf6   : > { %2723 = vmatpush1.bf16.msra.mxu0 %v6864_v43 }
 0xaf7   : > { %v2478_v39 = vpack.c.bf16 %v2461_v34, %v2460_v58  ;;  %6470 = vmatprep.subr.bf16.mxu0 %v7196_v42 }
 0xaf8   : > { %v7062_v44 = vpop.eup %7061 }
 0xaf9   : > { %5823 = vmatmul.mubr.msk.bf16.gmra.mxu0 %vm920_vm2, %v2478_v39  ;;  %5826 = vmatmul.mubr.msk.bf16.gmra.mxu1 %vm920_vm2, %v2478_v39  ;;  %v2462_v30 = vmul.f32 %v7062_v44, %v7957_v32 }
 0xafa   : > { %2634 = vmatprep.mubr.bf16.mxu0 %v7195_v12  ;;  %2697 = vmatprep.mubr.bf16.mxu1 %v7195_v12 }
 0xafc   : > { %v7064_v50 = vpop.eup %7063 }
 0xafd   : > { %v2463_v27 = vmul.f32 %v7064_v50, %v7962_v8 }
 0xaff   : > { %v2479_v38 = vpack.c.bf16 %v2463_v27, %v2462_v30 }
 0xb01   : > { %5824 = vmatmul.mubr.msk.bf16.gmra.mxu0 %vm920_vm2, %v2479_v38  ;;  %5827 = vmatmul.mubr.msk.bf16.gmra.mxu1 %vm920_vm2, %v2479_v38 }
 0xb02   : > { %2740 = vmatprep.mubr.bf16.mxu0 %v7195_v12  ;;  %6458 = vmatprep.mubr.msk.bf16.mxu1 %vm7197_vm3, %v7196_v42 }
 0xb09   : > { %5828 = vmatmul.mubr.msk.bf16.vlgmr.msra.gmra.mxu0 %vm920_vm2, %v2477_v6 }
 0xb0a   : > { %2750 = vmatprep.mubr.bf16.mxu0 %v7195_v12 }
 0xb11   : > { %5829 = vmatmul.mubr.msk.bf16.gmra.mxu0 %vm920_vm2, %v2478_v39 }
 0xb12   : > { %2760 = vmatprep.mubr.bf16.mxu0 %v7195_v12 }
 0xb19   : > { %5830 = vmatmul.mubr.msk.bf16.gmra.mxu0 %vm920_vm2, %v2479_v38 }
 0xb1a   : > { %6476 = vmatprep.mubr.msk.bf16.mxu0 %vm7197_vm3, %v7196_v42 }
 0xbb1   : > { %v8032_v48 = vpop.f32.mrf.mxu0  ;;  %v2679_v37 = vpop.f32.mrf.mxu1 }
 0xbb2   : > { %v2680_v28 = vadd.f32 %v2679_v37, %v2494_v14 }
 0xbb3   : > { %v2618_v32 = vpop.f32.mrf.mxu0  ;;  %v8034_v40 = vpop.f32.mrf.mxu1 }
 0xbb4   : > { %v2619_v27 = vadd.f32 %v2618_v32, %v2490_v53 }
 0xbb5   : > { %v8036_v59 = vpop.f32.mrf.mxu0  ;;  %v2683_v62 = vpop.f32.mrf.mxu1 }
 0xbb6   : > { %v2684_v16 = vadd.f32 %v2683_v62, %v2494_v14 }
 0xbb7   : > { %v2622_v57 = vpop.f32.mrf.mxu0  ;;  %v8038_v8 = vpop.f32.mrf.mxu1 }
 0xbb8   : > { %v2773_v6 = vpack.c.bf16 %v2684_v16, %v2680_v28  ;;  %v2623_v50 = vadd.f32 %v2622_v57, %v2490_v53  ;;  %v2502_v57 = vrot.slane %v8051_v17, %v7545_v45 }
 0xbb9   : > { %v8040_v36 = vpop.f32.mrf.mxu0  ;;  %v2689_v61 = vpop.f32.mrf.mxu1 }
 0xbba   : > { %v2690_v54 = vadd.f32 %v2689_v61, %v2494_v14  ;;  %v2772_v61 = vpack.c.bf16 %v2623_v50, %v2619_v27 }
 0xbbb   : > { %v2628_v13 = vpop.f32.mrf.mxu0  ;;  %v8042_v51 = vpop.f32.mrf.mxu1 }
 0xbbc   : > { %v2629_v33 = vadd.f32 %v2628_v13, %v2490_v53 }
 0xbbd   : > { %v8044_v60 = vpop.f32.mrf.mxu0  ;;  %v2693_v35 = vpop.f32.mrf.mxu1 }
 0xbbe   : > { %v2694_v23 = vadd.f32 %v2693_v35, %v2494_v14  ;;  %v2486_v35 = vrot.slane %v8051_v17, %v7539_v41 }
 0xbbf   : > { %v2632_v55 = vpop.f32.mrf.mxu0  ;;  %v8046_v49 = vpop.f32.mrf.mxu1 }
 0xbc0   : > { %v2779_v52 = vpack.c.bf16 %v2694_v23, %v2690_v54  ;;  %v2633_v31 = vadd.f32 %v2632_v55, %v2490_v53  ;;  %v2621_v32 = vadd.f32 %v8036_v59, %v2486_v35  ;;  %v2627_v59 = vadd.f32 %v8040_v36, %v2486_v35 }
 0xbc1   : > { %v8053_v2 = vpop.f32.mrf.mxu0  ;;  %v2699_v22 = vpop.f32.mrf.mxu1  ;;  %v2498_v36 = vrot.slane %v8051_v17, %v7566_v1 }
 0xbc2   : > { %v2700_v20 = vadd.f32 %v2699_v22, %v2494_v14  ;;  %v2778_v58 = vpack.c.bf16 %v2633_v31, %v2629_v33 }
 0xbc3   : > { %v2638_v10 = vpop.f32.mrf.mxu0  ;;  %v8055_v46 = vpop.f32.mrf.mxu1  ;;  %v2686_v16 = vadd.f32 %v8038_v8, %v2498_v36  ;;  %v2692_v17 = vadd.f32 %v8042_v51, %v2498_v36  ;;  %v7175_v51 = vld [vmem:[%s8983_s11] sm:$0xff] }
 0xbc4   : > { %v2639_v0 = vadd.f32 %v2638_v10, %v2490_v53  ;;  %v2702_v28 = vadd.f32 %v8055_v46, %v2498_v36 }
 0xbc5   : > { %v8059_v26 = vpop.f32.mrf.mxu0  ;;  %v2703_v47 = vpop.f32.mrf.mxu1 }
 0xbc6   : > { %v2704_v3 = vadd.f32 %v2703_v47, %v2494_v14  ;;  %v2617_v14 = vadd.f32 %v8032_v48, %v2486_v35  ;;  %v2641_v48 = vadd.f32 %v8059_v26, %v2486_v35  ;;  %v2682_v26 = vadd.f32 %v8034_v40, %v2498_v36 }
 0xbc7   : > { %v2642_v63 = vpop.f32.mrf.mxu0 }
 0xbc8   : > { %v2785_v15 = vpack.c.bf16 %v2704_v3, %v2700_v20  ;;  %v2643_v25 = vadd.f32 %v2642_v63, %v2490_v53  ;;  %v2771_v53 = vpack.c.bf16 %v2621_v32, %v2617_v14  ;;  %v2631_v3 = vadd.f32 %v8044_v60, %v2486_v35  ;;  %v7178_v14 = vld [vmem:[%s8983_s11 + $0x18] sm:$0xff] }
 0xbc9   : > { %v8063_v56 = vpop.f32.mrf.mxu0  ;;  %v2637_v60 = vadd.f32 %v8053_v2, %v2486_v35  ;;  %v2696_v2 = vadd.f32 %v8046_v49, %v2498_v36 }
 0xbca   : > { %v2784_v4 = vpack.c.bf16 %v2643_v25, %v2639_v0  ;;  %6471 = vmatpush3.bf16.msra.mxu0 %v2785_v15  ;;  %v2777_v0 = vpack.c.bf16 %v2631_v3, %v2627_v59  ;;  %v2743_v54 = vadd.f32 %v8063_v56, %v2502_v57  ;;  %v7179_v59 = vld [vmem:[%s8983_s11 + $0x20] sm:$0xff] }
 0xbcb   : > { %v2744_v7 = vpop.f32.mrf.mxu0  ;;  %6472 = vmatprep.subr.bf16.mxu0 %v7196_v42  ;;  %v2780_v56 = vpack.c.bf16 %v2696_v2, %v2692_v17 }
 0xbcc   : > { %6453 = vmatpush3.bf16.xpose.msra.mxu1 %v2784_v4  ;;  %v8073_v21 = vadd.f32 %v2744_v7, %v8068_v18  ;;  %v2783_v4 = vpack.c.bf16 %v2641_v48, %v2637_v60  ;;  %v7180_v60 = vld [vmem:[%s8983_s11 + $0x28] sm:$0xff] }
 0xbcd   : > { %v2746_v19 = vpop.f32.mrf.mxu0  ;;  %6454 = vmatprep.subr.bf16.mxu1 %v7196_v42 }
 0xbce   : > { %6473 = vmatpush3.bf16.msra.mxu0 %v2779_v52  ;;  %v2747_v25 = vadd.f32 %v2746_v19, %v2502_v57  ;;  %v2774_v52 = vpack.c.bf16 %v2686_v16, %v2682_v26  ;;  %v2705_v19 = vpop.f32.mrf.mxu1 }
 0xbcf   : > { %v2748_v24 = vpop.f32.mrf.mxu0  ;;  %6474 = vmatprep.subr.bf16.mxu0 %v7196_v42  ;;  %v2706_v8 = vadd.f32 %v2705_v19, %v2498_v36 }
 0xbd0   : > { %v8076_v43 = vadd.f32 %v2748_v24, %v8068_v18  ;;  %v2775_v7 = vpack.c.bf16 %v2747_v25, %v2743_v54 }
 0xbd1   : > { %v2752_v11 = vpop.f32.mrf.mxu0  ;;  %v2786_v31 = vpack.c.bf16 %v2706_v8, %v2702_v28 }
 0xbd2   : > { %v2776_v34 = vpack.c.bf16 %v8076_v43, %v8073_v21  ;;  %6475 = vmatpush3.bf16.msra.mxu0 %v2773_v6  ;;  %v2753_v23 = vadd.f32 %v2752_v11, %v2502_v57 }
 0xbd3   : > { %v2754_v39 = vpop.f32.mrf.mxu0  ;;  %6506 = vmatprep.subr.bf16.mxu0 %v7196_v42 }
 0xbd4   : > { %6455 = vmatpush3.bf16.xpose.msra.mxu1 %v2778_v58  ;;  %v8083_v38 = vadd.f32 %v2754_v39, %v8068_v18  ;;  %v7176_v39 = vld [vmem:[%s8983_s11 + $0x8] sm:$0xff] }
 0xbd5   : > { %v2756_v44 = vpop.f32.mrf.mxu0  ;;  %6456 = vmatprep.subr.bf16.mxu1 %v7196_v42 }
 0xbd6   : > { %v2757_v63 = vadd.f32 %v2756_v44, %v2502_v57 }
 0xbd7   : > { %v2758_v30 = vpop.f32.mrf.mxu0 }
 0xbd8   : > { %v8086_v37 = vadd.f32 %v2758_v30, %v8068_v18  ;;  %v2781_v15 = vpack.c.bf16 %v2757_v63, %v2753_v23 }
 0xbd9   : > { %v2762_v62 = vpop.f32.mrf.mxu0 }
 0xbda   : > { %v2782_v13 = vpack.c.bf16 %v8086_v37, %v8083_v38  ;;  %v2763_v47 = vadd.f32 %v2762_v62, %v2502_v57 }
 0xbdb   : > { %v8092_v55 = vpop.f32.mrf.mxu0 }
 0xbdc   : > { %6457 = vmatpush3.bf16.xpose.msra.mxu1 %v2772_v61  ;;  %v7177_v61 = vld [vmem:[%s8983_s11 + $0x10] sm:$0xff] }
 0xbdd   : > { %v2766_v22 = vpop.f32.mrf.mxu0  ;;  %6488 = vmatprep.subr.bf16.mxu1 %v7196_v42 }
 0xbde   : > { %v2767_v10 = vadd.f32 %v2766_v22, %v2502_v57 }
 0xbe0   : > { %v2787_v20 = vpack.c.bf16 %v2767_v10, %v2763_v47 }
 0xbe3   : > { %6459 = vmatmul.mubr.bf16.vlgmr.msra.gmra.mxu1 %v2771_v53 }
 0xbe4   : > { %6489 = vmatpush3.bf16.xpose.msra.mxu1 %v2787_v20  ;;  %6462 = vmatprep.mubr.msk.bf16.mxu1 %vm7197_vm3, %v7196_v42 }
 0xbe5   : > { %6490 = vmatprep.subr.bf16.mxu1 %v7196_v42 }
 0xbeb   : > { %6463 = vmatmul.mubr.bf16.gmra.mxu1 %v2777_v0 }
 0xbec   : > { %6491 = vmatpush3.bf16.xpose.msra.mxu1 %v2781_v15  ;;  %6466 = vmatprep.mubr.msk.bf16.mxu1 %vm7197_vm3, %v7196_v42 }
 0xbed   : > { %6492 = vmatprep.subr.bf16.mxu1 %v7196_v42 }
 0xbf3   : > { %6467 = vmatmul.mubr.bf16.gmra.mxu1 %v2783_v4 }
 0xbf4   : > { %6493 = vmatpush3.bf16.xpose.msra.mxu1 %v2775_v7  ;;  %6494 = vmatprep.mubr.msk.bf16.mxu1 %vm7197_vm3, %v7196_v42 }
 0xbf5   : > { %6524 = vmatprep.subr.bf16.mxu1 %v7196_v42 }
 0xbfb   : > { %6495 = vmatmul.mubr.bf16.vlgmr.msra.gmra.mxu1 %v2774_v52 }
 0xbfc   : > { %6498 = vmatprep.mubr.msk.bf16.mxu1 %vm7197_vm3, %v7196_v42 }
 0xc03   : > { %6499 = vmatmul.mubr.bf16.gmra.mxu1 %v2780_v56 }
 0xc04   : > { %6502 = vmatprep.mubr.msk.bf16.mxu1 %vm7197_vm3, %v7196_v42 }
 0xc0b   : > { %6503 = vmatmul.mubr.bf16.gmra.mxu1 %v2786_v31 }
 0xc0c   : > { %6540 = vmatprep.mubr.msk.bf16.mxu1 %vm7197_vm3, %v7196_v42 }
 0xca3   : > { %v2823_v40 = vpop.f32.mrf.mxu1 }
 0xca4   : > { %v2846_v24 = vmul.f32 0.25, %v2823_v40 }
 0xca5   : > { %v6460_v6 = vpop.f32.mrf.mxu1 }
 0xca6   : > { %v8129_v49 = vadd.f32 %v7175_v51, %v2846_v24 }
 0xca7   : > { %v2826_v33 = vpop.f32.mrf.mxu1 }
 0xca8   : > { %v2847_v11 = vmul.f32 0.25, %v2826_v33  ;;  %v2858_v58 = vsel %vm855_vm0, %v8129_v49, -inf }
 0xca9   : > { %2859 = vmax.xlane.f32.xlu0 %v2858_v58  ;;  %v6461_v46 = vpop.f32.mrf.mxu1 }
 0xcaa   : > { %v8136_v44 = vadd.f32 %v7176_v39, %v2847_v11 }
 0xcab   : > { %v2831_v50 = vpop.f32.mrf.mxu1 }
 0xcac   : > { %v2848_v30 = vmul.f32 0.25, %v2831_v50  ;;  %v2861_v27 = vsel %vm855_vm0, %v8136_v44, -inf }
 0xcad   : > { %2862 = vmax.xlane.f32.xlu1 %v2861_v27  ;;  %v6464_v62 = vpop.f32.mrf.mxu1 }
 0xcae   : > { %v8143_v35 = vadd.f32 %v7177_v61, %v2848_v30 }
 0xcaf   : > { %v2834_v57 = vpop.f32.mrf.mxu1 }
 0xcb0   : > { %v2849_v32 = vmul.f32 0.25, %v2834_v57  ;;  %v2864_v22 = vsel %vm855_vm0, %v8143_v35, -inf }
 0xcb1   : > { %2865 = vmax.xlane.f32.xlu0 %v2864_v22  ;;  %v6465_v10 = vpop.f32.mrf.mxu1 }
 0xcb2   : > { %v8150_v47 = vadd.f32 %v7178_v14, %v2849_v32 }
 0xcb3   : > { %v2839_v53 = vpop.f32.mrf.mxu1 }
 0xcb4   : > { %v2850_v20 = vmul.f32 0.25, %v2839_v53  ;;  %v2867_v3 = vsel %vm855_vm0, %v8150_v47, -inf }
 0xcb5   : > { %2868 = vmax.xlane.f32.xlu1 %v2867_v3  ;;  %v6468_v63 = vpop.f32.mrf.mxu1 }
 0xcb6   : > { %v8157_v23 = vadd.f32 %v7179_v59, %v2850_v20 }
 0xcb7   : > { %v2842_v0 = vpop.f32.mrf.mxu1 }
 0xcb8   : > { %v2851_v15 = vmul.f32 0.25, %v2842_v0  ;;  %v2870_v48 = vsel %vm855_vm0, %v8157_v23, -inf }
 0xcb9   : > { %2871 = vmax.xlane.f32.xlu0 %v2870_v48  ;;  %v6469_v25 = vpop.f32.mrf.mxu1 }
 0xcba   : > { %v8164_v54 = vadd.f32 %v7180_v60, %v2851_v15 }
 0xcbb   : > { %v3047_v4 = vpop.f32.mrf.mxu1 }
 0xcbc   : > { %v3070_v7 = vmul.f32 0.25, %v3047_v4  ;;  %v2873_v36 = vsel %vm855_vm0, %v8164_v54, -inf }
 0xcbd   : > { %2874 = vmax.xlane.f32.xlu1 %v2873_v36  ;;  %v6496_v16 = vpop.f32.mrf.mxu1 }
 0xcbe   : > { %v8168_v26 = vadd.f32 %v7175_v51, %v3070_v7 }
 0xcbf   : > { %v3050_v52 = vpop.f32.mrf.mxu1 }
 0xcc0   : > { %v3071_v2 = vmul.f32 0.25, %v3050_v52  ;;  %v3082_v17 = vsel %vm855_vm0, %v8168_v26, -inf }
 0xcc1   : > { %3083 = vmax.xlane.f32.xlu0 %v3082_v17  ;;  %v6497_v56 = vpop.f32.mrf.mxu1 }
 0xcc2   : > { %v8172_v19 = vadd.f32 %v7176_v39, %v3071_v2 }
 0xcc3   : > { %v3055_v8 = vpop.f32.mrf.mxu1 }
 0xcc4   : > { %v3072_v28 = vmul.f32 0.25, %v3055_v8  ;;  %v3085_v31 = vsel %vm855_vm0, %v8172_v19, -inf }
 0xcc5   : > { %3086 = vmax.xlane.f32.xlu1 %v3085_v31  ;;  %v6500_v40 = vpop.f32.mrf.mxu1 }
 0xcc6   : > { %v8176_v24 = vadd.f32 %v7177_v61, %v3072_v28 }
 0xcc7   : > { %v3058_v6 = vpop.f32.mrf.mxu1 }
 0xcc8   : > { %v3073_v51 = vmul.f32 0.25, %v3058_v6  ;;  %v3088_v33 = vsel %vm855_vm0, %v8176_v24, -inf }
 0xcc9   : > { %3089 = vmax.xlane.f32.xlu0 %v3088_v33  ;;  %v6501_v11 = vpop.f32.mrf.mxu1 }
 0xcca   : > { %v8180_v58 = vadd.f32 %v7178_v14, %v3073_v51 }
 0xccb   : > { %v3063_v46 = vpop.f32.mrf.mxu1 }
 0xccc   : > { %v3074_v39 = vmul.f32 0.25, %v3063_v46  ;;  %v3091_v50 = vsel %vm855_vm0, %v8180_v58, -inf }
 0xccd   : > { %3092 = vmax.xlane.f32.xlu1 %v3091_v50  ;;  %v6504_v30 = vpop.f32.mrf.mxu1 }
 0xcce   : > { %v8184_v27 = vadd.f32 %v7179_v59, %v3074_v39 }
 0xccf   : > { %v3066_v62 = vpop.f32.mrf.mxu1 }
 0xcd0   : > { %v3075_v61 = vmul.f32 0.25, %v3066_v62  ;;  %v3094_v57 = vsel %vm855_vm0, %v8184_v27, -inf }
 0xcd1   : > { %3095 = vmax.xlane.f32.xlu0 %v3094_v57  ;;  %v6505_v32 = vpop.f32.mrf.mxu1 }
 0xcd2   : > { %v8188_v22 = vadd.f32 %v7180_v60, %v3075_v61 }
 0xcd4   : > { %v3097_v10 = vsel %vm855_vm0, %v8188_v22, -inf }
 0xcd5   : > { %3098 = vmax.xlane.f32.xlu1 %v3097_v10 }
 0xd32   : > { %v2860_v14 = vpop.xlane.xlu0 %2859 }
 0xd33   : > { %v2876_v53 = vsub.f32 %v8129_v49, %v2860_v14 }
 0xd35   : > { %v2882_v20 = vmul.f32 1.442695, %v2876_v53 }
 0xd36   : > { %v2863_v3 = vpop.xlane.xlu1 %2862 }
 0xd37   : > { %7065 = vpow2.f32 %v2882_v20  ;;  %v2877_v63 = vsub.f32 %v8136_v44, %v2863_v3 }
 0xd39   : > { %v2884_v59 = vmul.f32 1.442695, %v2877_v63 }
 0xd3a   : > { %v2866_v0 = vpop.xlane.xlu0 %2865 }
 0xd3b   : > { %7067 = vpow2.f32 %v2884_v59  ;;  %v2878_v15 = vsub.f32 %v8143_v35, %v2866_v0 }
 0xd3d   : > { %v2886_v48 = vmul.f32 1.442695, %v2878_v15 }
 0xd3e   : > { %v2869_v25 = vpop.xlane.xlu1 %2868 }
 0xd3f   : > { %7069 = vpow2.f32 %v2886_v48  ;;  %v2879_v60 = vsub.f32 %v8150_v47, %v2869_v25 }
 0xd41   : > { %v2888_v4 = vmul.f32 1.442695, %v2879_v60 }
 0xd42   : > { %v2872_v7 = vpop.xlane.xlu0 %2871 }
 0xd43   : > { %7071 = vpow2.f32 %v2888_v4  ;;  %v2880_v49 = vsub.f32 %v8157_v23, %v2872_v7 }
 0xd44   : > { %v8197_v36 = vpop.eup %7065 }
 0xd45   : > { %v2890_v16 = vmul.f32 1.442695, %v2880_v49  ;;  %v2894_v44 = vsel %vm855_vm0, %v8197_v36, 0.0 }
 0xd46   : > { %v2875_v52 = vpop.xlane.xlu1 %2874  ;;  %2895 = vadd.xlane.f32.xlu0 %v2894_v44 }
 0xd47   : > { %7073 = vpow2.f32 %v2890_v16  ;;  %v2881_v35 = vsub.f32 %v8164_v54, %v2875_v52  ;;  %v2768_v52 = vpop.f32.mrf.mxu0 }
 0xd48   : > { %v8202_v2 = vpop.eup %7067 }
 0xd49   : > { %v2892_v17 = vmul.f32 1.442695, %v2881_v35  ;;  %v2897_v47 = vsel %vm855_vm0, %v8202_v2, 0.0 }
 0xd4a   : > { %v3084_v56 = vpop.xlane.xlu0 %3083  ;;  %2898 = vadd.xlane.f32.xlu1 %v2897_v47 }
 0xd4b   : > { %7075 = vpow2.f32 %v2892_v17  ;;  %v3100_v23 = vsub.f32 %v8168_v26, %v3084_v56  ;;  %v2769_v56 = vadd.f32 %v2768_v52, %v8068_v18  ;;  %v6881_v52 = vld [vmem:[%s8984_s28 + $0xc8] sm:$0xff]  }
 0xd4c   : > { %v8207_v8 = vpop.eup %7069 }
 0xd4d   : > { %v3106_v28 = vmul.f32 1.442695, %v3100_v23  ;;  %v2900_v31 = vsel %vm855_vm0, %v8207_v8, 0.0 }
 0xd4e   : > { %v3087_v40 = vpop.xlane.xlu1 %3086  ;;  %2901 = vadd.xlane.f32.xlu0 %v2900_v31  ;;  %v2765_v31 = vadd.f32 %v8092_v55, %v8068_v18 }
 0xd4f   : > { %7077 = vpow2.f32 %v3106_v28  ;;  %v3101_v54 = vsub.f32 %v8172_v19, %v3087_v40 }
 0xd50   : > { %v8212_v6 = vpop.eup %7071 }
 0xd51   : > { %v3108_v51 = vmul.f32 1.442695, %v3101_v54  ;;  %v2903_v33 = vsel %vm855_vm0, %v8212_v6, 0.0 }
 0xd52   : > { %v3090_v11 = vpop.xlane.xlu0 %3089  ;;  %2904 = vadd.xlane.f32.xlu1 %v2903_v33 }
 0xd53   : > { %7079 = vpow2.f32 %v3108_v51  ;;  %v3102_v26 = vsub.f32 %v8176_v24, %v3090_v11  ;;  %v2788_v51 = vpack.c.bf16 %v2769_v56, %v2765_v31 }
 0xd54   : > { %v8217_v46 = vpop.eup %7073 }
 0xd55   : > { %v3110_v39 = vmul.f32 1.442695, %v3102_v26  ;;  %v2906_v50 = vsel %vm855_vm0, %v8217_v46, 0.0 }
 0xd56   : > { %v3093_v30 = vpop.xlane.xlu1 %3092  ;;  %2907 = vadd.xlane.f32.xlu0 %v2906_v50 }
 0xd57   : > { %7081 = vpow2.f32 %v3110_v39  ;;  %v3103_v19 = vsub.f32 %v8180_v58, %v3093_v30 }
 0xd58   : > { %v8222_v62 = vpop.eup %7075 }
 0xd59   : > { %v3112_v61 = vmul.f32 1.442695, %v3103_v19  ;;  %v2909_v57 = vsel %vm855_vm0, %v8222_v62, 0.0 }
 0xd5a   : > { %v3096_v32 = vpop.xlane.xlu0 %3095  ;;  %2910 = vadd.xlane.f32.xlu1 %v2909_v57 }
 0xd5b   : > { %7083 = vpow2.f32 %v3112_v61  ;;  %v3104_v24 = vsub.f32 %v8184_v27, %v3096_v32  ;;  %v6868_v32 = vld [vmem:[%s8984_s28 + $0xb0] sm:$0xff]  }
 0xd5c   : > { %v8227_v10 = vpop.eup %7077 }
 0xd5d   : > { %v3114_v14 = vmul.f32 1.442695, %v3104_v24  ;;  %v3118_v53 = vsel %vm855_vm0, %v8227_v10, 0.0 }
 0xd5e   : > { %3119 = vadd.xlane.f32.xlu0 %v3118_v53  ;;  %v3099_v20 = vpop.xlane.xlu1 %3098  ;;  %v6869_v53 = vld [vmem:[%s8984_s28 + $0xa8] sm:$0xff]  }
 0xd5f   : > { %7085 = vpow2.f32 %v3114_v14  ;;  %v3105_v58 = vsub.f32 %v8188_v22, %v3099_v20 }
 0xd60   : > { %v8232_v3 = vpop.eup %7079 }
 0xd61   : > { %v3116_v63 = vmul.f32 1.442695, %v3105_v58  ;;  %v3121_v59 = vsel %vm855_vm0, %v8232_v3, 0.0 }
 0xd62   : > { %3122 = vadd.xlane.f32.xlu1 %v3121_v59 }
 0xd63   : > { %7087 = vpow2.f32 %v3116_v63 }
 0xd64   : > { %v8236_v27 = vpop.eup %7081 }
 0xd65   : > { %v3124_v0 = vsel %vm855_vm0, %v8236_v27, 0.0 }
 0xd66   : > { %3125 = vadd.xlane.f32.xlu0 %v3124_v0  ;;  %v6871_v0 = vld [vmem:[%s8984_s28 + $0x98] sm:$0xff]  }
 0xd68   : > { %v8240_v15 = vpop.eup %7083 }
 0xd69   : > { %v3127_v48 = vsel %vm855_vm0, %v8240_v15, 0.0 }
 0xd6a   : > { %3128 = vadd.xlane.f32.xlu1 %v3127_v48  ;;  %v6872_v48 = vld [vmem:[%s8984_s28 + $0x90] sm:$0xff]  }
 0xd6c   : > { %v8244_v22 = vpop.eup %7085 }
 0xd6d   : > { %v3130_v25 = vsel %vm855_vm0, %v8244_v22, 0.0 }
 0xd6e   : > { %3131 = vadd.xlane.f32.xlu0 %v3130_v25  ;;  %v6874_v25 = vld [vmem:[%s8984_s28 + $0x88] sm:$0xff]  }
 0xd70   : > { %v8248_v60 = vpop.eup %7087 }
 0xd71   : > { %v3133_v4 = vsel %vm855_vm0, %v8248_v60, 0.0 }
 0xd72   : > { %3134 = vadd.xlane.f32.xlu1 %v3133_v4  ;;  %v6876_v4 = vld [vmem:[%s8984_s28 + $0x80] sm:$0xff]  }
 0xdcf   : > { %v2896_v7 = vpop.xlane.xlu0 %2895 }
 0xdd0   : > { %7089 = vrcp.f32 %v2896_v7  ;;  %v6877_v7 = vld [vmem:[%s8984_s28 + $0xe8] sm:$0xff]  }
 0xdd3   : > { %v2899_v49 = vpop.xlane.xlu1 %2898 }
 0xdd4   : > { %7091 = vrcp.f32 %v2899_v49  ;;  %v6878_v49 = vld [vmem:[%s8984_s28 + $0xe0] sm:$0xff]  }
 0xdd7   : > { %v2902_v16 = vpop.xlane.xlu0 %2901 }
 0xdd8   : > { %7093 = vrcp.f32 %v2902_v16  ;;  %v6879_v16 = vld [vmem:[%s8984_s28 + $0xd8] sm:$0xff]  }
 0xddb   : > { %v2905_v44 = vpop.xlane.xlu1 %2904 }
 0xddc   : > { %7095 = vrcp.f32 %v2905_v44  ;;  %v6880_v44 = vld [vmem:[%s8984_s28 + $0xd0] sm:$0xff]  }
 0xddd   : > { %v7090_v35 = vpop.eup %7089 }
 0xdde   : > { %v2918_v23 = vmul.f32 %v7090_v35, %v8197_v36  ;;  %v6882_v35 = vld [vmem:[%s8984_s28 + $0xc0] sm:$0xff]  }
 0xddf   : > { %v2908_v17 = vpop.xlane.xlu0 %2907 }
 0xde0   : > { %7097 = vrcp.f32 %v2908_v17 }
 0xde1   : > { %v7092_v47 = vpop.eup %7091 }
 0xde2   : > { %v2919_v28 = vmul.f32 %v7092_v47, %v8202_v2 }
 0xde3   : > { %v2911_v40 = vpop.xlane.xlu1 %2910 }
 0xde4   : > { %v2924_v54 = vpack.c.bf16 %v2919_v28, %v2918_v23  ;;  %7099 = vrcp.f32 %v2911_v40 }
 0xde5   : > { %v7094_v33 = vpop.eup %7093 }
 0xde6   : > { %6477 = vmatmul.mubr.msk.bf16.vlgmr.msra.gmra.mxu0 %vm855_vm0, %v2924_v54  ;;  %v2920_v2 = vmul.f32 %v7094_v33, %v8207_v8 }
 0xde7   : > { %6507 = vmatpush3.bf16.msra.mxu0 %v2788_v51  ;;  %v3120_v11 = vpop.xlane.xlu0 %3119  ;;  %6480 = vmatprep.mubr.msk.bf16.mxu0 %vm7197_vm3, %v7196_v42 }
 0xde8   : > { %6508 = vmatprep.subr.bf16.mxu0 %v7196_v42  ;;  %7101 = vrcp.f32 %v3120_v11 }
 0xde9   : > { %v7096_v36 = vpop.eup %7095 }
 0xdea   : > { %v2921_v18 = vmul.f32 %v7096_v36, %v8212_v6 }
 0xdeb   : > { %6509 = vmatpush3.bf16.msra.mxu0 %v2782_v13  ;;  %v3123_v55 = vpop.xlane.xlu1 %3122 }
 0xdec   : > { %7103 = vrcp.f32 %v3123_v55  ;;  %6510 = vmatprep.subr.bf16.mxu0 %v7196_v42  ;;  %v2925_v26 = vpack.c.bf16 %v2921_v18, %v2920_v2 }
 0xded   : > { %v7098_v39 = vpop.eup %7097 }
 0xdee   : > { %6481 = vmatmul.mubr.msk.bf16.gmra.mxu0 %vm855_vm0, %v2925_v26  ;;  %v2922_v37 = vmul.f32 %v7098_v39, %v8217_v46  ;;  %v6867_v46 = vld [vmem:[%s8984_s28 + $0xb8] sm:$0xff]  }
 0xdef   : > { %6511 = vmatpush3.bf16.msra.mxu0 %v2776_v34  ;;  %v3126_v50 = vpop.xlane.xlu0 %3125  ;;  %6484 = vmatprep.mubr.msk.bf16.mxu0 %vm7197_vm3, %v7196_v42 }
 0xdf0   : > { %6552 = vmatprep.subr.bf16.mxu0 %v7196_v42  ;;  %7105 = vrcp.f32 %v3126_v50 }
 0xdf1   : > { %v7100_v38 = vpop.eup %7099 }
 0xdf2   : > { %v2923_v13 = vmul.f32 %v7100_v38, %v8222_v62 }
 0xdf3   : > { %v3129_v8 = vpop.xlane.xlu1 %3128 }
 0xdf4   : > { %7107 = vrcp.f32 %v3129_v8  ;;  %v2926_v6 = vpack.c.bf16 %v2923_v13, %v2922_v37 }
 0xdf5   : > { %v7102_v30 = vpop.eup %7101 }
 0xdf6   : > { %6485 = vmatmul.mubr.msk.bf16.gmra.mxu0 %vm855_vm0, %v2926_v6  ;;  %v3142_v34 = vmul.f32 %v7102_v30, %v8227_v10 }
 0xdf7   : > { %v3132_v21 = vpop.xlane.xlu0 %3131  ;;  %6512 = vmatprep.mubr.msk.bf16.mxu0 %vm7197_vm3, %v7196_v42 }
 0xdf8   : > { %7109 = vrcp.f32 %v3132_v21 }
 0xdf9   : > { %v7104_v43 = vpop.eup %7103 }
 0xdfa   : > { %v3143_v19 = vmul.f32 %v7104_v43, %v8232_v3  ;;  %v6870_v3 = vld [vmem:[%s8984_s28 + $0xa0] sm:$0xff]  }
 0xdfb   : > { %v3135_v61 = vpop.xlane.xlu1 %3134 }
 0xdfc   : > { %v3148_v62 = vpack.c.bf16 %v3143_v19, %v3142_v34  ;;  %7111 = vrcp.f32 %v3135_v61 }
 0xdfd   : > { %v7106_v57 = vpop.eup %7105 }
 0xdfe   : > { %6513 = vmatmul.mubr.msk.bf16.vlgmr.msra.gmra.mxu0 %vm855_vm0, %v3148_v62  ;;  %v3144_v10 = vmul.f32 %v7106_v57, %v8236_v27 }
 0xdff   : > { %6516 = vmatprep.mubr.msk.bf16.mxu0 %vm7197_vm3, %v7196_v42  ;;  %6553 = vmatpush3.bf16.msra.mxu0 %v6867_v46 }
 0xe00   : > { %6554 = vmatprep.subr.bf16.mxu0 %v7196_v42 }
 0xe01   : > { %v7108_v24 = vpop.eup %7107 }
 0xe02   : > { %v3145_v14 = vmul.f32 %v7108_v24, %v8240_v15 }
 0xe03   : > { %6555 = vmatpush3.bf16.msra.mxu0 %v6868_v32 }
 0xe04   : > { %v3149_v20 = vpack.c.bf16 %v3145_v14, %v3144_v10  ;;  %6556 = vmatprep.subr.bf16.mxu0 %v7196_v42 }
 0xe05   : > { %v7110_v58 = vpop.eup %7109 }
 0xe06   : > { %6517 = vmatmul.mubr.msk.bf16.gmra.mxu0 %vm855_vm0, %v3149_v20  ;;  %v3146_v59 = vmul.f32 %v7110_v58, %v8244_v22  ;;  %v6873_v22 = vld [vmem:[%s8984_s28 + $0xf8] sm:$0xff]  }
 0xe07   : > { %6520 = vmatprep.mubr.msk.bf16.mxu0 %vm7197_vm3, %v7196_v42  ;;  %6557 = vmatpush3.bf16.msra.mxu0 %v6869_v53 }
 0xe08   : > { %6558 = vmatprep.subr.bf16.mxu0 %v7196_v42  ;;  %6525 = vmatpush3.bf16.msra.mxu1 %v6873_v22  ;;  %v7181_v22 = vld [vmem:[#allocation2] sm:$0xff] }
 0xe09   : > { %v7112_v63 = vpop.eup %7111  ;;  %6526 = vmatprep.subr.bf16.mxu1 %v7196_v42 }
 0xe0a   : > { %v3147_v27 = vmul.f32 %v7112_v63, %v8248_v60  ;;  %v6875_v60 = vld [vmem:[%s8984_s28 + $0xf0] sm:$0xff]  }
 0xe0b   : > { %6559 = vmatpush3.bf16.msra.mxu0 %v6870_v3 }
 0xe0c   : > { %v3150_v15 = vpack.c.bf16 %v3147_v27, %v3146_v59  ;;  %6560 = vmatprep.subr.bf16.mxu0 %v7196_v42  ;;  %6527 = vmatpush3.bf16.msra.mxu1 %v6875_v60 }
 0xe0d   : > { %6528 = vmatprep.subr.bf16.mxu1 %v7196_v42 }
 0xe0e   : > { %6521 = vmatmul.mubr.msk.bf16.gmra.mxu0 %vm855_vm0, %v3150_v15  ;;  %v5886_v15 = vld [vmem:[%s8985_s29 + $0x1] ss:$0 sm:$0xff] }
 0xe0f   : > { %6561 = vmatpush3.bf16.msra.mxu0 %v6871_v0  ;;  %6568 = vmatprep.mubr.msk.bf16.mxu0 %vm7197_vm3, %v7196_v42 }
 0xe10   : > { %6562 = vmatprep.subr.bf16.mxu0 %v7196_v42  ;;  %6529 = vmatpush3.bf16.msra.mxu1 %v6877_v7 }
 0xe11   : > { %6530 = vmatprep.subr.bf16.mxu1 %v7196_v42 }
 0xe13   : > { %6563 = vmatpush3.bf16.msra.mxu0 %v6872_v48 }
 0xe14   : > { %6564 = vmatprep.subr.bf16.mxu0 %v7196_v42  ;;  %6531 = vmatpush3.bf16.msra.mxu1 %v6878_v49 }
 0xe15   : > { %6532 = vmatprep.subr.bf16.mxu1 %v7196_v42 }
 0xe17   : > { %6565 = vmatpush3.bf16.msra.mxu0 %v6874_v25 }
 0xe18   : > { %6566 = vmatprep.subr.bf16.mxu0 %v7196_v42  ;;  %6533 = vmatpush3.bf16.msra.mxu1 %v6879_v16  ;;  %v7182_v16 = vld [vmem:[#allocation2 + $0x8] sm:$0xff] }
 0xe19   : > { %6534 = vmatprep.subr.bf16.mxu1 %v7196_v42 }
 0xe1b   : > { %6567 = vmatpush3.bf16.msra.mxu0 %v6876_v4 }
 0xe1c   : > { %6596 = vmatprep.subr.bf16.mxu0 %v7196_v42  ;;  %6535 = vmatpush3.bf16.msra.mxu1 %v6880_v44 }
 0xe1d   : > { %6536 = vmatprep.subr.bf16.mxu1 %v7196_v42 }
 0xe20   : > { %6537 = vmatpush3.bf16.msra.mxu1 %v6881_v52 }
 0xe21   : > { %6538 = vmatprep.subr.bf16.mxu1 %v7196_v42 }
 0xe24   : > { %6539 = vmatpush3.bf16.msra.mxu1 %v6882_v35 }
 0xe25   : > { %6580 = vmatprep.subr.bf16.mxu1 %v7196_v42 }
 0xea6   : > { %v2970_v17 = vpop.f32.mrf.mxu0 }
 0xea8   : > { %v6478_v47 = vpop.f32.mrf.mxu0 }
 0xeaa   : > { %v2973_v56 = vpop.f32.mrf.mxu0 }
 0xeab   : > { %v2993_v23 = vpack.c.bf16 %v2973_v56, %v2970_v17  ;;  %v7183_v56 = vld [vmem:[#allocation2 + $0x10] sm:$0xff] }
 0xeac   : > { %v6479_v28 = vpop.f32.mrf.mxu0 }
 0xead   : > { %6569 = vmatmul.mubr.bf16.vlgmr.msra.gmra.mxu0 %v2993_v23 }
 0xeae   : > { %v2978_v31 = vpop.f32.mrf.mxu0  ;;  %6572 = vmatprep.mubr.msk.bf16.mxu0 %vm7197_vm3, %v7196_v42 }
 0xeb0   : > { %v6482_v40 = vpop.f32.mrf.mxu0 }
 0xeb2   : > { %v2981_v54 = vpop.f32.mrf.mxu0 }
 0xeb3   : > { %v2994_v51 = vpack.c.bf16 %v2981_v54, %v2978_v31 }
 0xeb4   : > { %v6483_v33 = vpop.f32.mrf.mxu0 }
 0xeb5   : > { %6573 = vmatmul.mubr.bf16.gmra.mxu0 %v2994_v51  ;;  %v7184_v33 = vld [vmem:[#allocation2 + $0x18] sm:$0xff] }
 0xeb6   : > { %v2986_v11 = vpop.f32.mrf.mxu0  ;;  %6576 = vmatprep.mubr.msk.bf16.mxu0 %vm7197_vm3, %v7196_v42 }
 0xeb8   : > { %v6486_v36 = vpop.f32.mrf.mxu0 }
 0xeba   : > { %v2989_v2 = vpop.f32.mrf.mxu0 }
 0xebb   : > { %v2995_v18 = vpack.c.bf16 %v2989_v2, %v2986_v11 }
 0xebc   : > { %v6487_v55 = vpop.f32.mrf.mxu0 }
 0xebd   : > { %6577 = vmatmul.mubr.bf16.gmra.mxu0 %v2995_v18 }
 0xebe   : > { %v3194_v26 = vpop.f32.mrf.mxu0  ;;  %6604 = vmatprep.mubr.msk.bf16.mxu0 %vm7197_vm3, %v7196_v42 }
 0xec0   : > { %v6514_v39 = vpop.f32.mrf.mxu0 }
 0xec2   : > { %v3197_v50 = vpop.f32.mrf.mxu0 }
 0xec3   : > { %v3217_v38 = vpack.c.bf16 %v3197_v50, %v3194_v26  ;;  %v7185_v50 = vld [vmem:[#allocation2 + $0x20] sm:$0xff] }
 0xec4   : > { %v6515_v37 = vpop.f32.mrf.mxu0 }
 0xec5   : > { %6541 = vmatmul.mubr.bf16.vlgmr.msra.gmra.mxu1 %v3217_v38 }
 0xec6   : > { %v3202_v13 = vpop.f32.mrf.mxu0  ;;  %6544 = vmatprep.mubr.msk.bf16.mxu1 %vm7197_vm3, %v7196_v42 }
 0xec8   : > { %v6518_v8 = vpop.f32.mrf.mxu0 }
 0xeca   : > { %v3205_v6 = vpop.f32.mrf.mxu0 }
 0xecb   : > { %v3218_v30 = vpack.c.bf16 %v3205_v6, %v3202_v13 }
 0xecc   : > { %v6519_v21 = vpop.f32.mrf.mxu0 }
 0xecd   : > { %6545 = vmatmul.mubr.bf16.gmra.mxu1 %v3218_v30 }
 0xece   : > { %v3210_v43 = vpop.f32.mrf.mxu0  ;;  %6548 = vmatprep.mubr.msk.bf16.mxu1 %vm7197_vm3, %v7196_v42 }
 0xed0   : > { %v6522_v34 = vpop.f32.mrf.mxu0 }
 0xed2   : > { %v3213_v19 = vpop.f32.mrf.mxu0 }
 0xed3   : > { %v3219_v61 = vpack.c.bf16 %v3213_v19, %v3210_v43  ;;  %v7186_v43 = vld [vmem:[#allocation2 + $0x28] sm:$0xff] }
 0xed4   : > { %v6523_v46 = vpop.f32.mrf.mxu0 }
 0xed5   : > { %6549 = vmatmul.mubr.bf16.gmra.mxu1 %v3219_v61 }
 0xed6   : > { %6584 = vmatprep.mubr.msk.bf16.mxu1 %vm7197_vm3, %v7196_v42 }
 0xf6d   : > { %v3424_v62 = vpop.f32.mrf.mxu0 }
 0xf6f   : > { %v6570_v57 = vpop.f32.mrf.mxu0 }
 0xf71   : > { %v3427_v32 = vpop.f32.mrf.mxu0 }
 0xf73   : > { %v6571_v24 = vpop.f32.mrf.mxu0 }
 0xf75   : > { %v3432_v10 = vpop.f32.mrf.mxu0 }
 0xf77   : > { %v6574_v14 = vpop.f32.mrf.mxu0 }
 0xf79   : > { %v3435_v53 = vpop.f32.mrf.mxu0 }
 0xf7b   : > { %v6575_v20 = vpop.f32.mrf.mxu0 }
 0xf7d   : > { %v3440_v58 = vpop.f32.mrf.mxu0 }
 0xf7f   : > { %v6578_v3 = vpop.f32.mrf.mxu0 }
 0xf81   : > { %v3443_v63 = vpop.f32.mrf.mxu0 }
 0xf83   : > { %v6579_v59 = vpop.f32.mrf.mxu0 }
 0xf85   : > { %v3319_v27 = vpop.f32.mrf.mxu1 }
 0xf86   : > { %v3425_v0 = vadd.f32 %v3424_v62, %v3319_v27 }
 0xf87   : > { %v6542_v48 = vpop.f32.mrf.mxu1 }
 0xf88   : > { %v3447_v25 = vadd.f32 %v7181_v22, %v3425_v0 }
 0xf89   : > { %v3322_v60 = vpop.f32.mrf.mxu1 }
 0xf8a   : > { %v3461_v4 = vadd.f32 %v5886_v15, %v3447_v25  ;;  %v3428_v7 = vadd.f32 %v3427_v32, %v3322_v60 }
 0xf8b   : > { %v6543_v49 = vpop.f32.mrf.mxu1 }
 0xf8c   : > { %3467 = vst.msk [vmem:[#allocation2] sm:$0xff] %vm920_vm2, %v3461_v4  ;;  %v3448_v44 = vadd.f32 %v7182_v16, %v3428_v7 }
 0xf8d   : > { %v3327_v52 = vpop.f32.mrf.mxu1 }
 0xf8e   : > { %v3462_v35 = vadd.f32 %v5886_v15, %v3448_v44  ;;  %v3433_v17 = vadd.f32 %v3432_v10, %v3327_v52 }
 0xf8f   : > { %v6546_v47 = vpop.f32.mrf.mxu1 }
 0xf90   : > { %3468 = vst.msk [vmem:[#allocation2 + $0x8] sm:$0xff] %vm920_vm2, %v3462_v35  ;;  %v3449_v23 = vadd.f32 %v7183_v56, %v3433_v17 }
 0xf91   : > { %v3330_v28 = vpop.f32.mrf.mxu1 }
 0xf92   : > { %v3463_v31 = vadd.f32 %v5886_v15, %v3449_v23  ;;  %v3436_v40 = vadd.f32 %v3435_v53, %v3330_v28 }
 0xf93   : > { %v6547_v54 = vpop.f32.mrf.mxu1  ;;  %v8375_v51 = vld [vmem:[#allocation2] sm:$0xff] }
 0xf94   : > { %3469 = vst.msk [vmem:[#allocation2 + $0x10] sm:$0xff] %vm920_vm2, %v3463_v31  ;;  %v3450_v11 = vadd.f32 %v7184_v33, %v3436_v40  ;;  %v3479_v36 = vsel %vm920_vm2, %v8375_v51, 0.0 }
 0xf95   : > { %3480 = vadd.xlane.f32.xlu0 %v3479_v36  ;;  %v3335_v2 = vpop.f32.mrf.mxu1  ;;  %v6884_v36 = vld [vmem:[%s8986_s3 + $0x10] sm:$0xff]  }
 0xf96   : > { %v3464_v18 = vadd.f32 %v5886_v15, %v3450_v11  ;;  %v3441_v55 = vadd.f32 %v3440_v58, %v3335_v2  ;;  %v6883_v11 = vld [vmem:[%s8986_s3 + $0x18] sm:$0xff]  }
 0xf97   : > { %v6550_v26 = vpop.f32.mrf.mxu1  ;;  %v8380_v39 = vld [vmem:[#allocation2 + $0x8] sm:$0xff]  ;;  %6581 = vmatpush3.bf16.msra.mxu1 %v6883_v11 }
 0xf98   : > { %3470 = vst.msk [vmem:[#allocation2 + $0x18] sm:$0xff] %vm920_vm2, %v3464_v18  ;;  %v3451_v38 = vadd.f32 %v7185_v50, %v3441_v55  ;;  %v3482_v37 = vsel %vm920_vm2, %v8380_v39, 0.0  ;;  %6582 = vmatprep.subr.bf16.mxu1 %v7196_v42 }
 0xf99   : > { %3483 = vadd.xlane.f32.xlu1 %v3482_v37  ;;  %v3338_v13 = vpop.f32.mrf.mxu1 }
 0xf9a   : > { %v3465_v8 = vadd.f32 %v5886_v15, %v3451_v38  ;;  %v3444_v6 = vadd.f32 %v3443_v63, %v3338_v13 }
 0xf9b   : > { %v6551_v30 = vpop.f32.mrf.mxu1  ;;  %v8385_v21 = vld [vmem:[#allocation2 + $0x10] sm:$0xff]  ;;  %6583 = vmatpush3.bf16.msra.mxu1 %v6884_v36 }
 0xf9c   : > { %3471 = vst.msk [vmem:[#allocation2 + $0x20] sm:$0xff] %vm920_vm2, %v3465_v8  ;;  %v3452_v34 = vadd.f32 %v7186_v43, %v3444_v6  ;;  %v3485_v19 = vsel %vm920_vm2, %v8385_v21, 0.0 }
 0xf9d   : > { %3486 = vadd.xlane.f32.xlu0 %v3485_v19 }
 0xf9e   : > { %v3466_v61 = vadd.f32 %v5886_v15, %v3452_v34 }
 0xf9f   : > { %v8390_v46 = vld [vmem:[#allocation2 + $0x18] sm:$0xff] }
 0xfa0   : > { %3472 = vst.msk [vmem:[#allocation2 + $0x28] sm:$0xff] %vm920_vm2, %v3466_v61  ;;  %v3488_v62 = vsel %vm920_vm2, %v8390_v46, 0.0 }
 0xfa1   : > { %3489 = vadd.xlane.f32.xlu1 %v3488_v62 }
 0xfa3   : > { %v8395_v57 = vld [vmem:[#allocation2 + $0x20] sm:$0xff] }
 0xfa4   : > { %v3491_v32 = vsel %vm920_vm2, %v8395_v57, 0.0 }
 0xfa5   : > { %3492 = vadd.xlane.f32.xlu0 %v3491_v32 }
 0xfa7   : > { %v8399_v24 = vld [vmem:[#allocation2 + $0x28] sm:$0xff] }
 0xfa8   : > { %v3494_v10 = vsel %vm920_vm2, %v8399_v24, 0.0 }
 0xfa9   : > { %3495 = vadd.xlane.f32.xlu1 %v3494_v10 }
0x101e   : > { %v3481_v14 = vpop.xlane.xlu0 %3480 }
0x101f   : > { %v3497_v53 = vmul.f32 0.03125, %v3481_v14 }
0x1021   : > { %v3503_v20 = vsub.f32 %v8375_v51, %v3497_v53 }
0x1022   : > { %v3484_v58 = vpop.xlane.xlu1 %3483 }
0x1023   : > { %v3498_v3 = vmul.f32 0.03125, %v3484_v58  ;;  %v3509_v63 = vmul.f32 %v3503_v20, %v3503_v20 }
0x1025   : > { %v3504_v59 = vsub.f32 %v8380_v39, %v3498_v3  ;;  %v3515_v27 = vsel %vm920_vm2, %v3509_v63, 0.0 }
0x1026   : > { %v3487_v0 = vpop.xlane.xlu0 %3486  ;;  %3516 = vadd.xlane.f32.xlu0 %v3515_v27 }
0x1027   : > { %v3499_v15 = vmul.f32 0.03125, %v3487_v0  ;;  %v3510_v48 = vmul.f32 %v3504_v59, %v3504_v59 }
0x1029   : > { %v3505_v22 = vsub.f32 %v8385_v21, %v3499_v15  ;;  %v3518_v25 = vsel %vm920_vm2, %v3510_v48, 0.0 }
0x102a   : > { %v3490_v60 = vpop.xlane.xlu1 %3489  ;;  %3519 = vadd.xlane.f32.xlu1 %v3518_v25 }
0x102b   : > { %v3500_v4 = vmul.f32 0.03125, %v3490_v60  ;;  %v3511_v7 = vmul.f32 %v3505_v22, %v3505_v22 }
0x102d   : > { %v3506_v49 = vsub.f32 %v8390_v46, %v3500_v4  ;;  %v3521_v16 = vsel %vm920_vm2, %v3511_v7, 0.0 }
0x102e   : > { %3522 = vadd.xlane.f32.xlu0 %v3521_v16  ;;  %v3493_v44 = vpop.xlane.xlu0 %3492  ;;  %v6887_v16 = vld [vmem:[%s8934_s13 + $0x28] sm:$0xff]  }
0x102f   : > { %v3501_v52 = vmul.f32 0.03125, %v3493_v44  ;;  %v3512_v35 = vmul.f32 %v3506_v49, %v3506_v49  ;;  %v6888_v44 = vld [vmem:[%s8934_s13 + $0x20] sm:$0xff]  }
0x1031   : > { %v3507_v17 = vsub.f32 %v8395_v57, %v3501_v52  ;;  %v3524_v47 = vsel %vm920_vm2, %v3512_v35, 0.0  ;;  %v5892_v52 = vld [vmem:[%s8933_s12 + $0x1] ss:$0 sm:$0xff] }
0x1032   : > { %3525 = vadd.xlane.f32.xlu1 %v3524_v47  ;;  %v3496_v56 = vpop.xlane.xlu1 %3495 }
0x1033   : > { %v3502_v23 = vmul.f32 0.03125, %v3496_v56  ;;  %v3513_v28 = vmul.f32 %v3507_v17, %v3507_v17 }
0x1035   : > { %v3508_v31 = vsub.f32 %v8399_v24, %v3502_v23  ;;  %v3527_v40 = vsel %vm920_vm2, %v3513_v28, 0.0 }
0x1036   : > { %3528 = vadd.xlane.f32.xlu0 %v3527_v40 }
0x1037   : > { %v3514_v54 = vmul.f32 %v3508_v31, %v3508_v31 }
0x1039   : > { %v3530_v33 = vsel %vm920_vm2, %v3514_v54, 0.0 }
0x103a   : > { %3531 = vadd.xlane.f32.xlu1 %v3530_v33 }
0x10af   : > { %v3517_v2 = vpop.xlane.xlu0 %3516 }
0x10b0   : > { %v3533_v18 = vmul.f32 0.03125, %v3517_v2 }
0x10b2   : > { %v3539_v55 = vadd.f32 1e-05, %v3533_v18 }
0x10b3   : > { %v3520_v26 = vpop.xlane.xlu1 %3519 }
0x10b4   : > { %v3534_v50 = vmul.f32 0.03125, %v3520_v26  ;;  %7113 = vrsqrt.f32 %v3539_v55 }
0x10b6   : > { %v3540_v38 = vadd.f32 1e-05, %v3534_v50 }
0x10b7   : > { %v3523_v37 = vpop.xlane.xlu0 %3522 }
0x10b8   : > { %7115 = vrsqrt.f32 %v3540_v38  ;;  %v3535_v13 = vmul.f32 0.03125, %v3523_v37 }
0x10ba   : > { %v3541_v8 = vadd.f32 1e-05, %v3535_v13 }
0x10bb   : > { %v3526_v6 = vpop.xlane.xlu1 %3525 }
0x10bc   : > { %v3536_v30 = vmul.f32 0.03125, %v3526_v6  ;;  %7117 = vrsqrt.f32 %v3541_v8 }
0x10be   : > { %v3542_v43 = vadd.f32 1e-05, %v3536_v30 }
0x10bf   : > { %v3529_v34 = vpop.xlane.xlu0 %3528 }
0x10c0   : > { %7119 = vrsqrt.f32 %v3542_v43  ;;  %v3537_v19 = vmul.f32 0.03125, %v3529_v34 }
0x10c1   : > { %v7114_v62 = vpop.eup %7113 }
0x10c2   : > { %v3543_v61 = vadd.f32 1e-05, %v3537_v19  ;;  %v3551_v53 = vmul.f32 %v7114_v62, %v3503_v20 }
0x10c3   : > { %v3532_v32 = vpop.xlane.xlu1 %3531 }
0x10c4   : > { %v3538_v10 = vmul.f32 0.03125, %v3532_v32  ;;  %7121 = vrsqrt.f32 %v3543_v61 }
0x10c5   : > { %v7116_v14 = vpop.eup %7115 }
0x10c6   : > { %v3552_v58 = vmul.f32 %v7116_v14, %v3504_v59  ;;  %v3544_v3 = vadd.f32 1e-05, %v3538_v10 }
0x10c8   : > { %v3562_v63 = vpack.c.bf16 %v3552_v58, %v3551_v53  ;;  %7123 = vrsqrt.f32 %v3544_v3 }
0x10c9   : > { %v7118_v27 = vpop.eup %7117 }
0x10ca   : > { %6585 = vmatmul.mubr.msk.bf16.vlgmr.msra.gmra.mxu1 %vm920_vm2, %v3562_v63  ;;  %v3553_v15 = vmul.f32 %v7118_v27, %v3505_v22  ;;  %v6885_v22 = vld [vmem:[%s8934_s13 + $0x38] sm:$0xff]  }
0x10cb   : > { %6588 = vmatprep.mubr.msk.bf16.mxu1 %vm7197_vm3, %v7196_v42  ;;  %6597 = vmatpush3.bf16.msra.mxu0 %v6885_v22 }
0x10cc   : > { %6598 = vmatprep.subr.bf16.mxu0 %v7196_v42 }
0x10cd   : > { %v7120_v0 = vpop.eup %7119 }
0x10ce   : > { %v3554_v48 = vmul.f32 %v7120_v0, %v3506_v49  ;;  %v6886_v49 = vld [vmem:[%s8934_s13 + $0x30] sm:$0xff]  }
0x10cf   : > { %6599 = vmatpush3.bf16.msra.mxu0 %v6886_v49 }
0x10d0   : > { %v3563_v25 = vpack.c.bf16 %v3554_v48, %v3553_v15  ;;  %6600 = vmatprep.subr.bf16.mxu0 %v7196_v42 }
0x10d1   : > { %v7122_v60 = vpop.eup %7121 }
0x10d2   : > { %6589 = vmatmul.mubr.msk.bf16.gmra.mxu1 %vm920_vm2, %v3563_v25  ;;  %v3555_v59 = vmul.f32 %v7122_v60, %v3507_v17 }
0x10d3   : > { %6592 = vmatprep.mubr.msk.bf16.mxu1 %vm7197_vm3, %v7196_v42  ;;  %6601 = vmatpush3.bf16.msra.mxu0 %v6887_v16 }
0x10d4   : > { %6602 = vmatprep.subr.bf16.mxu0 %v7196_v42 }
0x10d5   : > { %v7124_v20 = vpop.eup %7123 }
0x10d6   : > { %v3556_v4 = vmul.f32 %v7124_v20, %v3508_v31 }
0x10d7   : > { %6603 = vmatpush3.bf16.msra.mxu0 %v6888_v44 }
0x10d8   : > { %v3564_v7 = vpack.c.bf16 %v3556_v4, %v3555_v59 }
0x10da   : > { %6593 = vmatmul.mubr.msk.bf16.gmra.mxu1 %vm920_vm2, %v3564_v7 }
0x10db   : > { %4008 = vmatprep.mubr.bf16.mxu1 %v7195_v12 }
0x118a   : > { %v3628_v35 = vpop.f32.mrf.mxu1 }
0x118b   : > { %v3629_v17 = vadd.f32 %v5892_v52, %v3628_v35 }
0x118c   : > { %v6586_v47 = vpop.f32.mrf.mxu1 }
0x118d   : > { %v3657_v56 = vmul.f32 0.044715, %v3629_v17  ;;  %v3651_v47 = vmul.f32 0.5, %v3629_v17 }
0x118e   : > { %v3631_v23 = vpop.f32.mrf.mxu1 }
0x118f   : > { %v3663_v28 = vmul.f32 %v3657_v56, %v3629_v17  ;;  %v3632_v31 = vadd.f32 %v5892_v52, %v3631_v23 }
0x1190   : > { %v6587_v40 = vpop.f32.mrf.mxu1 }
0x1191   : > { %v3669_v54 = vmul.f32 %v3663_v28, %v3629_v17  ;;  %v3658_v33 = vmul.f32 0.044715, %v3632_v31  ;;  %v3652_v56 = vmul.f32 0.5, %v3632_v31 }
0x1192   : > { %v3636_v11 = vpop.f32.mrf.mxu1 }
0x1193   : > { %v3675_v36 = vadd.f32 %v3669_v54, %v3629_v17  ;;  %v3664_v2 = vmul.f32 %v3658_v33, %v3632_v31  ;;  %v3637_v18 = vadd.f32 %v5892_v52, %v3636_v11 }
0x1194   : > { %v6590_v55 = vpop.f32.mrf.mxu1 }
0x1195   : > { %v3681_v26 = vmul.f32 0.7978846, %v3675_v36  ;;  %v3670_v50 = vmul.f32 %v3664_v2, %v3632_v31  ;;  %v3659_v38 = vmul.f32 0.044715, %v3637_v18  ;;  %v3653_v2 = vmul.f32 0.5, %v3637_v18 }
0x1196   : > { %v3639_v37 = vpop.f32.mrf.mxu1 }
0x1197   : > { %7125 = vtanh.f32 %v3681_v26  ;;  %v3676_v13 = vadd.f32 %v3670_v50, %v3632_v31  ;;  %v3665_v8 = vmul.f32 %v3659_v38, %v3637_v18  ;;  %v3640_v6 = vadd.f32 %v5892_v52, %v3639_v37 }
0x1198   : > { %v6591_v30 = vpop.f32.mrf.mxu1 }
0x1199   : > { %v3682_v43 = vmul.f32 0.7978846, %v3676_v13  ;;  %v3671_v34 = vmul.f32 %v3665_v8, %v3637_v18  ;;  %v3660_v19 = vmul.f32 0.044715, %v3640_v6  ;;  %v3654_v55 = vmul.f32 0.5, %v3640_v6 }
0x119a   : > { %v3644_v61 = vpop.f32.mrf.mxu1 }
0x119b   : > { %7127 = vtanh.f32 %v3682_v43  ;;  %v3677_v62 = vadd.f32 %v3671_v34, %v3637_v18  ;;  %v3666_v32 = vmul.f32 %v3660_v19, %v3640_v6  ;;  %v3645_v10 = vadd.f32 %v5892_v52, %v3644_v61 }
0x119c   : > { %v6594_v14 = vpop.f32.mrf.mxu1 }
0x119d   : > { %v3683_v53 = vmul.f32 0.7978846, %v3677_v62  ;;  %v3672_v58 = vmul.f32 %v3666_v32, %v3640_v6  ;;  %v3661_v3 = vmul.f32 0.044715, %v3645_v10  ;;  %v3655_v8 = vmul.f32 0.5, %v3645_v10 }
0x119e   : > { %v3647_v63 = vpop.f32.mrf.mxu1 }
0x119f   : > { %7129 = vtanh.f32 %v3683_v53  ;;  %v3678_v27 = vadd.f32 %v3672_v58, %v3640_v6  ;;  %v3667_v0 = vmul.f32 %v3661_v3, %v3645_v10  ;;  %v3648_v15 = vadd.f32 %v5892_v52, %v3647_v63  ;;  %v5914_v6 = vld [vmem:[%s8935_s14 + $0x1] ss:$0 sm:$0xff] }
0x11a0   : > { %v6595_v48 = vpop.f32.mrf.mxu1 }
0x11a1   : > { %v3684_v25 = vmul.f32 0.7978846, %v3678_v27  ;;  %v3673_v60 = vmul.f32 %v3667_v0, %v3645_v10  ;;  %v3662_v20 = vmul.f32 0.044715, %v3648_v15  ;;  %v3656_v30 = vmul.f32 0.5, %v3648_v15 }
0x11a3   : > { %7131 = vtanh.f32 %v3684_v25  ;;  %v3679_v59 = vadd.f32 %v3673_v60, %v3645_v10  ;;  %v3668_v4 = vmul.f32 %v3662_v20, %v3648_v15 }
0x11a4   : > { %v7126_v7 = vpop.eup %7125 }
0x11a5   : > { %v3685_v22 = vmul.f32 0.7978846, %v3679_v59  ;;  %v3674_v49 = vmul.f32 %v3668_v4, %v3648_v15  ;;  %v3693_v16 = vadd.f32 1.0, %v7126_v7 }
0x11a7   : > { %7133 = vtanh.f32 %v3685_v22  ;;  %v3680_v44 = vadd.f32 %v3674_v49, %v3648_v15  ;;  %v3699_v40 = vmul.f32 %v3693_v16, %v3651_v47  ;;  %v5915_v47 = vld [vmem:[%s8937_s16] ss:$0 sm:$0xff] }
0x11a8   : > { %v7128_v35 = vpop.eup %7127 }
0x11a9   : > { %v3694_v23 = vadd.f32 1.0, %v7128_v35  ;;  %v3686_v28 = vmul.f32 0.7978846, %v3680_v44  ;;  %v3839_v44 = vld [vmem:[%s8936_s15] sm:$0x3] }
0x11ab   : > { %v3700_v52 = vmul.f32 %v3694_v23, %v3652_v56  ;;  %7135 = vtanh.f32 %v3686_v28 }
0x11ac   : > { %v7130_v54 = vpop.eup %7129 }
0x11ad   : > { %v3714_v33 = vpack.c.bf16 %v3700_v52, %v3699_v40  ;;  %v3695_v11 = vadd.f32 1.0, %v7130_v54  ;;  %v6889_v52 = vld [vmem:[%s8938_s17 + $0x30] ss:$24 sps:$4 sm:$0xff]   ;;  %v6891_v54 = vld [vmem:[%s8938_s17 + $0x34] ss:$24 sps:$4 sm:$0xff]  }
0x11ae   : > { %3988 = vmatprep.subr.bf16.mxu1 %v6891_v54 }
0x11af   : > { %6605 = vmatmul.mubr.msk.bf16.vlgmr.msra.gmra.mxu0 %vm2288_vm4, %v3714_v33  ;;  %v3701_v50 = vmul.f32 %v3695_v11, %v3653_v2  ;;  %3989 = vmatpush1.bf16.msra.mxu1 %v6889_v52 }
0x11b0   : > { %v7132_v36 = vpop.eup %7131  ;;  %6608 = vmatprep.mubr.msk.bf16.mxu0 %vm7197_vm3, %v7196_v42 }
0x11b1   : > { %v3696_v26 = vadd.f32 1.0, %v7132_v36 }
0x11b3   : > { %v3702_v17 = vmul.f32 %v3696_v26, %v3654_v55  ;;  %v6894_v26 = vld [vmem:[%s8938_s17 + $0x44] ss:$24 sps:$4 sm:$0xff]  }
0x11b4   : > { %v7134_v31 = vpop.eup %7133  ;;  %4070 = vmatprep.subr.bf16.mxu0 %v6894_v26 }
0x11b5   : > { %v3715_v38 = vpack.c.bf16 %v3702_v17, %v3701_v50  ;;  %v3697_v37 = vadd.f32 1.0, %v7134_v31  ;;  %v6892_v50 = vld [vmem:[%s8938_s17 + $0x40] ss:$24 sps:$4 sm:$0xff]   ;;  %v6897_v17 = vld [vmem:[%s8938_s17 + $0x4] ss:$24 sps:$4 sm:$0xff]  }
0x11b6   : > { %4071 = vmatpush1.bf16.msra.mxu0 %v6892_v50  ;;  %v6900_v31 = vld [vmem:[%s8938_s17 + $0x14] ss:$24 sps:$4 sm:$0xff]   ;;  %3990 = vmatprep.subr.bf16.mxu1 %v6897_v17 }
0x11b7   : > { %6609 = vmatmul.mubr.msk.bf16.gmra.mxu0 %vm2288_vm4, %v3715_v38  ;;  %v3703_v34 = vmul.f32 %v3697_v37, %v3655_v8  ;;  %v6895_v38 = vld [vmem:[%s8938_s17] ss:$24 sps:$4 sm:$0xff]   ;;  %v6898_v37 = vld [vmem:[%s8938_s17 + $0x10] ss:$24 sps:$4 sm:$0xff]   ;;  %4072 = vmatprep.subr.bf16.mxu0 %v6900_v31 }
0x11b8   : > { %v7136_v13 = vpop.eup %7135  ;;  %6612 = vmatprep.mubr.msk.bf16.mxu0 %vm7197_vm3, %v7196_v42  ;;  %3991 = vmatpush1.bf16.msra.mxu1 %v6895_v38 }
0x11b9   : > { %v3698_v43 = vadd.f32 1.0, %v7136_v13  ;;  %v6903_v13 = vld [vmem:[%s8938_s17 + $0x3c] ss:$24 sps:$4 sm:$0xff]  }
0x11ba   : > { %4073 = vmatpush1.bf16.msra.mxu0 %v6898_v37  ;;  %4029 = vmatprep.subr.bf16.mxu1 %v6903_v13 }
0x11bb   : > { %v3704_v19 = vmul.f32 %v3698_v43, %v3656_v30  ;;  %6622 = vmatprep.subr.bf16.mxu0 %v7196_v42 }
0x11bd   : > { %v3716_v61 = vpack.c.bf16 %v3704_v19, %v3703_v34 }
0x11bf   : > { %6613 = vmatmul.mubr.msk.bf16.gmra.mxu0 %vm2288_vm4, %v3716_v61  ;;  %v6901_v61 = vld [vmem:[%s8938_s17 + $0x38] ss:$24 sps:$4 sm:$0xff]  }
0x11c0   : > { %4090 = vmatprep.mubr.bf16.mxu0 %v7195_v12 }
0x126f   : > { %v3784_v18 = vpop.f32.mrf.mxu0 }
0x1270   : > { %v3807_v62 = vadd.f32 %v3784_v18, %v8375_v51 }
0x1271   : > { %v6606_v32 = vpop.f32.mrf.mxu0 }
0x1272   : > { %v3821_v14 = vadd.f32 %v5914_v6, %v3807_v62  ;;  %v6904_v62 = vld [vmem:[%s8938_s17 + $0x8] ss:$24 sps:$4 sm:$0xff]  }
0x1273   : > { %v3787_v53 = vpop.f32.mrf.mxu0  ;;  %v8534_v32 = vld [vmem:[%s8939_s18] sm:$0x3f] }
0x1274   : > { %3827 = vst.msk [vmem:[#allocation2] sm:$0xff] %vm920_vm2, %v3821_v14  ;;  %v3808_v10 = vadd.f32 %v3787_v53, %v8380_v39  ;;  %v3890_v14 = vrot.slane %v8534_v32, %v7515_v9 }
0x1275   : > { %v6607_v58 = vpop.f32.mrf.mxu0 }
0x1276   : > { %v3822_v3 = vadd.f32 %v5914_v6, %v3808_v10 }
0x1277   : > { %v3792_v63 = vpop.f32.mrf.mxu0 }
0x1278   : > { %3828 = vst.msk [vmem:[#allocation2 + $0x8] sm:$0xff] %vm920_vm2, %v3822_v3  ;;  %v3809_v27 = vadd.f32 %v3792_v63, %v8385_v21 }
0x1279   : > { %v6610_v0 = vpop.f32.mrf.mxu0 }
0x127a   : > { %v3823_v15 = vadd.f32 %v5914_v6, %v3809_v27  ;;  %v3886_v27 = vrot.slane %v8534_v32, %v7539_v41 }
0x127b   : > { %v3795_v48 = vpop.f32.mrf.mxu0 }
0x127c   : > { %3829 = vst.msk [vmem:[#allocation2 + $0x10] sm:$0xff] %vm920_vm2, %v3823_v15  ;;  %v3810_v51 = vadd.f32 %v3795_v48, %v8390_v46  ;;  %v3902_v48 = vrot.slane %v8534_v32, %v7545_v45 }
0x127d   : > { %v6611_v25 = vpop.f32.mrf.mxu0 }
0x127e   : > { %v3824_v60 = vadd.f32 %v5914_v6, %v3810_v51  ;;  %v3894_v25 = vrot.slane %v8534_v32, %v7505_v5 }
0x127f   : > { %v3800_v20 = vpop.f32.mrf.mxu0 }
0x1280   : > { %3830 = vst.msk [vmem:[#allocation2 + $0x18] sm:$0xff] %vm920_vm2, %v3824_v60  ;;  %v3811_v39 = vadd.f32 %v3800_v20, %v8395_v57 }
0x1281   : > { %v6614_v59 = vpop.f32.mrf.mxu0 }
0x1282   : > { %v3825_v4 = vadd.f32 %v5914_v6, %v3811_v39 }
0x1283   : > { %v3803_v7 = vpop.f32.mrf.mxu0  ;;  %v3833_v35 = vld [vmem:[#allocation2 + $0x10] sm:$0x1] }
0x1284   : > { %3831 = vst.msk [vmem:[#allocation2 + $0x20] sm:$0xff] %vm920_vm2, %v3825_v4  ;;  %v3812_v21 = vadd.f32 %v3803_v7, %v8399_v24 }
0x1285   : > { %v6615_v22 = vpop.f32.mrf.mxu0 }
0x1286   : > { %v3826_v49 = vadd.f32 %v5914_v6, %v3812_v21  ;;  %v6906_v6 = vld [vmem:[%s8938_s17 + $0xc] ss:$24 sps:$4 sm:$0xff]  }
0x1288   : > { %3832 = vst.msk [vmem:[#allocation2 + $0x28] sm:$0xff] %vm920_vm2, %v3826_v49 }
0x128f   : > { %v3834_v16 = vld [vmem:[#allocation2 + $0x28] sm:$0x1] }
0x1290   : > { %v3836_v46 = vrot.slane %v3834_v16, 7  ;;  %v3898_v16 = vrot.slane %v8534_v32, %v7566_v1 }
0x1292   : > { %v3838_v57 = vsel %vm916_vm1, %v3833_v35, %v3836_v46 }
0x1293   : > { %v3840_v56 = vadd.f32 %v3839_v44, %v3838_v57 }
0x1295   : > { %v3849_v24 = vsel %vm3848_vm5, %v3840_v56, %v5915_v47 }
0x1296   : > { %v3851_v23 = vsel %vm3850_vm6, %v3849_v24, 0.0  ;;  %v8559_v24 = vld [vmem:[%s8987_s6] sm:$0xff] }
0x1297   : > { %3852 = vst.msk [vmem:[#allocation2] sm:$0xff] %vm920_vm2, %v3851_v23 }
0x129e   : > { %v8479_v28 = vld [vmem:[#allocation2] sm:$0xff] }
0x129f   : > { %v3855_v40 = vsel %vm920_vm2, %v8479_v28, 0.0 }
0x12a0   : > { %3856 = vadd.xlane.f32.xlu0 %v3855_v40 }
0x1329   : > { %v3857_v33 = vpop.xlane.xlu0 %3856 }
0x132a   : > { %v3858_v11 = vmul.f32 0.03125, %v3857_v33 }
0x132c   : > { %v3859_v36 = vsub.f32 %v8479_v28, %v3858_v11 }
0x132e   : > { %v3860_v2 = vmul.f32 %v3859_v36, %v3859_v36 }
0x1330   : > { %v3861_v55 = vsel %vm920_vm2, %v3860_v2, 0.0 }
0x1331   : > { %3862 = vadd.xlane.f32.xlu1 %v3861_v55 }
0x13ba   : > { %v3863_v8 = vpop.xlane.xlu1 %3862 }
0x13bb   : > { %v3864_v30 = vmul.f32 0.03125, %v3863_v8 }
0x13bd   : > { %v3865_v43 = vadd.f32 1e-05, %v3864_v30 }
0x13bf   : > { %7137 = vrsqrt.f32 %v3865_v43 }
0x13cc   : > { %v7138_v34 = vpop.eup %7137 }
0x13cd   : > { %v3867_v19 = vmul.f32 %v7138_v34, %v3859_v36 }
0x13cf   : > { %v3880_v18 = vpack.c.bf16 %v3867_v19, %v3867_v19 }
0x13d1   : > { %5928 = vmatmul.mubr.msk.bf16.vlgmr.msra.gmra.mxu1 %vm920_vm2, %v3880_v18  ;;  %5930 = vmatmul.mubr.msk.bf16.vlgmr.msra.gmra.mxu0 %vm920_vm2, %v3880_v18 }
0x13d2   : > { %4030 = vmatpush1.bf16.msra.mxu1 %v6901_v61  ;;  %4049 = vmatprep.mubr.bf16.mxu1 %v7195_v12 }
0x13d3   : > { %4031 = vmatprep.subr.bf16.mxu1 %v6906_v6  ;;  %6624 = vmatprep.mubr.msk.bf16.mxu0 %vm7197_vm3, %v7196_v42 }
0x13d6   : > { %4032 = vmatpush1.bf16.msra.mxu1 %v6904_v62  ;;  %v6909_v62 = vld [vmem:[%s8940_s19 + $0x78] sm:$0xff]  }
0x13d7   : > { %6616 = vmatprep.subr.bf16.mxu1 %v7196_v42 }
0x13d9   : > { %5929 = vmatmul.mubr.msk.bf16.vlgmr.msra.gmra.mxu1 %vm920_vm2, %v3880_v18 }
0x13da   : > { %6618 = vmatprep.mubr.msk.bf16.mxu1 %vm7197_vm3, %v7196_v42 }
0x1491   : > { %v4010_v53 = vpop.f32.mrf.mxu1  ;;  %v4092_v10 = vpop.f32.mrf.mxu0 }
0x1492   : > { %v4011_v39 = vadd.f32 %v4010_v53, %v3886_v27  ;;  %v4093_v4 = vadd.f32 %v4092_v10, %v3902_v48  ;;  %v6913_v53 = vld [vmem:[%s8940_s19 + $0x68] sm:$0xff]   ;;  %v6915_v10 = vld [vmem:[%s8940_s19 + $0x60] sm:$0xff]   ;;  %v3906_v27 = vrot.slane %v8534_v32, %v7713_v29 }
0x1493   : > { %v4012_v58 = vpop.f32.mrf.mxu1  ;;  %v8538_v3 = vpop.f32.mrf.mxu0 }
0x1494   : > { %v4013_v63 = vadd.f32 %v4012_v58, %v3890_v14  ;;  %v4099_v49 = vpack.c.bf16 %v4011_v39, %v4011_v39  ;;  %v4103_v44 = vpack.c.bf16 %v4093_v4, %v4093_v4  ;;  %v6911_v14 = vld [vmem:[%s8940_s19 + $0x70] sm:$0xff]   ;;  %v6917_v58 = vld [vmem:[%s8940_s19 + $0x58] sm:$0xff]  }
0x1495   : > { %v4014_v0 = vpop.f32.mrf.mxu1  ;;  %v4096_v15 = vpop.f32.mrf.mxu0  ;;  %v6908_v4 = vld [vmem:[%s8940_s19 + $0x30] sm:$0xff]  }
0x1496   : > { %v4100_v51 = vpack.c.bf16 %v4013_v63, %v4013_v63  ;;  %v4095_v15 = vadd.f32 %v8538_v3, %v3906_v27  ;;  %v6907_v3 = vld [vmem:[%s8940_s19 + $0x38] sm:$0xff]  }
0x1497   : > { %v4015_v60 = vpop.f32.mrf.mxu1  ;;  %v4097_v20 = vpop.f32.mrf.mxu0 }
0x1498   : > { %6617 = vmatpush3.bf16.xpose.msra.mxu1 %v4100_v51  ;;  %v4104_v51 = vpack.c.bf16 %v4095_v15, %v4095_v15 }
0x1499   : > { %v4051_v59 = vpop.f32.mrf.mxu1  ;;  %6628 = vmatprep.subr.bf16.mxu1 %v7196_v42 }
0x149a   : > { %v4052_v7 = vadd.f32 %v4051_v59, %v3894_v25  ;;  %v4282_v20 = vsel %vm4163_vm7, %v4104_v51, 0  ;;  %v6925_v51 = vld [vmem:[%s8944_s23 + $0x18] sm:$0xff]  }
0x149b   : > { %v4053_v21 = vpop.f32.mrf.mxu1 }
0x149c   : > { %v4101_v22 = vpack.c.bf16 %v4052_v7, %v4052_v7  ;;  %v4054_v47 = vadd.f32 %v4053_v21, %v3898_v16  ;;  %v6910_v7 = vld [vmem:[%s8940_s19 + $0x28] sm:$0xff]   ;;  %v6912_v21 = vld [vmem:[%s8940_s19 + $0x20] sm:$0xff]  }
0x149d   : > { %v4055_v46 = vpop.f32.mrf.mxu1  ;;  %v6918_v16 = vld [vmem:[%s8940_s19 + $0x8] sm:$0xff]  }
0x149e   : > { %v4165_v35 = vsel %vm4163_vm7, %v4101_v22, 0  ;;  %v4102_v56 = vpack.c.bf16 %v4054_v47, %v4054_v47  ;;  %v6914_v22 = vld [vmem:[%s8940_s19 + $0x18] sm:$0xff]   ;;  %v6919_v46 = vld [vmem:[%s8940_s19 + $0x50] sm:$0xff]  }
0x149f   : > { %v4056_v57 = vpop.f32.mrf.mxu1  ;;  %6619 = vmatmul.mubr.bf16.vlgmr.msra.gmra.mxu1 %v4099_v49  ;;  %6623 = vmatpush3.bf16.msra.mxu0 %v4165_v35  ;;  %v6916_v49 = vld [vmem:[%s8940_s19 + $0x10] sm:$0xff]   ;;  %v6921_v35 = vld [vmem:[%s8940_s19 + $0x48] sm:$0xff]  }
0x14a0   : > { %6629 = vmatpush3.bf16.xpose.msra.mxu1 %v4103_v44  ;;  %6630 = vmatprep.mubr.msk.bf16.mxu1 %vm7197_vm3, %v7196_v42  ;;  %v6920_v44 = vld [vmem:[%s8940_s19] sm:$0xff]  }
0x14a1   : > { %6634 = vmatprep.subr.bf16.mxu0 %v7196_v42  ;;  %6640 = vmatprep.subr.bf16.mxu1 %v7196_v42  ;;  %v6922_v57 = vld [vmem:[%s8940_s19 + $0x40] sm:$0xff]  }
0x14a7   : > { %6631 = vmatmul.mubr.bf16.vlgmr.msra.gmra.mxu1 %v4102_v56 }
0x14a8   : > { %6656 = vmatprep.mubr.msk.bf16.mxu1 %vm7197_vm3, %v7196_v42  ;;  %6641 = vmatpush3.bf16.msra.mxu1 %v6909_v62 }
0x14a9   : > { %6642 = vmatprep.subr.bf16.mxu1 %v7196_v42 }
0x14ac   : > { %6643 = vmatpush3.bf16.msra.mxu1 %v6911_v14 }
0x14ad   : > { %6644 = vmatprep.subr.bf16.mxu1 %v7196_v42 }
0x14b0   : > { %6645 = vmatpush3.bf16.msra.mxu1 %v6913_v53 }
0x14b1   : > { %6646 = vmatprep.subr.bf16.mxu1 %v7196_v42 }
0x14b4   : > { %6647 = vmatpush3.bf16.msra.mxu1 %v6915_v10  ;;  %v6924_v10 = vld [vmem:[%s8942_s21] sm:$0xff]  }
0x14b5   : > { %6648 = vmatprep.subr.bf16.mxu1 %v7196_v42 }
0x14b8   : > { %6649 = vmatpush3.bf16.msra.mxu1 %v6917_v58 }
0x14b9   : > { %6650 = vmatprep.subr.bf16.mxu1 %v7196_v42 }
0x14bc   : > { %6651 = vmatpush3.bf16.msra.mxu1 %v6919_v46 }
0x14bd   : > { %6652 = vmatprep.subr.bf16.mxu1 %v7196_v42 }
0x14c0   : > { %6653 = vmatpush3.bf16.msra.mxu1 %v6921_v35 }
0x14c1   : > { %6654 = vmatprep.subr.bf16.mxu1 %v7196_v42 }
0x14c4   : > { %6655 = vmatpush3.bf16.msra.mxu1 %v6922_v57 }
0x14c5   : > { %6680 = vmatprep.subr.bf16.mxu1 %v7196_v42 }
0x155f   : > { %v4139_v23 = vpop.f32.mrf.mxu1 }
0x1560   : > { %v4145_v40 = vmul.f32 0.25, %v4139_v23 }
0x1561   : > { %v6620_v52 = vpop.f32.mrf.mxu1 }
0x1562   : > { %v4146_v54 = vadd.f32 %v4145_v40, %v8559_v24 }
0x1563   : > { %v4142_v33 = vpop.f32.mrf.mxu1 }
0x1564   : > { %v4148_v11 = vsel %vm4147_vm8, %v4146_v54, -inf }
0x1565   : > { %4149 = vmax.xlane.f32.xlu0 %v4148_v11  ;;  %v6621_v36 = vpop.f32.mrf.mxu1 }
0x1567   : > { %v4258_v2 = vpop.f32.mrf.mxu1 }
0x1568   : > { %v4264_v55 = vmul.f32 0.25, %v4258_v2 }
0x1569   : > { %v6632_v26 = vpop.f32.mrf.mxu1 }
0x156a   : > { %v4265_v50 = vadd.f32 %v4264_v55, %v8559_v24 }
0x156b   : > { %v4261_v17 = vpop.f32.mrf.mxu1 }
0x156c   : > { %v4266_v31 = vsel %vm4147_vm8, %v4265_v50, -inf }
0x156d   : > { %4267 = vmax.xlane.f32.xlu1 %v4266_v31  ;;  %v6633_v38 = vpop.f32.mrf.mxu1 }
0x15ee   : > { %v4150_v37 = vpop.xlane.xlu0 %4149 }
0x15ef   : > { %v4151_v13 = vsub.f32 %v4146_v54, %v4150_v37  ;;  %v5965_v37 = vld [vmem:[%s8941_s20] ss:$0 sm:$0xff] }
0x15f1   : > { %v4152_v8 = vmul.f32 1.442695, %v4151_v13 }
0x15f3   : > { %7139 = vpow2.f32 %v4152_v8 }
0x15f6   : > { %v4268_v30 = vpop.xlane.xlu1 %4267 }
0x15f7   : > { %v4269_v43 = vsub.f32 %v4265_v50, %v4268_v30 }
0x15f9   : > { %v4270_v34 = vmul.f32 1.442695, %v4269_v43 }
0x15fb   : > { %7141 = vpow2.f32 %v4270_v34 }
0x1600   : > { %v7140_v19 = vpop.eup %7139 }
0x1601   : > { %v4154_v61 = vsel %vm4147_vm8, %v7140_v19, 0.0 }
0x1602   : > { %4155 = vadd.xlane.f32.xlu0 %v4154_v61 }
0x1608   : > { %v7142_v18 = vpop.eup %7141 }
0x1609   : > { %v4272_v6 = vsel %vm4147_vm8, %v7142_v18, 0.0 }
0x160a   : > { %4273 = vadd.xlane.f32.xlu1 %v4272_v6 }
0x168b   : > { %v4156_v63 = vpop.xlane.xlu0 %4155 }
0x168c   : > { %7143 = vrcp.f32 %v4156_v63 }
0x1693   : > { %v4274_v0 = vpop.xlane.xlu1 %4273 }
0x1694   : > { %7145 = vrcp.f32 %v4274_v0 }
0x1699   : > { %v7144_v48 = vpop.eup %7143 }
0x169a   : > { %v4158_v25 = vmul.f32 %v7144_v48, %v7140_v19 }
0x169c   : > { %v4159_v60 = vpack.c.bf16 %v4158_v25, %v4158_v25  ;;  %v6926_v25 = vld [vmem:[%s8944_s23 + $0x10] sm:$0xff]  }
0x169e   : > { %6625 = vmatmul.mubr.msk.bf16.vlgmr.msra.gmra.mxu0 %vm4147_vm8, %v4159_v60  ;;  %v6927_v60 = vld [vmem:[%s8944_s23 + $0x8] sm:$0xff]  }
0x169f   : > { %6635 = vmatpush3.bf16.msra.mxu0 %v4282_v20  ;;  %6636 = vmatprep.mubr.msk.bf16.mxu0 %vm7197_vm3, %v7196_v42  ;;  %v6928_v20 = vld [vmem:[%s8944_s23] sm:$0xff]  }
0x16a0   : > { %6660 = vmatprep.subr.bf16.mxu0 %v7196_v42 }
0x16a1   : > { %v7146_v39 = vpop.eup %7145 }
0x16a2   : > { %v4276_v32 = vmul.f32 %v7146_v39, %v7142_v18  ;;  %v5966_v39 = vld [vmem:[%s8943_s22] ss:$0 sm:$0xff] }
0x16a4   : > { %v4277_v59 = vpack.c.bf16 %v4276_v32, %v4276_v32 }
0x16a6   : > { %6637 = vmatmul.mubr.msk.bf16.vlgmr.msra.gmra.mxu0 %vm4147_vm8, %v4277_v59 }
0x16a7   : > { %6661 = vmatpush3.bf16.msra.mxu0 %v6907_v3  ;;  %6676 = vmatprep.mubr.msk.bf16.mxu0 %vm7197_vm3, %v7196_v42 }
0x16a8   : > { %6662 = vmatprep.subr.bf16.mxu0 %v7196_v42 }
0x16ab   : > { %6663 = vmatpush3.bf16.msra.mxu0 %v6908_v4 }
0x16ac   : > { %6664 = vmatprep.subr.bf16.mxu0 %v7196_v42 }
0x16af   : > { %6665 = vmatpush3.bf16.msra.mxu0 %v6910_v7 }
0x16b0   : > { %6666 = vmatprep.subr.bf16.mxu0 %v7196_v42 }
0x16b3   : > { %6667 = vmatpush3.bf16.msra.mxu0 %v6912_v21 }
0x16b4   : > { %6668 = vmatprep.subr.bf16.mxu0 %v7196_v42 }
0x16b7   : > { %6669 = vmatpush3.bf16.msra.mxu0 %v6914_v22 }
0x16b8   : > { %6670 = vmatprep.subr.bf16.mxu0 %v7196_v42 }
0x16bb   : > { %6671 = vmatpush3.bf16.msra.mxu0 %v6916_v49 }
0x16bc   : > { %6672 = vmatprep.subr.bf16.mxu0 %v7196_v42 }
0x16bf   : > { %6673 = vmatpush3.bf16.msra.mxu0 %v6918_v16 }
0x16c0   : > { %6674 = vmatprep.subr.bf16.mxu0 %v7196_v42 }
0x16c3   : > { %6675 = vmatpush3.bf16.msra.mxu0 %v6920_v44 }
0x16c4   : > { %6688 = vmatprep.subr.bf16.mxu0 %v7196_v42 }
0x175e   : > { %v4201_v47 = vpop.f32.mrf.mxu0 }
0x175f   : > { %v4207_v56 = vpack.c.bf16 %v4201_v47, %v4201_v47 }
0x1760   : > { %v6626_v23 = vpop.f32.mrf.mxu0 }
0x1761   : > { %6677 = vmatmul.mubr.bf16.vlgmr.msra.gmra.mxu0 %v4207_v56 }
0x1762   : > { %v4204_v40 = vpop.f32.mrf.mxu0  ;;  %6696 = vmatprep.mubr.msk.bf16.mxu0 %vm7197_vm3, %v7196_v42  ;;  %6689 = vmatpush3.bf16.msra.mxu0 %v6925_v51 }
0x1763   : > { %6690 = vmatprep.subr.bf16.mxu0 %v7196_v42  ;;  %v5975_v40 = vld [vmem:[%s8945_s24] ss:$0 sm:$0xff] }
0x1764   : > { %v6627_v52 = vpop.f32.mrf.mxu0 }
0x1766   : > { %v4318_v54 = vpop.f32.mrf.mxu0  ;;  %6691 = vmatpush3.bf16.msra.mxu0 %v6926_v25 }
0x1767   : > { %v4324_v33 = vpack.c.bf16 %v4318_v54, %v4318_v54  ;;  %6692 = vmatprep.subr.bf16.mxu0 %v7196_v42 }
0x1768   : > { %v6638_v11 = vpop.f32.mrf.mxu0 }
0x1769   : > { %6657 = vmatmul.mubr.bf16.vlgmr.msra.gmra.mxu1 %v4324_v33 }
0x176a   : > { %v4321_v36 = vpop.f32.mrf.mxu0  ;;  %6684 = vmatprep.mubr.msk.bf16.mxu1 %vm7197_vm3, %v7196_v42  ;;  %6693 = vmatpush3.bf16.msra.mxu0 %v6927_v60 }
0x176b   : > { %6694 = vmatprep.subr.bf16.mxu0 %v7196_v42 }
0x176c   : > { %v6639_v2 = vpop.f32.mrf.mxu0 }
0x176e   : > { %6695 = vmatpush3.bf16.msra.mxu0 %v6928_v20 }
0x1821   : > { %v4512_v55 = vpop.f32.mrf.mxu0 }
0x1823   : > { %v6678_v26 = vpop.f32.mrf.mxu0 }
0x1825   : > { %v4515_v50 = vpop.f32.mrf.mxu0 }
0x1827   : > { %v6679_v17 = vpop.f32.mrf.mxu0 }
0x1829   : > { %v4424_v31 = vpop.f32.mrf.mxu1 }
0x182a   : > { %v4513_v38 = vadd.f32 %v4512_v55, %v4424_v31 }
0x182b   : > { %v6658_v13 = vpop.f32.mrf.mxu1 }
0x182c   : > { %v4518_v8 = vadd.f32 %v4513_v38, %v8479_v28  ;;  %v6923_v28 = vld [vmem:[%s8942_s21 + $0x8] sm:$0xff]   ;;  %v6934_v13 = vld [vmem:[%s8938_s17 + $0xa4] ss:$24 sps:$4 sm:$0xff]  }
0x182d   : > { %v4427_v30 = vpop.f32.mrf.mxu1  ;;  %6681 = vmatpush3.bf16.msra.mxu1 %v6923_v28  ;;  %4922 = vmatprep.subr.bf16.mxu0 %v6934_v13 }
0x182e   : > { %v4526_v43 = vadd.f32 %v5965_v37, %v4518_v8  ;;  %6682 = vmatprep.subr.bf16.mxu1 %v7196_v42  ;;  %v6931_v37 = vld [vmem:[%s8938_s17 + $0x94] ss:$24 sps:$4 sm:$0xff]   ;;  %v6929_v8 = vld [vmem:[%s8938_s17 + $0x90] ss:$24 sps:$4 sm:$0xff]   ;;  %v6932_v30 = vld [vmem:[%s8938_s17 + $0xa0] ss:$24 sps:$4 sm:$0xff]  }
0x182f   : > { %v6659_v34 = vpop.f32.mrf.mxu1 }
0x1830   : > { %4527 = vst.msk [vmem:[#allocation2] sm:$0xff] %vm920_vm2, %v4526_v43  ;;  %v6937_v43 = vld [vmem:[%s8938_s17 + $0x64] ss:$24 sps:$4 sm:$0xff]   ;;  %v6940_v34 = vld [vmem:[%s8938_s17 + $0x74] ss:$24 sps:$4 sm:$0xff]  }
0x1831   : > { %6683 = vmatpush3.bf16.msra.mxu1 %v6924_v10  ;;  %v6941_v10 = vld [vmem:[%s8938_s17 + $0x98] ss:$24 sps:$4 sm:$0xff]  }
0x1832   : > { %4840 = vmatprep.subr.bf16.mxu1 %v6931_v37 }
0x1837   : > { %v4528_v19 = vld [vmem:[#allocation2] sm:$0xff] }
0x1838   : > { %v4529_v61 = vsel %vm920_vm2, %v4528_v19, 0.0 }
0x1839   : > { %4530 = vadd.xlane.f32.xlu0 %v4529_v61  ;;  %v6938_v61 = vld [vmem:[%s8938_s17 + $0x70] ss:$24 sps:$4 sm:$0xff]  }
0x18c2   : > { %v4531_v18 = vpop.xlane.xlu0 %4530 }
0x18c3   : > { %v4532_v6 = vmul.f32 0.03125, %v4531_v18  ;;  %v6943_v18 = vld [vmem:[%s8938_s17 + $0x9c] ss:$24 sps:$4 sm:$0xff]  }
0x18c5   : > { %v4533_v62 = vsub.f32 %v4528_v19, %v4532_v6 }
0x18c7   : > { %v4534_v14 = vmul.f32 %v4533_v62, %v4533_v62 }
0x18c9   : > { %v4535_v53 = vsel %vm920_vm2, %v4534_v14, 0.0 }
0x18ca   : > { %4536 = vadd.xlane.f32.xlu1 %v4535_v53 }
0x1953   : > { %v4537_v58 = vpop.xlane.xlu1 %4536 }
0x1954   : > { %v4538_v63 = vmul.f32 0.03125, %v4537_v58 }
0x1956   : > { %v4539_v27 = vadd.f32 1e-05, %v4538_v63  ;;  %v6946_v63 = vld [vmem:[%s8938_s17 + $0x6c] ss:$24 sps:$4 sm:$0xff]  }
0x1958   : > { %7147 = vrsqrt.f32 %v4539_v27  ;;  %v6944_v27 = vld [vmem:[%s8938_s17 + $0x68] ss:$24 sps:$4 sm:$0xff]  }
0x1965   : > { %v7148_v0 = vpop.eup %7147 }
0x1966   : > { %v4541_v15 = vmul.f32 %v7148_v0, %v4533_v62  ;;  %v8741_v0 = vld [vmem:[%s8939_s18 + $0x6] sm:$0x3f] }
0x1967   : > { %v4738_v20 = vrot.slane %v8741_v0, %v7539_v41 }
0x1968   : > { %v4546_v48 = vpack.c.bf16 %v4541_v15, %v4541_v15 }
0x196a   : > { %6685 = vmatmul.mubr.msk.bf16.vlgmr.msra.gmra.mxu1 %vm920_vm2, %v4546_v48 }
0x196b   : > { %4860 = vmatprep.mubr.bf16.mxu1 %v7195_v12  ;;  %4841 = vmatpush1.bf16.msra.mxu1 %v6929_v8 }
0x196c   : > { %4842 = vmatprep.subr.bf16.mxu1 %v6937_v43 }
0x1a2a   : > { %v4603_v32 = vpop.f32.mrf.mxu1 }
0x1a2b   : > { %v4604_v3 = vadd.f32 %v5966_v39, %v4603_v32 }
0x1a2c   : > { %v6686_v59 = vpop.f32.mrf.mxu1 }
0x1a2d   : > { %v4610_v4 = vmul.f32 0.044715, %v4604_v3  ;;  %v4609_v35 = vmul.f32 0.5, %v4604_v3 }
0x1a2e   : > { %v4606_v7 = vpop.f32.mrf.mxu1 }
0x1a2f   : > { %v4611_v21 = vmul.f32 %v4610_v4, %v4604_v3  ;;  %v4746_v4 = vrot.slane %v8741_v0, %v7505_v5 }
0x1a30   : > { %v6687_v22 = vpop.f32.mrf.mxu1 }
0x1a31   : > { %v4612_v49 = vmul.f32 %v4611_v21, %v4604_v3 }
0x1a33   : > { %v4613_v16 = vadd.f32 %v4612_v49, %v4604_v3  ;;  %v4754_v3 = vrot.slane %v8741_v0, %v7545_v45 }
0x1a35   : > { %v4614_v46 = vmul.f32 0.7978846, %v4613_v16 }
0x1a37   : > { %7149 = vtanh.f32 %v4614_v46 }
0x1a44   : > { %v7150_v44 = vpop.eup %7149 }
0x1a45   : > { %v4616_v57 = vadd.f32 1.0, %v7150_v44 }
0x1a47   : > { %v4617_v47 = vmul.f32 %v4616_v57, %v4609_v35  ;;  %v4750_v35 = vrot.slane %v8741_v0, %v7566_v1 }
0x1a49   : > { %v4626_v56 = vpack.c.bf16 %v4617_v47, %v4617_v47 }
0x1a4b   : > { %6697 = vmatmul.mubr.msk.bf16.vlgmr.msra.gmra.mxu0 %vm2288_vm4, %v4626_v56 }
0x1a4c   : > { %4942 = vmatprep.mubr.bf16.mxu0 %v7195_v12  ;;  %4923 = vmatpush1.bf16.msra.mxu0 %v6932_v30 }
0x1a4d   : > { %4924 = vmatprep.subr.bf16.mxu0 %v6940_v34 }
0x1a50   : > { %4925 = vmatpush1.bf16.msra.mxu0 %v6938_v61 }
0x1a51   : > { %6706 = vmatprep.subr.bf16.mxu0 %v7196_v42 }
0x1b0b   : > { %v4688_v23 = vpop.f32.mrf.mxu0 }
0x1b0c   : > { %v4694_v52 = vadd.f32 %v4688_v23, %v4528_v19  ;;  %v6935_v19 = vld [vmem:[%s8938_s17 + $0x60] ss:$24 sps:$4 sm:$0xff]  }
0x1b0d   : > { %v6698_v54 = vpop.f32.mrf.mxu0  ;;  %4843 = vmatpush1.bf16.msra.mxu1 %v6935_v19 }
0x1b0e   : > { %v4702_v33 = vadd.f32 %v5975_v40, %v4694_v52  ;;  %4881 = vmatprep.subr.bf16.mxu1 %v6943_v18 }
0x1b0f   : > { %v4691_v11 = vpop.f32.mrf.mxu0 }
0x1b10   : > { %4703 = vst.msk [vmem:[#allocation2] sm:$0xff] %vm920_vm2, %v4702_v33 }
0x1b11   : > { %v6699_v36 = vpop.f32.mrf.mxu0 }
0x1b17   : > { %v8686_v2 = vld [vmem:[#allocation2] sm:$0xff] }
0x1b18   : > { %v4705_v55 = vsel %vm920_vm2, %v8686_v2, 0.0 }
0x1b19   : > { %4706 = vadd.xlane.f32.xlu0 %v4705_v55 }
0x1ba2   : > { %v4707_v26 = vpop.xlane.xlu0 %4706 }
0x1ba3   : > { %v4708_v50 = vmul.f32 0.03125, %v4707_v26 }
0x1ba5   : > { %v4709_v17 = vsub.f32 %v8686_v2, %v4708_v50 }
0x1ba7   : > { %v4710_v31 = vmul.f32 %v4709_v17, %v4709_v17 }
0x1ba9   : > { %v4711_v38 = vsel %vm920_vm2, %v4710_v31, 0.0 }
0x1baa   : > { %4712 = vadd.xlane.f32.xlu1 %v4711_v38 }
0x1c33   : > { %v4713_v6 = vpop.xlane.xlu1 %4712 }
0x1c34   : > { %v4714_v62 = vmul.f32 0.03125, %v4713_v6 }
0x1c36   : > { %v4715_v14 = vadd.f32 1e-05, %v4714_v62  ;;  %v6949_v62 = vld [vmem:[%s8940_s19 + $0xf8] sm:$0xff]  }
0x1c38   : > { %7151 = vrsqrt.f32 %v4715_v14  ;;  %v6951_v14 = vld [vmem:[%s8940_s19 + $0xf0] sm:$0xff]  }
0x1c45   : > { %v7152_v53 = vpop.eup %7151 }
0x1c46   : > { %v4717_v28 = vmul.f32 %v7152_v53, %v4709_v17  ;;  %v6953_v53 = vld [vmem:[%s8940_s19 + $0xe8] sm:$0xff]  }
0x1c48   : > { %v4731_v58 = vpack.c.bf16 %v4717_v28, %v4717_v28  ;;  %v6955_v28 = vld [vmem:[%s8940_s19 + $0xe0] sm:$0xff]  }
0x1c4a   : > { %6001 = vmatmul.mubr.msk.bf16.vlgmr.msra.gmra.mxu1 %vm920_vm2, %v4731_v58  ;;  %6003 = vmatmul.mubr.msk.bf16.vlgmr.msra.gmra.mxu0 %vm920_vm2, %v4731_v58 }
0x1c4b   : > { %4882 = vmatpush1.bf16.msra.mxu1 %v6941_v10  ;;  %4901 = vmatprep.mubr.bf16.mxu1 %v7195_v12  ;;  %v4742_v12 = vrot.slane %v8741_v0, %v7515_v9  ;;  %v6957_v10 = vld [vmem:[%s8940_s19 + $0xd8] sm:$0xff]  }
0x1c4c   : > { %4883 = vmatprep.subr.bf16.mxu1 %v6946_v63  ;;  %6708 = vmatprep.mubr.msk.bf16.mxu0 %vm7197_vm3, %v7196_v42  ;;  %v4758_v63 = vrot.slane %v8741_v0, %v7713_v29  ;;  %v6947_v0 = vld [vmem:[%s8940_s19 + $0xb8] sm:$0xff]  }
0x1c4f   : > { %4884 = vmatpush1.bf16.msra.mxu1 %v6944_v27 }
0x1c50   : > { %6700 = vmatprep.subr.bf16.mxu1 %v7196_v42 }
0x1c52   : > { %6002 = vmatmul.mubr.msk.bf16.vlgmr.msra.gmra.mxu1 %vm920_vm2, %v4731_v58 }
0x1c53   : > { %6702 = vmatprep.mubr.msk.bf16.mxu1 %vm7197_vm3, %v7196_v42 }
0x1d0a   : > { %v4862_v15 = vpop.f32.mrf.mxu1  ;;  %v4944_v48 = vpop.f32.mrf.mxu0 }
0x1d0b   : > { %v4863_v21 = vadd.f32 %v4862_v15, %v4738_v20  ;;  %v4945_v49 = vadd.f32 %v4944_v48, %v4754_v3  ;;  %v6950_v3 = vld [vmem:[%s8940_s19 + $0xa8] sm:$0xff]  }
0x1d0c   : > { %v4864_v51 = vpop.f32.mrf.mxu1  ;;  %v8745_v25 = vpop.f32.mrf.mxu0 }
0x1d0d   : > { %v4865_v60 = vadd.f32 %v4864_v51, %v4742_v12  ;;  %v4951_v44 = vpack.c.bf16 %v4863_v21, %v4863_v21  ;;  %v4955_v57 = vpack.c.bf16 %v4945_v49, %v4945_v49  ;;  %v4947_v12 = vadd.f32 %v8745_v25, %v4758_v63  ;;  %v6959_v21 = vld [vmem:[%s8940_s19 + $0xd0] sm:$0xff]   ;;  %v6961_v49 = vld [vmem:[%s8940_s19 + $0xc8] sm:$0xff]   ;;  %v6061_v63 = vld [vmem:[%s8943_s22 + $0x1] ss:$0 sm:$0xff] }
0x1d0e   : > { %v4866_v39 = vpop.f32.mrf.mxu1  ;;  %v4948_v32 = vpop.f32.mrf.mxu0 }
0x1d0f   : > { %v4952_v59 = vpack.c.bf16 %v4865_v60, %v4865_v60  ;;  %v4956_v48 = vpack.c.bf16 %v4947_v12, %v4947_v12  ;;  %v6948_v32 = vld [vmem:[%s8940_s19 + $0xb0] sm:$0xff]  }
0x1d10   : > { %v4867_v7 = vpop.f32.mrf.mxu1  ;;  %v4949_v9 = vpop.f32.mrf.mxu0 }
0x1d11   : > { %6701 = vmatpush3.bf16.xpose.msra.mxu1 %v4952_v59  ;;  %v5133_v20 = vsel %vm4163_vm7, %v4956_v48, 0  ;;  %v6952_v59 = vld [vmem:[%s8940_s19 + $0xa0] sm:$0xff]   ;;  %v6956_v7 = vld [vmem:[%s8940_s19 + $0x90] sm:$0xff]   ;;  %v6958_v9 = vld [vmem:[%s8940_s19 + $0x88] sm:$0xff]  }
0x1d12   : > { %v4903_v22 = vpop.f32.mrf.mxu1  ;;  %6712 = vmatprep.subr.bf16.mxu1 %v7196_v42 }
0x1d13   : > { %v4904_v16 = vadd.f32 %v4903_v22, %v4746_v4  ;;  %v6954_v4 = vld [vmem:[%s8940_s19 + $0x98] sm:$0xff]   ;;  %v6960_v22 = vld [vmem:[%s8940_s19 + $0x80] sm:$0xff]  }
0x1d14   : > { %v4905_v46 = vpop.f32.mrf.mxu1 }
0x1d15   : > { %v4953_v41 = vpack.c.bf16 %v4904_v16, %v4904_v16  ;;  %v4906_v56 = vadd.f32 %v4905_v46, %v4750_v35  ;;  %v6962_v16 = vld [vmem:[%s8940_s19 + $0xc0] sm:$0xff]  }
0x1d16   : > { %v4907_v45 = vpop.f32.mrf.mxu1 }
0x1d17   : > { %v5015_v47 = vsel %vm4163_vm7, %v4953_v41, 0  ;;  %v4954_v23 = vpack.c.bf16 %v4906_v56, %v4906_v56 }
0x1d18   : > { %v4908_v5 = vpop.f32.mrf.mxu1  ;;  %6703 = vmatmul.mubr.bf16.vlgmr.msra.gmra.mxu1 %v4951_v44  ;;  %6707 = vmatpush3.bf16.msra.mxu0 %v5015_v47 }
0x1d19   : > { %6713 = vmatpush3.bf16.xpose.msra.mxu1 %v4955_v57  ;;  %6714 = vmatprep.mubr.msk.bf16.mxu1 %vm7197_vm3, %v7196_v42 }
0x1d1a   : > { %6718 = vmatprep.subr.bf16.mxu0 %v7196_v42  ;;  %6724 = vmatprep.subr.bf16.mxu1 %v7196_v42 }
0x1d20   : > { %6715 = vmatmul.mubr.bf16.vlgmr.msra.gmra.mxu1 %v4954_v23 }
0x1d21   : > { %6740 = vmatprep.mubr.msk.bf16.mxu1 %vm7197_vm3, %v7196_v42  ;;  %6725 = vmatpush3.bf16.msra.mxu1 %v6949_v62 }
0x1d22   : > { %6726 = vmatprep.subr.bf16.mxu1 %v7196_v42 }
0x1d25   : > { %6727 = vmatpush3.bf16.msra.mxu1 %v6951_v14 }
0x1d26   : > { %6728 = vmatprep.subr.bf16.mxu1 %v7196_v42 }
0x1d29   : > { %6729 = vmatpush3.bf16.msra.mxu1 %v6953_v53  ;;  %v6965_v53 = vld [vmem:[%s8944_s23 + $0x38] sm:$0xff]  }
0x1d2a   : > { %6730 = vmatprep.subr.bf16.mxu1 %v7196_v42 }
0x1d2d   : > { %6731 = vmatpush3.bf16.msra.mxu1 %v6955_v28  ;;  %v6966_v28 = vld [vmem:[%s8944_s23 + $0x30] sm:$0xff]  }
0x1d2e   : > { %6732 = vmatprep.subr.bf16.mxu1 %v7196_v42 }
0x1d31   : > { %6733 = vmatpush3.bf16.msra.mxu1 %v6957_v10  ;;  %v6967_v10 = vld [vmem:[%s8944_s23 + $0x28] sm:$0xff]  }
0x1d32   : > { %6734 = vmatprep.subr.bf16.mxu1 %v7196_v42 }
0x1d35   : > { %6735 = vmatpush3.bf16.msra.mxu1 %v6959_v21  ;;  %v5562_v21 = vld [vmem:[%s8946_s25 + $0x8] sm:$0xff] }
0x1d36   : > { %6736 = vmatprep.subr.bf16.mxu1 %v7196_v42 }
0x1d39   : > { %6737 = vmatpush3.bf16.msra.mxu1 %v6961_v49 }
0x1d3a   : > { %6738 = vmatprep.subr.bf16.mxu1 %v7196_v42 }
0x1d3d   : > { %6739 = vmatpush3.bf16.msra.mxu1 %v6962_v16  ;;  %v6079_v16 = vld [vmem:[%s8945_s24 + $0x1] ss:$0 sm:$0xff] }
0x1d3e   : > { %6764 = vmatprep.subr.bf16.mxu1 %v7196_v42 }
0x1dd8   : > { %v4991_v1 = vpop.f32.mrf.mxu1 }
0x1dd9   : > { %v4997_v40 = vmul.f32 0.25, %v4991_v1 }
0x1dda   : > { %v6704_v52 = vpop.f32.mrf.mxu1 }
0x1ddb   : > { %v4998_v54 = vadd.f32 %v4997_v40, %v8559_v24 }
0x1ddc   : > { %v4994_v33 = vpop.f32.mrf.mxu1 }
0x1ddd   : > { %v4999_v11 = vsel %vm4147_vm8, %v4998_v54, -inf }
0x1dde   : > { %5000 = vmax.xlane.f32.xlu0 %v4999_v11  ;;  %v6705_v36 = vpop.f32.mrf.mxu1 }
0x1ddf   : > { %v6055_v36 = vld [vmem:[%s8941_s20 + $0x1] ss:$0 sm:$0xff] }
0x1de0   : > { %v5109_v55 = vpop.f32.mrf.mxu1 }
0x1de1   : > { %v5115_v26 = vmul.f32 0.25, %v5109_v55 }
0x1de2   : > { %v6716_v50 = vpop.f32.mrf.mxu1 }
0x1de3   : > { %v5116_v17 = vadd.f32 %v5115_v26, %v8559_v24 }
0x1de4   : > { %v5112_v31 = vpop.f32.mrf.mxu1 }
0x1de5   : > { %v5117_v38 = vsel %vm4147_vm8, %v5116_v17, -inf }
0x1de6   : > { %5118 = vmax.xlane.f32.xlu1 %v5117_v38  ;;  %v6717_v37 = vpop.f32.mrf.mxu1 }
0x1e67   : > { %v5001_v13 = vpop.xlane.xlu0 %5000 }
0x1e68   : > { %v5002_v8 = vsub.f32 %v4998_v54, %v5001_v13 }
0x1e6a   : > { %v5003_v30 = vmul.f32 1.442695, %v5002_v8 }
0x1e6c   : > { %7153 = vpow2.f32 %v5003_v30 }
0x1e6f   : > { %v5119_v43 = vpop.xlane.xlu1 %5118 }
0x1e70   : > { %v5120_v34 = vsub.f32 %v5116_v17, %v5119_v43 }
0x1e72   : > { %v5121_v19 = vmul.f32 1.442695, %v5120_v34 }
0x1e74   : > { %7155 = vpow2.f32 %v5121_v19  ;;  %v6964_v19 = vld [vmem:[%s8942_s21 + $0x10] sm:$0xff]  }
0x1e79   : > { %v7154_v61 = vpop.eup %7153 }
0x1e7a   : > { %v5005_v18 = vsel %vm4147_vm8, %v7154_v61, 0.0 }
0x1e7b   : > { %5006 = vadd.xlane.f32.xlu0 %v5005_v18 }
0x1e81   : > { %v7156_v6 = vpop.eup %7155 }
0x1e82   : > { %v5123_v24 = vsel %vm4147_vm8, %v7156_v6, 0.0 }
0x1e83   : > { %5124 = vadd.xlane.f32.xlu1 %v5123_v24 }
0x1f04   : > { %v5007_v58 = vpop.xlane.xlu0 %5006 }
0x1f05   : > { %7157 = vrcp.f32 %v5007_v58  ;;  %v6968_v58 = vld [vmem:[%s8944_s23 + $0x20] sm:$0xff]  }
0x1f0c   : > { %v5125_v27 = vpop.xlane.xlu1 %5124 }
0x1f0d   : > { %7159 = vrcp.f32 %v5125_v27 }
0x1f12   : > { %v7158_v15 = vpop.eup %7157 }
0x1f13   : > { %v5009_v51 = vmul.f32 %v7158_v15, %v7154_v61 }
0x1f15   : > { %v5010_v60 = vpack.c.bf16 %v5009_v51, %v5009_v51 }
0x1f17   : > { %6709 = vmatmul.mubr.msk.bf16.vlgmr.msra.gmra.mxu0 %vm4147_vm8, %v5010_v60 }
0x1f18   : > { %6719 = vmatpush3.bf16.msra.mxu0 %v5133_v20  ;;  %6720 = vmatprep.mubr.msk.bf16.mxu0 %vm7197_vm3, %v7196_v42 }
0x1f19   : > { %6744 = vmatprep.subr.bf16.mxu0 %v7196_v42 }
0x1f1a   : > { %v7160_v39 = vpop.eup %7159 }
0x1f1b   : > { %v5127_v29 = vmul.f32 %v7160_v39, %v7156_v6 }
0x1f1d   : > { %v5128_v25 = vpack.c.bf16 %v5127_v29, %v5127_v29 }
0x1f1f   : > { %6721 = vmatmul.mubr.msk.bf16.vlgmr.msra.gmra.mxu0 %vm4147_vm8, %v5128_v25 }
0x1f20   : > { %6745 = vmatpush3.bf16.msra.mxu0 %v6947_v0  ;;  %6760 = vmatprep.mubr.msk.bf16.mxu0 %vm7197_vm3, %v7196_v42 }
0x1f21   : > { %6746 = vmatprep.subr.bf16.mxu0 %v7196_v42 }
0x1f24   : > { %6747 = vmatpush3.bf16.msra.mxu0 %v6948_v32 }
0x1f25   : > { %6748 = vmatprep.subr.bf16.mxu0 %v7196_v42 }
0x1f28   : > { %6749 = vmatpush3.bf16.msra.mxu0 %v6950_v3 }
0x1f29   : > { %6750 = vmatprep.subr.bf16.mxu0 %v7196_v42 }
0x1f2c   : > { %6751 = vmatpush3.bf16.msra.mxu0 %v6952_v59 }
0x1f2d   : > { %6752 = vmatprep.subr.bf16.mxu0 %v7196_v42 }
0x1f30   : > { %6753 = vmatpush3.bf16.msra.mxu0 %v6954_v4 }
0x1f31   : > { %6754 = vmatprep.subr.bf16.mxu0 %v7196_v42 }
0x1f34   : > { %6755 = vmatpush3.bf16.msra.mxu0 %v6956_v7  ;;  %v5564_v7 = vld [vmem:[%s8946_s25 + $0x18] sm:$0xff] }
0x1f35   : > { %6756 = vmatprep.subr.bf16.mxu0 %v7196_v42 }
0x1f38   : > { %6757 = vmatpush3.bf16.msra.mxu0 %v6958_v9  ;;  %v5563_v9 = vld [vmem:[%s8946_s25 + $0x10] sm:$0xff] }
0x1f39   : > { %6758 = vmatprep.subr.bf16.mxu0 %v7196_v42 }
0x1f3c   : > { %6759 = vmatpush3.bf16.msra.mxu0 %v6960_v22  ;;  %v5561_v22 = vld [vmem:[%s8946_s25] sm:$0xff] }
0x1f3d   : > { %6772 = vmatprep.subr.bf16.mxu0 %v7196_v42 }
0x1fd7   : > { %v5051_v46 = vpop.f32.mrf.mxu0 }
0x1fd8   : > { %v5057_v41 = vpack.c.bf16 %v5051_v46, %v5051_v46 }
0x1fd9   : > { %v6710_v44 = vpop.f32.mrf.mxu0 }
0x1fda   : > { %6761 = vmatmul.mubr.bf16.vlgmr.msra.gmra.mxu0 %v5057_v41 }
0x1fdb   : > { %v5054_v35 = vpop.f32.mrf.mxu0  ;;  %6780 = vmatprep.mubr.msk.bf16.mxu0 %vm7197_vm3, %v7196_v42  ;;  %6773 = vmatpush3.bf16.msra.mxu0 %v6965_v53 }
0x1fdc   : > { %6774 = vmatprep.subr.bf16.mxu0 %v7196_v42 }
0x1fdd   : > { %v6711_v45 = vpop.f32.mrf.mxu0 }
0x1fdf   : > { %v5169_v57 = vpop.f32.mrf.mxu0  ;;  %6775 = vmatpush3.bf16.msra.mxu0 %v6966_v28 }
0x1fe0   : > { %v5175_v47 = vpack.c.bf16 %v5169_v57, %v5169_v57  ;;  %6776 = vmatprep.subr.bf16.mxu0 %v7196_v42 }
0x1fe1   : > { %v6722_v5 = vpop.f32.mrf.mxu0 }
0x1fe2   : > { %6741 = vmatmul.mubr.bf16.vlgmr.msra.gmra.mxu1 %v5175_v47 }
0x1fe3   : > { %v5172_v56 = vpop.f32.mrf.mxu0  ;;  %6768 = vmatprep.mubr.msk.bf16.mxu1 %vm7197_vm3, %v7196_v42  ;;  %6777 = vmatpush3.bf16.msra.mxu0 %v6967_v10 }
0x1fe4   : > { %6778 = vmatprep.subr.bf16.mxu0 %v7196_v42 }
0x1fe5   : > { %v6723_v23 = vpop.f32.mrf.mxu0 }
0x1fe7   : > { %6779 = vmatpush3.bf16.msra.mxu0 %v6968_v58 }
0x209a   : > { %v5363_v1 = vpop.f32.mrf.mxu0 }
0x209c   : > { %v6762_v40 = vpop.f32.mrf.mxu0 }
0x209e   : > { %v5366_v52 = vpop.f32.mrf.mxu0 }
0x20a0   : > { %v6763_v54 = vpop.f32.mrf.mxu0 }
0x20a2   : > { %v5275_v33 = vpop.f32.mrf.mxu1 }
0x20a3   : > { %v5364_v11 = vadd.f32 %v5363_v1, %v5275_v33 }
0x20a4   : > { %v6742_v55 = vpop.f32.mrf.mxu1 }
0x20a5   : > { %v5369_v26 = vadd.f32 %v5364_v11, %v8686_v2  ;;  %v6963_v2 = vld [vmem:[%s8942_s21 + $0x18] sm:$0xff]  }
0x20a6   : > { %v5278_v50 = vpop.f32.mrf.mxu1  ;;  %6765 = vmatpush3.bf16.msra.mxu1 %v6963_v2 }
0x20a7   : > { %v5378_v17 = vadd.f32 %v6055_v36, %v5369_v26  ;;  %6766 = vmatprep.subr.bf16.mxu1 %v7196_v42 }
0x20a8   : > { %v6743_v31 = vpop.f32.mrf.mxu1 }
0x20a9   : > { %5379 = vst.msk [vmem:[#allocation2] sm:$0xff] %vm920_vm2, %v5378_v17 }
0x20aa   : > { %6767 = vmatpush3.bf16.msra.mxu1 %v6964_v19 }
0x20ab   : > { %6784 = vmatprep.subr.mxu1 %v7196_v42 }
0x20b0   : > { %v8853_v38 = vld [vmem:[#allocation2] sm:$0xff] }
0x20b1   : > { %v5381_v37 = vsel %vm920_vm2, %v8853_v38, 0.0 }
0x20b2   : > { %5382 = vadd.xlane.f32.xlu0 %v5381_v37 }
0x213b   : > { %v5383_v13 = vpop.xlane.xlu0 %5382 }
0x213c   : > { %v5384_v8 = vmul.f32 0.03125, %v5383_v13 }
0x213e   : > { %v5385_v30 = vsub.f32 %v8853_v38, %v5384_v8 }
0x2140   : > { %v5386_v43 = vmul.f32 %v5385_v30, %v5385_v30 }
0x2142   : > { %v5387_v34 = vsel %vm920_vm2, %v5386_v43, 0.0 }
0x2143   : > { %5388 = vadd.xlane.f32.xlu1 %v5387_v34 }
0x21cc   : > { %v5389_v61 = vpop.xlane.xlu1 %5388 }
0x21cd   : > { %v5390_v18 = vmul.f32 0.03125, %v5389_v61 }
0x21cf   : > { %v5391_v6 = vadd.f32 1e-05, %v5390_v18 }
0x21d1   : > { %7161 = vrsqrt.f32 %v5391_v6 }
0x21de   : > { %v7162_v24 = vpop.eup %7161 }
0x21df   : > { %v5393_v62 = vmul.f32 %v7162_v24, %v5385_v30 }
0x21e1   : > { %v5399_v14 = vpack.c.bf16 %v5393_v62, %v5393_v62 }
0x21e3   : > { %6769 = vmatmul.mubr.msk.bf16.vlgmr.msra.gmra.mxu1 %vm920_vm2, %v5399_v14 }
0x21e4   : > { %6792 = vmatprep.mubr.msk.f32.mxu1 %vm7197_vm3, %v7196_v42  ;;  %6785 = vmatpush3.msra.mxu1 %v5564_v7 }
0x21e5   : > { %6786 = vmatprep.subr.mxu1 %v7196_v42 }
0x21e6   : > { %6787 = vmatpush3.msra.mxu1 %v5563_v9 }
0x21e7   : > { %6788 = vmatprep.subr.mxu1 %v7196_v42 }
0x21e8   : > { %6789 = vmatpush3.msra.mxu1 %v5562_v21 }
0x21e9   : > { %6790 = vmatprep.subr.mxu1 %v7196_v42  ;;  %v5565_v42 = vld [vmem:[%s8947_s26] sm:$0x1] }
0x21ea   : > { %6791 = vmatpush3.msra.mxu1 %v5561_v22 }
0x22a3   : > { %v5457_v27 = vpop.f32.mrf.mxu1 }
0x22a4   : > { %v5458_v12 = vadd.f32 %v6061_v63, %v5457_v27 }
0x22a5   : > { %v6770_v15 = vpop.f32.mrf.mxu1 }
0x22a6   : > { %v5464_v48 = vmul.f32 0.044715, %v5458_v12  ;;  %v5463_v32 = vmul.f32 0.5, %v5458_v12 }
0x22a7   : > { %v5460_v51 = vpop.f32.mrf.mxu1 }
0x22a8   : > { %v5465_v60 = vmul.f32 %v5464_v48, %v5458_v12 }
0x22a9   : > { %v6771_v20 = vpop.f32.mrf.mxu1 }
0x22aa   : > { %v5466_v39 = vmul.f32 %v5465_v60, %v5458_v12 }
0x22ac   : > { %v5467_v29 = vadd.f32 %v5466_v39, %v5458_v12 }
0x22ae   : > { %v5468_v0 = vmul.f32 0.7978846, %v5467_v29 }
0x22b0   : > { %7163 = vtanh.f32 %v5468_v0 }
0x22bd   : > { %v7164_v25 = vpop.eup %7163 }
0x22be   : > { %v5470_v3 = vadd.f32 1.0, %v7164_v25 }
0x22c0   : > { %v5471_v59 = vmul.f32 %v5470_v3, %v5463_v32 }
0x22c2   : > { %v5481_v4 = vpack.c.bf16 %v5471_v59, %v5471_v59 }
0x22c4   : > { %6781 = vmatmul.mubr.msk.bf16.vlgmr.msra.gmra.mxu0 %vm2288_vm4, %v5481_v4 }
0x2384   : > { %v5543_v49 = vpop.f32.mrf.mxu0 }
0x2385   : > { %v5549_v46 = vadd.f32 %v5543_v49, %v8853_v38 }
0x2386   : > { %v6782_v41 = vpop.f32.mrf.mxu0 }
0x2387   : > { %v5558_v44 = vadd.f32 %v6079_v16, %v5549_v46 }
0x2388   : > { %v5546_v35 = vpop.f32.mrf.mxu0 }
0x2389   : > { %5559 = vst.msk [vmem:[#allocation2] sm:$0xff] %vm920_vm2, %v5558_v44 }
0x238a   : > { %v6783_v45 = vpop.f32.mrf.mxu0 }
0x2390   : > { %v5560_v57 = vld [vmem:[#allocation2 + $0x2] sm:$0x1] }
0x2391   : > { %6793 = vmatmul.mubr.msk.f32.vlgmr.msra.gmra.mxu1 %vm920_vm2, %v5560_v57 }
0x2451   : > { %v5635_v47 = vpop.f32.mrf.mxu1 }
0x2452   : > { %v5636_v5 = vadd.f32 %v5635_v47, %v5565_v42 }
0x2453   : > { %v6794_v56 = vpop.f32.mrf.mxu1 }
0x2454   : > { %v5640_v23 = vsel %vm5639_vm9, %v5636_v5, -inf }
0x2455   : > { %5641 = vmax.xlane.f32.xlu0 %v5640_v23 }
0x24de   : > { %v5642_v1 = vpop.xlane.xlu0 %5641 }
0x24df   : > { %v5643_v40 = vsub.f32 %v5636_v5, %v5642_v1 }
0x24e1   : > { %v5644_v52 = vmul.f32 1.442695, %v5643_v40 }
0x24e3   : > { %7165 = vpow2.f32 %v5644_v52 }
0x24f0   : > { %v7166_v54 = vpop.eup %7165 }
0x24f1   : > { %v5646_v33 = vsel %vm5639_vm9, %v7166_v54, 0.0 }
0x24f2   : > { %5647 = vadd.xlane.f32.xlu1 %v5646_v33 }
0x257b   : > { %v5648_v11 = vpop.xlane.xlu1 %5647 }
0x257c   : > { %7167 = vlog2.f32 %v5648_v11 }
0x2589   : > { %v7168_v36 = vpop.eup %7167 }
0x258a   : > { %v5650_v55 = vmul.f32 0.6931472, %v7168_v36 }
0x258c   : > { %v5651_v26 = vsub.f32 %v5643_v40, %v5650_v55 }
0x258e   : > { %v5653_v50 = vsel %vm5652_vm10, %v5651_v26, 0.0 }
0x258f   : > { %v5654_v17 = vsel %vm916_vm1, %v5653_v50, 0.0 }
0x2590   : > { %5655 = vst [vmem:[%s816_s30] sm:$0xff] %v5654_v17 }
0x2591 PF: > { %s8990_s5 = sld [smem:[#allocation3_spill]] }
0x2597   : > { %s37_s7 = sadd.s32 1, %s8990_s5  }
0x2598   : > { %p34_p4 = scmp.ge.s32.totalorder %s37_s7, 4  }
0x259a   :  { %36 = sbr.rel (!%p34_p4) target bundleno = 14 (0xe), region = 178 }

</bundles_post_ra>
